<compile_context>
chip_gen: v6e
topology: v6e:2x2x1
jax: 0.10.0
libtpu: 0.0.40
codegen_flags: <defaults>
</compile_context>

<pallas_src>
import jax
import jax.numpy as jnp
from jax import lax
from jax.experimental import pallas as pl
from jax.experimental.pallas import tpu as pltpu

EPS = 1e-5
META_DIM = 73
META_PAD = 128          # metadata features padded to a full lane width
FEAT_DIM = 1792         # efficientnet-b4 head channels
STEM_CH = 48            # efficientnet-b4 stem channels
STEM_CH_PAD = 64        # stem channels padded for MXU / lane friendliness
K_IM2COL = 27           # 3x3 conv over 3 input channels
K_PAD = 32              # contraction dim padded
FUSE_TK = 256           # contraction block width for the fused meta/fc kernel


def _device_profile():
    """Returns (use_bf16_elementwise, spatial_tile_cap, vmem_limit_bytes)."""
    try:
        kind = jax.devices()[0].device_kind.lower()
    except Exception:
        kind = ""
    if any(v in kind for v in ("v2", "v3", "v4", "v5")):
        # v5e & older: no bf16 VPU/EUP; 128 MiB physical VMEM -> bigger limit.
        return False, 1024, 64 * 1024 * 1024
    # v6e / v7x: bf16 VPU/EUP; keep scoped limit <= 48 MiB (v7x: 64 MiB phys).
    return True, 1024, 48 * 1024 * 1024


def _swish_f32(x):
    # EUP exp + approx reciprocal keeps the divide off the VALU slot.
    return x * pl.reciprocal(1.0 + jnp.exp(-x), approx=True)


def _swish_bf16(x):
    return x * jax.nn.sigmoid(x)


# ----------------------------------------------------------------------------
# Fused stem conv + 1x1 head + BN + swish + global average pool (gridded)
# ----------------------------------------------------------------------------
def _make_stem_head_pool_kernel(tile, n_inner, hw_valid, mask_rows, use_bf16):
    inv_hw = 1.0 / float(hw_valid)

    def kernel(p_ref, ws_ref, sh0_ref, wh_ref, sh1_ref, o_ref, acc_ref):
        si = pl.program_id(2)

        @pl.when(si == 0)
        def _init():
            acc_ref[...] = jnp.zeros_like(acc_ref)

        # stem conv as matmul (BN scale folded into ws), + shift, swish
        h = jnp.dot(p_ref[...], ws_ref[...], preferred_element_type=jnp.float32)
        h = h + sh0_ref[...]
        if use_bf16:
            h = _swish_bf16(h.astype(jnp.bfloat16))
        else:
            h = _swish_f32(h).astype(jnp.bfloat16)

        # 1x1 conv head (BN scale folded into wh), + shift, swish
        h2 = jnp.dot(h, wh_ref[...], preferred_element_type=jnp.float32)
        h2 = h2 + sh1_ref[...]
        if use_bf16:
            h2f = _swish_bf16(h2.astype(jnp.bfloat16)).astype(jnp.float32)
        else:
            h2f = _swish_f32(h2)

        def _accumulate(v):
            # per-sublane partial sums: pure vreg adds, no per-step XLU reduce
            acc_ref[...] += jnp.sum(v.reshape(tile // 8, 8, FEAT_DIM), axis=0)

        if mask_rows:
            # only boundary / fully padded tiles pay for the mask
            gidx = pl.program_id(1) * n_inner + si
            on_boundary = (gidx + 1) * tile > hw_valid

            @pl.when(jnp.logical_not(on_boundary))
            def _plain():
                _accumulate(h2f)

            @pl.when(on_boundary)
            def _masked():
                row = gidx * tile + lax.broadcasted_iota(jnp.int32, (tile, 1), 0)
                _accumulate(jnp.where(row < hw_valid, h2f, 0.0))
        else:
            _accumulate(h2f)

        @pl.when(si == pl.num_programs(2) - 1)
        def _finalize():
            # 8 -> 1 cross-sublane reduce + global-average-pool scaling, once
            # per (batch, outer-spatial) chunk.
            o_ref[...] = jnp.sum(acc_ref[...], axis=0, keepdims=True) * inv_hw

    return kernel


def _stem_head_pool(patches, w_stem, sh0, w_head, sh1, *,
                    tile, n_outer, n_inner, hw_valid, use_bf16, vmem_limit):
    """patches: (B, HW_pad, K_PAD) bf16 -> pooled features (B, FEAT_DIM) f32."""
    B, hw_pad, kp = patches.shape
    mask_rows = hw_pad != hw_valid
    kernel = _make_stem_head_pool_kernel(tile, n_inner, hw_valid, mask_rows,
                                         use_bf16)

    out = pl.pallas_call(
        kernel,
        out_shape=jax.ShapeDtypeStruct((B, n_outer, 1, FEAT_DIM), jnp.float32),
        grid_spec=pltpu.PrefetchScalarGridSpec(
            num_scalar_prefetch=0,
            grid=(B, n_outer, n_inner),
            in_specs=[
                # streamed activation tile (the only per-step operand)
                pl.BlockSpec((None, tile, kp),
                             lambda b, so, si: (b, so * n_inner + si, 0)),
                # weights / BN shifts: constant index_map -> stay resident
                pl.BlockSpec((kp, STEM_CH_PAD), lambda b, so, si: (0, 0)),
                pl.BlockSpec((1, STEM_CH_PAD), lambda b, so, si: (0, 0)),
                pl.BlockSpec((STEM_CH_PAD, FEAT_DIM), lambda b, so, si: (0, 0)),
                pl.BlockSpec((1, FEAT_DIM), lambda b, so, si: (0, 0)),
            ],
            out_specs=pl.BlockSpec((None, None, 1, FEAT_DIM),
                                   lambda b, so, si: (b, so, 0, 0)),
            scratch_shapes=[pltpu.VMEM((8, FEAT_DIM), jnp.float32)],
        ),
        compiler_params=pltpu.CompilerParams(
            dimension_semantics=("parallel", "parallel", "arbitrary"),
            vmem_limit_bytes=vmem_limit),
    )(patches, w_stem, sh0, w_head, sh1)
    # finish the tiny cross-outer reduction outside the kernel
    return out.reshape(B, n_outer, FEAT_DIM).sum(axis=1)


# ----------------------------------------------------------------------------
# meta_fusion gate + fc_block + classifier, gridded over the 1792 contraction
# of the first fc layer so the big weights stream through the pipeline.
# ----------------------------------------------------------------------------
def _fusion_mlp_kernel(feat_ref, meta_ref, wg_ref, bg_ref,
                       w1_ref, b1_ref, w2_ref, b2_ref, w3_ref, b3_ref,
                       wc_ref, bc_ref, o_ref, h1_acc):
    k = pl.program_id(0)

    @pl.when(k == 0)
    def _init():
        h1_acc[...] = jnp.zeros_like(h1_acc)

    # meta_fusion: sigmoid gate over this 256-wide block of image features.
    # TODO(synk): exact meta_fusion definition is external; implemented as
    # feat * sigmoid(meta @ Wg + bg).
    z = jnp.dot(meta_ref[...], wg_ref[...],
                preferred_element_type=jnp.float32) + bg_ref[...]
    gate = pl.reciprocal(1.0 + jnp.exp(-z), approx=True)
    gf = (feat_ref[...] * gate).astype(jnp.bfloat16)

    # partial first fc layer (BN scale folded into w1); w1 streams in
    # 256-row blocks so its 3.5 MiB pipelines across grid steps.
    h1_acc[...] += jnp.dot(gf, w1_ref[...], preferred_element_type=jnp.float32)

    @pl.when(k == pl.num_programs(0) - 1)
    def _tail():
        # Dropout == identity in eval mode; BN folded into weights/bias.
        h1 = jnp.maximum(h1_acc[...] + b1_ref[...], 0.0).astype(jnp.bfloat16)
        h2 = jnp.maximum(
            jnp.dot(h1, w2_ref[...], preferred_element_type=jnp.float32)
            + b2_ref[...], 0.0)
        h3 = jnp.maximum(
            jnp.dot(h2.astype(jnp.bfloat16), w3_ref[...],
                    preferred_element_type=jnp.float32) + b3_ref[...], 0.0)
        o_ref[...] = (jnp.dot(h3.astype(jnp.bfloat16), wc_ref[...],
                              preferred_element_type=jnp.float32) + bc_ref[...])


def _fusion_head(feat, meta_p, p, *, vmem_limit):
    B = feat.shape[0]
    cls_pad = p['wc'].shape[1]
    tk = FUSE_TK
    nk = FEAT_DIM // tk
    const = lambda k: (0, 0)
    return pl.pallas_call(
        _fusion_mlp_kernel,
        out_shape=jax.ShapeDtypeStruct((B, cls_pad), jnp.float32),
        grid_spec=pltpu.PrefetchScalarGridSpec(
            num_scalar_prefetch=0,
            grid=(nk,),
            in_specs=[
                pl.BlockSpec((B, tk), lambda k: (0, k)),          # feat block
                pl.BlockSpec((B, META_PAD), const),               # metadata
                pl.BlockSpec((META_PAD, tk), lambda k: (0, k)),   # gate weight
                pl.BlockSpec((1, tk), lambda k: (0, k)),          # gate bias
                pl.BlockSpec((tk, 1024), lambda k: (k, 0)),       # fc1 w block
                pl.BlockSpec((1, 1024), const),                   # fc1 bias
                pl.BlockSpec((1024, 512), const),
                pl.BlockSpec((1, 512), const),
                pl.BlockSpec((512, 256), const),
                pl.BlockSpec((1, 256), const),
                pl.BlockSpec((256, cls_pad), const),              # classifier
                pl.BlockSpec((1, cls_pad), const),
            ],
            out_specs=pl.BlockSpec((B, cls_pad), const),          # lane-dense
            scratch_shapes=[pltpu.VMEM((B, 1024), jnp.float32)],
        ),
        compiler_params=pltpu.CompilerParams(
            dimension_semantics=("arbitrary",),
            vmem_limit_bytes=vmem_limit),
    )(feat, meta_p, p['wg'], p['bg'], p['w1'], p['b1'],
      p['w2'], p['b2'], p['w3'], p['b3'], p['wc'], p['bc'])


# ----------------------------------------------------------------------------
# Parameter setup (deterministic synthetic init, BN folded) and glue
# ----------------------------------------------------------------------------
def _bn_scale_shift(n):
    gamma = jnp.ones((n,), jnp.float32)
    beta = jnp.zeros((n,), jnp.float32)
    mean = jnp.zeros((n,), jnp.float32)
    var = jnp.ones((n,), jnp.float32)
    scale = gamma / jnp.sqrt(var + EPS)
    shift = beta - mean * scale
    return scale, shift


def init_params(key, num_classes):
    ks = jax.random.split(key, 8)

    def kaiming(k, shape, fan_in):
        return jax.random.normal(k, shape, jnp.float32) * jnp.sqrt(2.0 / fan_in)

    p = {}
    # --- stem conv (BN scale folded into the weight columns) ----------------
    s0, t0 = _bn_scale_shift(STEM_CH)
    w_stem = kaiming(ks[0], (K_IM2COL, STEM_CH), K_IM2COL) * s0[None, :]
    p['w_stem'] = jnp.pad(
        w_stem, ((0, K_PAD - K_IM2COL), (0, STEM_CH_PAD - STEM_CH))
    ).astype(jnp.bfloat16)
    p['bn0_shift'] = jnp.pad(t0, (0, STEM_CH_PAD - STEM_CH)).reshape(1, -1)

    # --- 1x1 conv head (BN scale folded) -------------------------------------
    s1, t1 = _bn_scale_shift(FEAT_DIM)
    w_head = kaiming(ks[1], (STEM_CH, FEAT_DIM), STEM_CH) * s1[None, :]
    p['w_head'] = jnp.pad(
        w_head, ((0, STEM_CH_PAD - STEM_CH), (0, 0))).astype(jnp.bfloat16)
    p['bn1_shift'] = t1.reshape(1, -1)

    # --- meta_fusion gate (73 -> 1792), rows zero-padded to 128 ---------------
    wg = kaiming(ks[2], (META_DIM, FEAT_DIM), META_DIM)
    p['wg'] = jnp.pad(wg, ((0, META_PAD - META_DIM), (0, 0))).astype(jnp.bfloat16)
    p['bg'] = jnp.zeros((1, FEAT_DIM), jnp.float32)

    # --- fc_block: Linear + BatchNorm1d(eval, folded) + ReLU ------------------
    def fc(k, din, dout):
        w = kaiming(k, (din, dout), din)
        b = jnp.zeros((dout,), jnp.float32)
        s, t = _bn_scale_shift(dout)
        return (w * s[None, :]).astype(jnp.bfloat16), (b * s + t).reshape(1, -1)

    p['w1'], p['b1'] = fc(ks[3], FEAT_DIM, 1024)
    p['w2'], p['b2'] = fc(ks[4], 1024, 512)
    p['w3'], p['b3'] = fc(ks[5], 512, 256)

    # --- classifier, padded to a full 128-lane output block -------------------
    cls_pad = ((num_classes + 127) // 128) * 128
    wc = kaiming(ks[6], (256, num_classes), 256)
    p['wc'] = jnp.pad(wc, ((0, 0), (0, cls_pad - num_classes))).astype(jnp.bfloat16)
    p['bc'] = jnp.zeros((1, cls_pad), jnp.float32)
    return p


def _im2col_3x3_s2_same(x_nhwc):
    """3x3 / stride-2 TF-SAME im2col: (B,H,W,C) -> (B, Ho*Wo, 9*C).

    TF-SAME (pad lo=0, hi=1) matches EfficientNet's Conv2dStaticSamePadding
    stem (torch Conv2d(padding=1) would shift the taps by one pixel)."""
    B, H, W, C = x_nhwc.shape
    Ho, Wo = H // 2, W // 2
    xp = jnp.pad(x_nhwc, ((0, 0), (0, 1), (0, 1), (0, 0)))
    taps = [xp[:, dy:dy + H:2, dx:dx + W:2, :]
            for dy in range(3) for dx in range(3)]
    patches = jnp.stack(taps, axis=-2)                        # (B, Ho, Wo, 9, C)
    return patches.reshape(B, Ho * Wo, 9 * C), Ho * Wo


def _choose_spatial_tile(hw, cap):
    if hw >= cap:
        return cap
    # small inputs: use a few tiles so the streamed reduction (and the
    # boundary-mask / dual-core paths) still get exercised
    return max(8, (((hw + 2) // 3 + 7) // 8) * 8)


def _forward(params, x_nchw, meta, *, num_classes):
    p = params
    use_bf16, tile_cap, vmem_limit = _device_profile()
    x = jnp.transpose(x_nchw, (0, 2, 3, 1))                   # NCHW -> NHWC

    # ---- backbone stand-in ---------------------------------------------------
    # TODO(synk): the 32 pretrained MBConv blocks of EfficientNet-b4 come from
    # an external checkpoint and are not reproduced; the stand-in keeps the
    # conv stem + BN + swish, 1x1 conv head + BN + swish and global avg pool.
    patches, hw = _im2col_3x3_s2_same(x)
    tile = _choose_spatial_tile(hw, tile_cap)
    n_tiles = -(-hw // tile)
    n_outer = 2 if n_tiles >= 2 else 1        # engages both v7x TensorCores
    n_inner = -(-n_tiles // n_outer)
    hw_pad = n_outer * n_inner * tile

    # single fused pad: K 27 -> 32, spatial hw -> hw_pad (no extra zero-copy)
    patches_p = jnp.pad(patches.astype(jnp.bfloat16),
                        ((0, 0), (0, hw_pad - hw), (0, K_PAD - K_IM2COL)))

    feat = _stem_head_pool(
        patches_p, p['w_stem'], p['bn0_shift'], p['w_head'], p['bn1_shift'],
        tile=tile, n_outer=n_outer, n_inner=n_inner, hw_valid=hw,
        use_bf16=use_bf16, vmem_limit=vmem_limit)             # (B, 1792) f32

    # ---- meta_fusion + fc_block + classifier ---------------------------------
    meta_p = jnp.pad(meta, ((0, 0), (0, META_PAD - META_DIM))).astype(jnp.bfloat16)
    logits_pad = _fusion_head(feat, meta_p, p, vmem_limit=vmem_limit)
    logits = logits_pad[:, :num_classes]
    return [logits, None, None, None]


effnet_fusion_forward = jax.jit(_forward, static_argnames=("num_classes",))


if __name__ == "__main__":
    key = jax.random.PRNGKey(0)
    kx, km, kp = jax.random.split(key, 3)

    B, C, H, W = 2, 3, 16, 16
    num_classes = 8

    x_nchw = jax.random.normal(kx, (B, C, H, W), jnp.float32)   # PyTorch NCHW input
    meta = jax.random.normal(km, (B, META_DIM), jnp.float32)    # 73 metadata features
    params = init_params(kp, num_classes)

    out = effnet_fusion_forward(params, x_nchw, meta, num_classes=num_classes)
    logits = out[0]
    jax.block_until_ready(logits)
    assert logits.shape == (B, num_classes)
    assert out[1] is None and out[2] is None and out[3] is None
    print("KERNEL_OK")
</pallas_src>

<mosaic_0001>
module attributes {stable_mosaic.version = 11 : i64} {
  func.func @kernel(%arg0: i32, %arg1: i32, %arg2: i32, %arg3: memref<1x24x32xbf16, #tpu.memory_space<vmem>>, %arg4: memref<32x64xbf16, #tpu.memory_space<vmem>>, %arg5: memref<1x64xf32, #tpu.memory_space<vmem>>, %arg6: memref<64x1792xbf16, #tpu.memory_space<vmem>>, %arg7: memref<1x1792xf32, #tpu.memory_space<vmem>>, %arg8: memref<1x1x1x1792xf32, #tpu.memory_space<vmem>>, %arg9: memref<8x1792xf32, #tpu.memory_space<vmem>>) attributes {dimension_semantics = [#tpu.dimension_semantics<parallel>, #tpu.dimension_semantics<parallel>, #tpu.dimension_semantics<arbitrary>], iteration_bounds = array<i64: 2, 2, 2>, scalar_prefetch = 0 : i64, scratch_operands = 1 : i64, tpu.core_type = #tpu.core_type<tc>, window_params = [{transform_indices = @transform_0, window_bounds = array<i64: 1, 24, 32>}, {pipeline_mode = #tpu.pipeline_mode<synchronous>, transform_indices = @transform_1, window_bounds = array<i64: 32, 64>}, {pipeline_mode = #tpu.pipeline_mode<synchronous>, transform_indices = @transform_2, window_bounds = array<i64: 1, 64>}, {pipeline_mode = #tpu.pipeline_mode<synchronous>, transform_indices = @transform_3, window_bounds = array<i64: 64, 1792>}, {pipeline_mode = #tpu.pipeline_mode<synchronous>, transform_indices = @transform_4, window_bounds = array<i64: 1, 1792>}, {transform_indices = @transform_5, window_bounds = array<i64: 1, 1, 1, 1792>}]} {
    %c0_i32 = arith.constant 0 : i32
    %0 = arith.cmpi eq, %arg2, %c0_i32 : i32
    %1 = arith.extui %0 : i1 to i32
    %c0_i32_0 = arith.constant 0 : i32
    %2 = arith.cmpi ne, %1, %c0_i32_0 : i32
    scf.if %2 {
      %cst_18 = arith.constant 0.000000e+00 : f32
      %43 = vector.broadcast %cst_18 : f32 to vector<8x1792xf32>
      %c0_19 = arith.constant 0 : index
      %c0_20 = arith.constant 0 : index
      %44 = vector.load %arg9[%c0_19, %c0_20] : memref<8x1792xf32, #tpu.memory_space<vmem>>, vector<8x1792xf32>
      tpu.vector_store %arg9[%c0_19, %c0_20], %43 {strides = array<i32>} : memref<8x1792xf32, #tpu.memory_space<vmem>>, vector<8x1792xf32>,
    } else {
    }
    %c0 = arith.constant 0 : index
    %c0_1 = arith.constant 0 : index
    %c0_2 = arith.constant 0 : index
    %3 = vector.load %arg3[%c0, %c0_1, %c0_2] : memref<1x24x32xbf16, #tpu.memory_space<vmem>>, vector<1x24x32xbf16>
    %4 = vector.shape_cast %3 : vector<1x24x32xbf16> to vector<24x32xbf16>
    %c0_3 = arith.constant 0 : index
    %c0_4 = arith.constant 0 : index
    %5 = vector.load %arg4[%c0_3, %c0_4] : memref<32x64xbf16, #tpu.memory_space<vmem>>, vector<32x64xbf16>
    %cst = arith.constant dense<0.000000e+00> : vector<24x64xf32>
    %6 = tpu.matmul %4, %5, %cst {dimension_numbers = #tpu.dot_dimension_numbers<[1], [0], [0], [1], [0, 0, 1, 1], [], []>} : vector<24x32xbf16>, vector<32x64xbf16>, vector<24x64xf32> -> vector<24x64xf32>
    %c0_5 = arith.constant 0 : index
    %c0_6 = arith.constant 0 : index
    %7 = vector.load %arg5[%c0_5, %c0_6] : memref<1x64xf32, #tpu.memory_space<vmem>>, vector<1x64xf32>
    %8 = vector.broadcast %7 : vector<1x64xf32> to vector<24x64xf32>
    %9 = arith.addf %6, %8 : vector<24x64xf32>
    %10 = arith.truncf %9 : vector<24x64xf32> to vector<24x64xbf16>
    %11 = arith.negf %10 : vector<24x64xbf16>
    %12 = math.exp %11 : vector<24x64xbf16>
    %cst_7 = arith.constant 1.000000e+00 : bf16
    %13 = vector.broadcast %cst_7 : bf16 to vector<24x64xbf16>
    %14 = arith.addf %13, %12 : vector<24x64xbf16>
    %15 = arith.divf %13, %14 : vector<24x64xbf16>
    %16 = arith.mulf %10, %15 : vector<24x64xbf16>
    %c0_8 = arith.constant 0 : index
    %c0_9 = arith.constant 0 : index
    %17 = vector.load %arg6[%c0_8, %c0_9] : memref<64x1792xbf16, #tpu.memory_space<vmem>>, vector<64x1792xbf16>
    %cst_10 = arith.constant dense<0.000000e+00> : vector<24x1792xf32>
    %18 = tpu.matmul %16, %17, %cst_10 {dimension_numbers = #tpu.dot_dimension_numbers<[1], [0], [0], [1], [0, 0, 1, 1], [], []>} : vector<24x64xbf16>, vector<64x1792xbf16>, vector<24x1792xf32> -> vector<24x1792xf32>
    %c0_11 = arith.constant 0 : index
    %c0_12 = arith.constant 0 : index
    %19 = vector.load %arg7[%c0_11, %c0_12] : memref<1x1792xf32, #tpu.memory_space<vmem>>, vector<1x1792xf32>
    %20 = vector.broadcast %19 : vector<1x1792xf32> to vector<24x1792xf32>
    %21 = arith.addf %18, %20 : vector<24x1792xf32>
    %22 = arith.truncf %21 : vector<24x1792xf32> to vector<24x1792xbf16>
    %23 = arith.negf %22 : vector<24x1792xbf16>
    %24 = math.exp %23 : vector<24x1792xbf16>
    %cst_13 = arith.constant 1.000000e+00 : bf16
    %25 = vector.broadcast %cst_13 : bf16 to vector<24x1792xbf16>
    %26 = arith.addf %25, %24 : vector<24x1792xbf16>
    %27 = arith.divf %25, %26 : vector<24x1792xbf16>
    %28 = arith.mulf %22, %27 : vector<24x1792xbf16>
    %29 = arith.extf %28 : vector<24x1792xbf16> to vector<24x1792xf32>
    %c2_i32 = arith.constant 2 : i32
    %30 = arith.muli %arg1, %c2_i32 : i32
    %31 = arith.addi %30, %arg2 : i32
    %c1_i32 = arith.constant 1 : i32
    %32 = arith.addi %31, %c1_i32 : i32
    %c24_i32 = arith.constant 24 : i32
    %33 = arith.muli %32, %c24_i32 : i32
    %c64_i32 = arith.constant 64 : i32
    %34 = arith.cmpi sgt, %33, %c64_i32 : i32
    %true = arith.constant true
    %35 = arith.xori %34, %true : i1
    %36 = arith.extui %35 : i1 to i32
    %c0_i32_14 = arith.constant 0 : i32
    %37 = arith.cmpi ne, %36, %c0_i32_14 : i32
    scf.if %37 {
      %c0_18 = arith.constant 0 : index
      %c0_19 = arith.constant 0 : index
      %43 = vector.load %arg9[%c0_18, %c0_19] : memref<8x1792xf32, #tpu.memory_space<vmem>>, vector<8x1792xf32>
      %44 = vector.shape_cast %29 : vector<24x1792xf32> to vector<3x8x1792xf32>
      %cst_20 = arith.constant dense<0.000000e+00> : vector<8x1792xf32>
      %45 = vector.multi_reduction <add>, %44, %cst_20 [0] : vector<3x8x1792xf32> to vector<8x1792xf32>
      %46 = arith.addf %43, %45 : vector<8x1792xf32>
      %c0_21 = arith.constant 0 : index
      %c0_22 = arith.constant 0 : index
      %47 = vector.load %arg9[%c0_21, %c0_22] : memref<8x1792xf32, #tpu.memory_space<vmem>>, vector<8x1792xf32>
      tpu.vector_store %arg9[%c0_21, %c0_22], %46 {strides = array<i32>} : memref<8x1792xf32, #tpu.memory_space<vmem>>, vector<8x1792xf32>,
    } else {
    }
    %38 = arith.extui %34 : i1 to i32
    %c0_i32_15 = arith.constant 0 : i32
    %39 = arith.cmpi ne, %38, %c0_i32_15 : i32
    scf.if %39 {
      %c24_i32_18 = arith.constant 24 : i32
      %43 = arith.muli %31, %c24_i32_18 : i32
      %44 = tpu.iota {dimensions = array<i32: 0>} : vector<24x1xi32>
      %45 = vector.broadcast %43 : i32 to vector<24x1xi32>
      %46 = arith.addi %45, %44 : vector<24x1xi32>
      %c64_i32_19 = arith.constant 64 : i32
      %47 = vector.broadcast %c64_i32_19 : i32 to vector<24x1xi32>
      %48 = arith.cmpi slt, %46, %47 : vector<24x1xi32>
      %cst_20 = arith.constant 0.000000e+00 : f32
      %49 = vector.shape_cast %48 : vector<24x1xi1> to vector<24x1xi1>
      %50 = vector.broadcast %49 : vector<24x1xi1> to vector<24x1792xi1>
      %51 = vector.broadcast %cst_20 : f32 to vector<24x1792xf32>
      %52 = arith.select %50, %29, %51 : vector<24x1792xi1>, vector<24x1792xf32>
      %c0_21 = arith.constant 0 : index
      %c0_22 = arith.constant 0 : index
      %53 = vector.load %arg9[%c0_21, %c0_22] : memref<8x1792xf32, #tpu.memory_space<vmem>>, vector<8x1792xf32>
      %54 = vector.shape_cast %52 : vector<24x1792xf32> to vector<3x8x1792xf32>
      %cst_23 = arith.constant dense<0.000000e+00> : vector<8x1792xf32>
      %55 = vector.multi_reduction <add>, %54, %cst_23 [0] : vector<3x8x1792xf32> to vector<8x1792xf32>
      %56 = arith.addf %53, %55 : vector<8x1792xf32>
      %c0_24 = arith.constant 0 : index
      %c0_25 = arith.constant 0 : index
      %57 = vector.load %arg9[%c0_24, %c0_25] : memref<8x1792xf32, #tpu.memory_space<vmem>>, vector<8x1792xf32>
      tpu.vector_store %arg9[%c0_24, %c0_25], %56 {strides = array<i32>} : memref<8x1792xf32, #tpu.memory_space<vmem>>, vector<8x1792xf32>,
    } else {
    }
    %c1_i32_16 = arith.constant 1 : i32
    %40 = arith.cmpi eq, %arg2, %c1_i32_16 : i32
    %41 = arith.extui %40 : i1 to i32
    %c0_i32_17 = arith.constant 0 : i32
    %42 = arith.cmpi ne, %41, %c0_i32_17 : i32
    scf.if %42 {
      %c0_18 = arith.constant 0 : index
      %c0_19 = arith.constant 0 : index
      %43 = vector.load %arg9[%c0_18, %c0_19] : memref<8x1792xf32, #tpu.memory_space<vmem>>, vector<8x1792xf32>
      %cst_20 = arith.constant dense<0.000000e+00> : vector<1792xf32>
      %44 = vector.multi_reduction <add>, %43, %cst_20 [0] : vector<8x1792xf32> to vector<1792xf32>
      %45 = vector.shape_cast %44 : vector<1792xf32> to vector<1x1792xf32>
      %cst_21 = arith.constant 1.562500e-02 : f32
      %46 = vector.broadcast %cst_21 : f32 to vector<1x1792xf32>
      %47 = arith.mulf %45, %46 : vector<1x1792xf32>
      %c0_22 = arith.constant 0 : index
      %c0_23 = arith.constant 0 : index
      %c0_24 = arith.constant 0 : index
      %c0_25 = arith.constant 0 : index
      %48 = vector.load %arg8[%c0_22, %c0_23, %c0_24, %c0_25] : memref<1x1x1x1792xf32, #tpu.memory_space<vmem>>, vector<1x1x1x1792xf32>
      %49 = vector.shape_cast %48 : vector<1x1x1x1792xf32> to vector<1x1792xf32>
      %50 = vector.shape_cast %47 : vector<1x1792xf32> to vector<1x1x1x1792xf32>
      tpu.vector_store %arg8[%c0_22, %c0_23, %c0_24, %c0_25], %50 {strides = array<i32>} : memref<1x1x1x1792xf32, #tpu.memory_space<vmem>>, vector<1x1x1x1792xf32>,
    } else {
    }
    return
  }
  func.func @transform_0(%arg0: i32, %arg1: i32, %arg2: i32) -> (i32, i32, i32) {
    %c2_i32 = arith.constant 2 : i32
    %0 = arith.muli %arg1, %c2_i32 : i32
    %1 = arith.addi %0, %arg2 : i32
    %c0_i32 = arith.constant 0 : i32
    %c0_i32_0 = arith.constant 0 : i32
    return %arg0, %1, %c0_i32 : i32, i32, i32
  }
  func.func @transform_1(%arg0: i32, %arg1: i32, %arg2: i32) -> (i32, i32) {
    %c0_i32 = arith.constant 0 : i32
    %c0_i32_0 = arith.constant 0 : i32
    %c0_i32_1 = arith.constant 0 : i32
    return %c0_i32, %c0_i32_0 : i32, i32
  }
  func.func @transform_2(%arg0: i32, %arg1: i32, %arg2: i32) -> (i32, i32) {
    %c0_i32 = arith.constant 0 : i32
    %c0_i32_0 = arith.constant 0 : i32
    %c0_i32_1 = arith.constant 0 : i32
    return %c0_i32, %c0_i32_0 : i32, i32
  }
  func.func @transform_3(%arg0: i32, %arg1: i32, %arg2: i32) -> (i32, i32) {
    %c0_i32 = arith.constant 0 : i32
    %c0_i32_0 = arith.constant 0 : i32
    %c0_i32_1 = arith.constant 0 : i32
    return %c0_i32, %c0_i32_0 : i32, i32
  }
  func.func @transform_4(%arg0: i32, %arg1: i32, %arg2: i32) -> (i32, i32) {
    %c0_i32 = arith.constant 0 : i32
    %c0_i32_0 = arith.constant 0 : i32
    %c0_i32_1 = arith.constant 0 : i32
    return %c0_i32, %c0_i32_0 : i32, i32
  }
  func.func @transform_5(%arg0: i32, %arg1: i32, %arg2: i32) -> (i32, i32, i32, i32) {
    %c0_i32 = arith.constant 0 : i32
    %c0_i32_0 = arith.constant 0 : i32
    %c0_i32_1 = arith.constant 0 : i32
    return %arg0, %arg1, %c0_i32, %c0_i32_0 : i32, i32, i32, i32
  }
}

module attributes {stable_mosaic.version = 11 : i64} {
  func.func @_fusion_mlp_kernel(%arg0: i32, %arg1: memref<2x256xf32, #tpu.memory_space<vmem>>, %arg2: memref<2x128xbf16, #tpu.memory_space<vmem>>, %arg3: memref<128x256xbf16, #tpu.memory_space<vmem>>, %arg4: memref<1x256xf32, #tpu.memory_space<vmem>>, %arg5: memref<256x1024xbf16, #tpu.memory_space<vmem>>, %arg6: memref<1x1024xf32, #tpu.memory_space<vmem>>, %arg7: memref<1024x512xbf16, #tpu.memory_space<vmem>>, %arg8: memref<1x512xf32, #tpu.memory_space<vmem>>, %arg9: memref<512x256xbf16, #tpu.memory_space<vmem>>, %arg10: memref<1x256xf32, #tpu.memory_space<vmem>>, %arg11: memref<256x128xbf16, #tpu.memory_space<vmem>>, %arg12: memref<1x128xf32, #tpu.memory_space<vmem>>, %arg13: memref<2x128xf32, #tpu.memory_space<vmem>>, %arg14: memref<2x1024xf32, #tpu.memory_space<vmem>>) attributes {dimension_semantics = [#tpu.dimension_semantics<arbitrary>], iteration_bounds = array<i64: 7>, scalar_prefetch = 0 : i64, scratch_operands = 1 : i64, tpu.core_type = #tpu.core_type<tc>, window_params = [{transform_indices = @transform_0, window_bounds = array<i64: 2, 256>}, {pipeline_mode = #tpu.pipeline_mode<synchronous>, transform_indices = @transform_1, window_bounds = array<i64: 2, 128>}, {transform_indices = @transform_2, window_bounds = array<i64: 128, 256>}, {transform_indices = @transform_3, window_bounds = array<i64: 1, 256>}, {transform_indices = @transform_4, window_bounds = array<i64: 256, 1024>}, {pipeline_mode = #tpu.pipeline_mode<synchronous>, transform_indices = @transform_5, window_bounds = array<i64: 1, 1024>}, {pipeline_mode = #tpu.pipeline_mode<synchronous>, transform_indices = @transform_6, window_bounds = array<i64: 1024, 512>}, {pipeline_mode = #tpu.pipeline_mode<synchronous>, transform_indices = @transform_7, window_bounds = array<i64: 1, 512>}, {pipeline_mode = #tpu.pipeline_mode<synchronous>, transform_indices = @transform_8, window_bounds = array<i64: 512, 256>}, {pipeline_mode = #tpu.pipeline_mode<synchronous>, transform_indices = @transform_9, window_bounds = array<i64: 1, 256>}, {pipeline_mode = #tpu.pipeline_mode<synchronous>, transform_indices = @transform_10, window_bounds = array<i64: 256, 128>}, {pipeline_mode = #tpu.pipeline_mode<synchronous>, transform_indices = @transform_11, window_bounds = array<i64: 1, 128>}, {pipeline_mode = #tpu.pipeline_mode<synchronous>, transform_indices = @transform_12, window_bounds = array<i64: 2, 128>}]} {
    %c0_i32 = arith.constant 0 : i32
    %0 = arith.cmpi eq, %arg0, %c0_i32 : i32
    %1 = arith.extui %0 : i1 to i32
    %c0_i32_0 = arith.constant 0 : i32
    %2 = arith.cmpi ne, %1, %c0_i32_0 : i32
    scf.if %2 {
      %cst_18 = arith.constant 0.000000e+00 : f32
      %26 = vector.broadcast %cst_18 : f32 to vector<2x1024xf32>
      %c0_19 = arith.constant 0 : index
      %c0_20 = arith.constant 0 : index
      %27 = vector.load %arg14[%c0_19, %c0_20] : memref<2x1024xf32, #tpu.memory_space<vmem>>, vector<2x1024xf32>
      tpu.vector_store %arg14[%c0_19, %c0_20], %26 {strides = array<i32>} : memref<2x1024xf32, #tpu.memory_space<vmem>>, vector<2x1024xf32>,
    } else {
    }
    %c0 = arith.constant 0 : index
    %c0_1 = arith.constant 0 : index
    %3 = vector.load %arg2[%c0, %c0_1] : memref<2x128xbf16, #tpu.memory_space<vmem>>, vector<2x128xbf16>
    %c0_2 = arith.constant 0 : index
    %c0_3 = arith.constant 0 : index
    %4 = vector.load %arg3[%c0_2, %c0_3] : memref<128x256xbf16, #tpu.memory_space<vmem>>, vector<128x256xbf16>
    %cst = arith.constant dense<0.000000e+00> : vector<2x256xf32>
    %5 = tpu.matmul %3, %4, %cst {dimension_numbers = #tpu.dot_dimension_numbers<[1], [0], [0], [1], [0, 0, 1, 1], [], []>} : vector<2x128xbf16>, vector<128x256xbf16>, vector<2x256xf32> -> vector<2x256xf32>
    %c0_4 = arith.constant 0 : index
    %c0_5 = arith.constant 0 : index
    %6 = vector.load %arg4[%c0_4, %c0_5] : memref<1x256xf32, #tpu.memory_space<vmem>>, vector<1x256xf32>
    %7 = vector.broadcast %6 : vector<1x256xf32> to vector<2x256xf32>
    %8 = arith.addf %5, %7 : vector<2x256xf32>
    %cst_6 = arith.constant 0.000000e+00 : f32
    %9 = vector.broadcast %cst_6 : f32 to vector<2x256xf32>
    %10 = arith.subf %9, %8 : vector<2x256xf32>
    %11 = math.exp %10 : vector<2x256xf32>
    %cst_7 = arith.constant 1.000000e+00 : f32
    %12 = vector.broadcast %cst_7 : f32 to vector<2x256xf32>
    %13 = arith.addf %12, %11 : vector<2x256xf32>
    %14 = tpu.reciprocal %13 {approx = true} : vector<2x256xf32> -> vector<2x256xf32>
    %c0_8 = arith.constant 0 : index
    %c0_9 = arith.constant 0 : index
    %15 = vector.load %arg1[%c0_8, %c0_9] : memref<2x256xf32, #tpu.memory_space<vmem>>, vector<2x256xf32>
    %16 = arith.mulf %15, %14 : vector<2x256xf32>
    %17 = arith.truncf %16 : vector<2x256xf32> to vector<2x256xbf16>
    %c0_10 = arith.constant 0 : index
    %c0_11 = arith.constant 0 : index
    %18 = vector.load %arg14[%c0_10, %c0_11] : memref<2x1024xf32, #tpu.memory_space<vmem>>, vector<2x1024xf32>
    %c0_12 = arith.constant 0 : index
    %c0_13 = arith.constant 0 : index
    %19 = vector.load %arg5[%c0_12, %c0_13] : memref<256x1024xbf16, #tpu.memory_space<vmem>>, vector<256x1024xbf16>
    %cst_14 = arith.constant dense<0.000000e+00> : vector<2x1024xf32>
    %20 = tpu.matmul %17, %19, %cst_14 {dimension_numbers = #tpu.dot_dimension_numbers<[1], [0], [0], [1], [0, 0, 1, 1], [], []>} : vector<2x256xbf16>, vector<256x1024xbf16>, vector<2x1024xf32> -> vector<2x1024xf32>
    %21 = arith.addf %18, %20 : vector<2x1024xf32>
    %c0_15 = arith.constant 0 : index
    %c0_16 = arith.constant 0 : index
    %22 = vector.load %arg14[%c0_15, %c0_16] : memref<2x1024xf32, #tpu.memory_space<vmem>>, vector<2x1024xf32>
    tpu.vector_store %arg14[%c0_15, %c0_16], %21 {strides = array<i32>} : memref<2x1024xf32, #tpu.memory_space<vmem>>, vector<2x1024xf32>,
    %c6_i32 = arith.constant 6 : i32
    %23 = arith.cmpi eq, %arg0, %c6_i32 : i32
    %24 = arith.extui %23 : i1 to i32
    %c0_i32_17 = arith.constant 0 : i32
    %25 = arith.cmpi ne, %24, %c0_i32_17 : i32
    scf.if %25 {
      %c0_18 = arith.constant 0 : index
      %c0_19 = arith.constant 0 : index
      %26 = vector.load %arg14[%c0_18, %c0_19] : memref<2x1024xf32, #tpu.memory_space<vmem>>, vector<2x1024xf32>
      %c0_20 = arith.constant 0 : index
      %c0_21 = arith.constant 0 : index
      %27 = vector.load %arg6[%c0_20, %c0_21] : memref<1x1024xf32, #tpu.memory_space<vmem>>, vector<1x1024xf32>
      %28 = vector.broadcast %27 : vector<1x1024xf32> to vector<2x1024xf32>
      %29 = arith.addf %26, %28 : vector<2x1024xf32>
      %cst_22 = arith.constant 0.000000e+00 : f32
      %30 = vector.broadcast %cst_22 : f32 to vector<2x1024xf32>
      %31 = arith.maximumf %29, %30 : vector<2x1024xf32>
      %32 = arith.truncf %31 : vector<2x1024xf32> to vector<2x1024xbf16>
      %c0_23 = arith.constant 0 : index
      %c0_24 = arith.constant 0 : index
      %33 = vector.load %arg7[%c0_23, %c0_24] : memref<1024x512xbf16, #tpu.memory_space<vmem>>, vector<1024x512xbf16>
      %cst_25 = arith.constant dense<0.000000e+00> : vector<2x512xf32>
      %34 = tpu.matmul %32, %33, %cst_25 {dimension_numbers = #tpu.dot_dimension_numbers<[1], [0], [0], [1], [0, 0, 1, 1], [], []>} : vector<2x1024xbf16>, vector<1024x512xbf16>, vector<2x512xf32> -> vector<2x512xf32>
      %c0_26 = arith.constant 0 : index
      %c0_27 = arith.constant 0 : index
      %35 = vector.load %arg8[%c0_26, %c0_27] : memref<1x512xf32, #tpu.memory_space<vmem>>, vector<1x512xf32>
      %36 = vector.broadcast %35 : vector<1x512xf32> to vector<2x512xf32>
      %37 = arith.addf %34, %36 : vector<2x512xf32>
      %cst_28 = arith.constant 0.000000e+00 : f32
      %38 = vector.broadcast %cst_28 : f32 to vector<2x512xf32>
      %39 = arith.maximumf %37, %38 : vector<2x512xf32>
      %40 = arith.truncf %39 : vector<2x512xf32> to vector<2x512xbf16>
      %c0_29 = arith.constant 0 : index
      %c0_30 = arith.constant 0 : index
      %41 = vector.load %arg9[%c0_29, %c0_30] : memref<512x256xbf16, #tpu.memory_space<vmem>>, vector<512x256xbf16>
      %cst_31 = arith.constant dense<0.000000e+00> : vector<2x256xf32>
      %42 = tpu.matmul %40, %41, %cst_31 {dimension_numbers = #tpu.dot_dimension_numbers<[1], [0], [0], [1], [0, 0, 1, 1], [], []>} : vector<2x512xbf16>, vector<512x256xbf16>, vector<2x256xf32> -> vector<2x256xf32>
      %c0_32 = arith.constant 0 : index
      %c0_33 = arith.constant 0 : index
      %43 = vector.load %arg10[%c0_32, %c0_33] : memref<1x256xf32, #tpu.memory_space<vmem>>, vector<1x256xf32>
      %44 = vector.broadcast %43 : vector<1x256xf32> to vector<2x256xf32>
      %45 = arith.addf %42, %44 : vector<2x256xf32>
      %cst_34 = arith.constant 0.000000e+00 : f32
      %46 = vector.broadcast %cst_34 : f32 to vector<2x256xf32>
      %47 = arith.maximumf %45, %46 : vector<2x256xf32>
      %48 = arith.truncf %47 : vector<2x256xf32> to vector<2x256xbf16>
      %c0_35 = arith.constant 0 : index
      %c0_36 = arith.constant 0 : index
      %49 = vector.load %arg11[%c0_35, %c0_36] : memref<256x128xbf16, #tpu.memory_space<vmem>>, vector<256x128xbf16>
      %cst_37 = arith.constant dense<0.000000e+00> : vector<2x128xf32>
      %50 = tpu.matmul %48, %49, %cst_37 {dimension_numbers = #tpu.dot_dimension_numbers<[1], [0], [0], [1], [0, 0, 1, 1], [], []>} : vector<2x256xbf16>, vector<256x128xbf16>, vector<2x128xf32> -> vector<2x128xf32>
      %c0_38 = arith.constant 0 : index
      %c0_39 = arith.constant 0 : index
      %51 = vector.load %arg12[%c0_38, %c0_39] : memref<1x128xf32, #tpu.memory_space<vmem>>, vector<1x128xf32>
      %52 = vector.broadcast %51 : vector<1x128xf32> to vector<2x128xf32>
      %53 = arith.addf %50, %52 : vector<2x128xf32>
      %c0_40 = arith.constant 0 : index
      %c0_41 = arith.constant 0 : index
      %54 = vector.load %arg13[%c0_40, %c0_41] : memref<2x128xf32, #tpu.memory_space<vmem>>, vector<2x128xf32>
      tpu.vector_store %arg13[%c0_40, %c0_41], %53 {strides = array<i32>} : memref<2x128xf32, #tpu.memory_space<vmem>>, vector<2x128xf32>,
    } else {
    }
    return
  }
  func.func @transform_0(%arg0: i32) -> (i32, i32) {
    %c0_i32 = arith.constant 0 : i32
    %c0_i32_0 = arith.constant 0 : i32
    return %c0_i32, %arg0 : i32, i32
  }
  func.func @transform_1(%arg0: i32) -> (i32, i32) {
    %c0_i32 = arith.constant 0 : i32
    %c0_i32_0 = arith.constant 0 : i32
    %c0_i32_1 = arith.constant 0 : i32
    return %c0_i32, %c0_i32_0 : i32, i32
  }
  func.func @transform_2(%arg0: i32) -> (i32, i32) {
    %c0_i32 = arith.constant 0 : i32
    %c0_i32_0 = arith.constant 0 : i32
    return %c0_i32, %arg0 : i32, i32
  }
  func.func @transform_3(%arg0: i32) -> (i32, i32) {
    %c0_i32 = arith.constant 0 : i32
    %c0_i32_0 = arith.constant 0 : i32
    return %c0_i32, %arg0 : i32, i32
  }
  func.func @transform_4(%arg0: i32) -> (i32, i32) {
    %c0_i32 = arith.constant 0 : i32
    %c0_i32_0 = arith.constant 0 : i32
    return %arg0, %c0_i32 : i32, i32
  }
  func.func @transform_5(%arg0: i32) -> (i32, i32) {
    %c0_i32 = arith.constant 0 : i32
    %c0_i32_0 = arith.constant 0 : i32
    %c0_i32_1 = arith.constant 0 : i32
    return %c0_i32, %c0_i32_0 : i32, i32
  }
  func.func @transform_6(%arg0: i32) -> (i32, i32) {
    %c0_i32 = arith.constant 0 : i32
    %c0_i32_0 = arith.constant 0 : i32
    %c0_i32_1 = arith.constant 0 : i32
    return %c0_i32, %c0_i32_0 : i32, i32
  }
  func.func @transform_7(%arg0: i32) -> (i32, i32) {
    %c0_i32 = arith.constant 0 : i32
    %c0_i32_0 = arith.constant 0 : i32
    %c0_i32_1 = arith.constant 0 : i32
    return %c0_i32, %c0_i32_0 : i32, i32
  }
  func.func @transform_8(%arg0: i32) -> (i32, i32) {
    %c0_i32 = arith.constant 0 : i32
    %c0_i32_0 = arith.constant 0 : i32
    %c0_i32_1 = arith.constant 0 : i32
    return %c0_i32, %c0_i32_0 : i32, i32
  }
  func.func @transform_9(%arg0: i32) -> (i32, i32) {
    %c0_i32 = arith.constant 0 : i32
    %c0_i32_0 = arith.constant 0 : i32
    %c0_i32_1 = arith.constant 0 : i32
    return %c0_i32, %c0_i32_0 : i32, i32
  }
  func.func @transform_10(%arg0: i32) -> (i32, i32) {
    %c0_i32 = arith.constant 0 : i32
    %c0_i32_0 = arith.constant 0 : i32
    %c0_i32_1 = arith.constant 0 : i32
    return %c0_i32, %c0_i32_0 : i32, i32
  }
  func.func @transform_11(%arg0: i32) -> (i32, i32) {
    %c0_i32 = arith.constant 0 : i32
    %c0_i32_0 = arith.constant 0 : i32
    %c0_i32_1 = arith.constant 0 : i32
    return %c0_i32, %c0_i32_0 : i32, i32
  }
  func.func @transform_12(%arg0: i32) -> (i32, i32) {
    %c0_i32 = arith.constant 0 : i32
    %c0_i32_0 = arith.constant 0 : i32
    %c0_i32_1 = arith.constant 0 : i32
    return %c0_i32, %c0_i32_0 : i32, i32
  }
}

</mosaic_0001>

<bundles_post_ra>
// kernel: _forward.2
= control target key start
LH: loop header
LB: loop body
LE: loop exit
PB: predicated region body
PF: predicated region fallthrough
CT: control target
= control target key end

     0   :  { %10 = vsyncpa [#allocation4], 0  ;;  %s3548_s0 = inlined_call_operand.vmem [shape: bf16[2,96,32], index: 0, kind: input, shape index: {}]   ;;  %s3549_s1 = inlined_call_operand.hbm [shape: bf16[32,64], index: 1, kind: input, shape index: {}]   ;;  %s3550_s2 = inlined_call_operand.hbm [shape: f32[1,64], index: 2, kind: input, shape index: {}]   ;;  %s3551_s3 = inlined_call_operand.hbm [shape: bf16[64,1792], index: 3, kind: input, shape index: {}]   ;;  %s3552_s4 = inlined_call_operand.hbm [shape: f32[1,1792], index: 4, kind: input, shape index: {}]   ;;  %s3553_s5 = inlined_call_operand.vmem [shape: f32[2,2,1,1792], index: 5, kind: output, shape index: {}]  }
   0x1   :  { %11 = vsyncpa [#allocation6], 0 }
   0x2   :  { %12 = vsyncpa [#allocation9], 0  ;;  %s2776_s18 = smov 0   ;;  %s2778_s19 = smov 0  }
   0x3   :  { %s2780_s20 = smov 0   ;;  %s2782_s21 = smov 0  }
   0x4   :  { %s2784_s22 = smov 0   ;;  %s2786_s23 = smov 0  }
   0x5   :  { %s2788_s24 = smov 0  }
   0x6 LB: > { %s2735_s25 = smov [#allocation5]   ;;  %s2105_s27 = sadd.s32 4294967295, %s2733_s24   ;;  %s2733_s24 = sphi %s2788_s24, %s18_s24   ;;  %s2729_s23 = sphi %s2786_s23, %s3642_s23   ;;  %s2725_s22 = sphi %s2784_s22, %s3641_s22   ;;  %s2721_s21 = sphi %s2782_s21, %s3640_s21   ;;  %s2717_s20 = sphi %s2780_s20, %s3639_s20   ;;  %s2713_s19 = sphi %s2778_s19, %s3638_s19   ;;  %s2709_s18 = sphi %s2776_s18, %s3637_s18  }
   0x7   : > { %s212_s26 = sshll.u32 %s2735_s25, 4  ;;  %p2109_p0 = scmp.ge.s32.totalorder %s2733_s24, 1  ;;  %s213_s26 = int_to_ptr.vmem [resolvable:$true] %s212_s26 }
   0x8   : > { %p186_p1 = scmp.lt.s32.totalorder %s2733_s24, 9  ;;  %p2814_p2 = scmp.eq.s32.totalorder %s2105_s27, 0 }
   0x9   : > { %s2574_s6 = scalar_lea.vmem %s213_s26, 16  ;;  %s2581_s7 = scalar_lea.vmem %s213_s26, 32 }
   0xa   : > { %p2818_p3 = pnand %p2109_p0, %p186_p1  ;;  %p2575_p7 = scmp.ne.s32.totalorder %s213_s26, %s2574_s6 }
   0xb   : > { %p2582_p10 = scmp.lt.s32.totalorder %s213_s26, %s213_s26  ;;  %p2583_p11 = scmp.lt.s32.totalorder %s2581_s7, %s2574_s6 }
   0xc   : > { %p2267_p4 = pneg %p2818_p3 }
   0xd   : > { %p2584_p12 = por %p2583_p11, %p2582_p10 }
   0xe   : > { %p2826_p5 = pnand %p2814_p2, %p2267_p4 }
  0x10   : > { %p2565_p6 = pneg %p2826_p5 }
  0x12   : > { %p2577_p8 = pnand %p2575_p7, %p2565_p6 }
  0x14   : > { %p2578_p9 = pneg %p2577_p8 }
  0x16   : > { %p2585_p13 = pnand %p2584_p12, %p2578_p9 }
  0x18   : > { %2588 = shalt.err (!%p2585_p13)
}
  0x19   : > { %2273 = dma.hbm_to_vmem [thread:$0]  (!%p2826_p5), %s3550_s2, 16, %s213_s26, [#allocation6]  }
  0x1a   : > { %s30_s10 = sadd.s32 1, %s2721_s21  ;;  %s33_s11 = sadd.s32 1, %s2725_s22 }
  0x1b   : > { %p31_p0 = scmp.ge.s32.totalorder %s30_s10, 2  ;;  %s37_s12 = sadd.s32 1, %s2729_s23 }
  0x1c   : > { %s2736_s13 = smov [#allocation3]  }
  0x1d   : > { %s3644_s10 = smov (%p31_p0, %s30_s10), 0  ;;  %s3646_s11 = smov (!%p31_p0, %s33_s11), %s2725_s22 }
  0x1e   : > { %s198_s14 = sshll.u32 %s2736_s13, 4  ;;  %p35_p1 = scmp.ge.s32.totalorder %s3646_s11, 2  ;;  %s199_s14 = int_to_ptr.vmem [resolvable:$true] %s198_s14 }
  0x1f   : > { %s2600_s15 = scalar_lea.vmem %s199_s14, 256  ;;  %p2608_p9 = scmp.lt.s32.totalorder %s199_s14, %s199_s14 }
  0x20   : > { %p2601_p4 = scmp.ne.s32.totalorder %s199_s14, %s2600_s15  ;;  %p2609_p10 = scmp.lt.s32.totalorder %s2600_s15, %s2600_s15 }
  0x22   : > { %p2603_p7 = pnand %p2601_p4, %p2565_p6  ;;  %p2610_p11 = por %p2609_p10, %p2608_p9 }
  0x24   : > { %p2604_p8 = pneg %p2603_p7 }
  0x26   : > { %p2611_p12 = pnand %p2610_p11, %p2604_p8 }
  0x28   : > { %2614 = shalt.err (!%p2611_p12)
}
  0x29   : > { %s2737_s16 = smov 64   ;;  %s2738_s17 = smov 4  }
  0x2a   : > { %2270 = dma.hbm_to_vmem [thread:$0]  (!%p2826_p5), %s3549_s1, 256, %s199_s14, [#allocation4], %s2737_s16, %s2737_s16, %s2738_s17  }
  0x2b   : > { %s2855_s27 = scalar_select %p35_p1, 0, %s3646_s11  }
  0x2c   : > { %s3648_s12 = smov (!%p35_p1, %s37_s12), %s2729_s23  ;;  %s2739_s6 = smov [#allocation7]  }
  0x2d   : > { %p39_p13 = scmp.ge.s32.totalorder %s3648_s12, 2  ;;  %s222_s7 = sshll.u32 %s2739_s6, 4  ;;  %s223_s7 = int_to_ptr.vmem [resolvable:$true] %s222_s7 }
  0x2e   : > { %s2626_s8 = scalar_lea.vmem %s223_s7, 7168  ;;  %p2634_p8 = scmp.lt.s32.totalorder %s223_s7, %s223_s7 }
  0x2f   : > { %s3650_s12 = smov (%p39_p13, %s3648_s12), 0  ;;  %p2627_p0 = scmp.ne.s32.totalorder %s223_s7, %s2626_s8 }
  0x30   : > { %p2635_p9 = scmp.lt.s32.totalorder %s2626_s8, %s2626_s8 }
  0x31   : > { %p2629_p4 = pnand %p2627_p0, %p2565_p6 }
  0x32   : > { %p2636_p10 = por %p2635_p9, %p2634_p8 }
  0x33   : > { %p2630_p7 = pneg %p2629_p4 }
  0x35   : > { %p2637_p11 = pnand %p2636_p10, %p2630_p7 }
  0x37   : > { %2640 = shalt.err (!%p2637_p11)
}
  0x38   : > { %s2740_s9 = smov 896   ;;  %s2741_s11 = smov 56  }
  0x39   : > { %2276 = dma.hbm_to_vmem [thread:$0]  (!%p2826_p5), %s3551_s3, 7168, %s223_s7, [#allocation6], %s2740_s9, %s2740_s9, %s2741_s11  }
  0x3a   : > { %s2742_s15 = smov [#allocation8]  }
  0x3b   : > { %s236_s16 = sshll.u32 %s2742_s15, 4  ;;  %s237_s16 = int_to_ptr.vmem [resolvable:$true] %s236_s16 }
  0x3c   : > { %s2652_s17 = scalar_lea.vmem %s237_s16, 224  ;;  %p2660_p0 = scmp.lt.s32.totalorder %s237_s16, %s237_s16 }
  0x3d   : > { %p2653_p1 = scmp.ne.s32.totalorder %s237_s16, %s2652_s17  ;;  %p2661_p4 = scmp.lt.s32.totalorder %s2652_s17, %s2652_s17 }
  0x3f   : > { %p2655_p12 = pnand %p2653_p1, %p2565_p6  ;;  %p2662_p7 = por %p2661_p4, %p2660_p0 }
  0x41   : > { %p2656_p13 = pneg %p2655_p12 }
  0x43   : > { %p2663_p8 = pnand %p2662_p7, %p2656_p13 }
  0x45   : > { %2666 = shalt.err (!%p2663_p8)
}
  0x46   : > { %2279 = dma.hbm_to_vmem [thread:$0]  (!%p2826_p5), %s3552_s4, 224, %s237_s16, [#allocation9]  }
  0x47   : > { %266 = sbr.rel (%p2818_p3) target bundleno = 764 (0x2fc), region = 40 }
  0x4c   : > { %2696 = dma.done.wait (%p2814_p2), [#allocation4], 256  }
  0x4d   : > { %2698 = vsyncadd (%p2814_p2), [#allocation4], 4294967040 }
  0x4e   : > { %2700 = dma.done.wait (%p2814_p2), [#allocation6], 7184  }
  0x4f   : > { %2702 = vsyncadd (%p2814_p2), [#allocation6], 4294960112 }
  0x50   : > { %2704 = dma.done.wait (%p2814_p2), [#allocation9], 224  }
  0x51   : > { %2706 = vsyncadd (%p2814_p2), [#allocation9], 4294967072  ;;  %s2120_s29 = sshll.u32 %s2713_s19, 1  ;;  %p318_p3 = scmp.lt.s32.totalorder %s2717_s20, 1 }
  0x52   : > { %s2894_s30 = sadd.s32 %s2709_s18, %s2120_s29  ;;  %p331_p5 = scmp.lt.s32.totalorder %s2713_s19, 1 }
  0x53   : > { %s317_s6 = smul.u32 3, %s2894_s30  ;;  %s3652_s20 = smov (!%p318_p3, %s2717_s20), 1 }
  0x54   : > { %s2248_s7 = smul.u32 12, %s3652_s20  ;;  %s3656_s19 = smov (!%p331_p5, %s2713_s19), 1 }
  0x55   : > { %p320_p6 = scmp.lt.s32.totalorder %s317_s6, 11  ;;  %s2250_s8 = smul.u32 28, %s3652_s20 }
  0x56   : > { %s2249_s11 = smul.u32 14, %s3656_s19  ;;  %p2122_p2 = scmp.ne.s32.totalorder %s2709_s18, 0 }
  0x57   : > { %s3654_s6 = smov (!%p320_p6, %s317_s6), 11 }
  0x58   : > { %s323_s28 = sadd.s32 %s2248_s7, %s3654_s6  ;;  %s335_s16 = sadd.s32 %s2250_s8, %s2249_s11 }
  0x59   : > { %s2121_s9 = sshll.u32 %s323_s28, 2  ;;  %s2906_s26 = scalar_lea.vmem %s3553_s5, %s335_s16 }
  0x5a   : > { %s325_s15 = scalar_lea.vmem %s3548_s0, %s2121_s9  ;;  %342 = sbr.rel (%p2122_p2) target bundleno = 103 (0x67), region = 60 }
  0x5f   : > { %v2743_v0 = vmov 0.0  }
  0x60   : > { %343 = vst [vmem:[#allocation2 + $0x30] sm:$0xff] %v2743_v0  ;;  %344 = vst [vmem:[#allocation2] sm:$0xff] %v2743_v0 }
  0x61   : > { %345 = vst [vmem:[#allocation2 + $0x58] sm:$0xff] %v2743_v0  ;;  %346 = vst [vmem:[#allocation2 + $0x18] sm:$0xff] %v2743_v0 }
  0x62   : > { %347 = vst [vmem:[#allocation2 + $0x50] sm:$0xff] %v2743_v0  ;;  %348 = vst [vmem:[#allocation2 + $0x68] sm:$0xff] %v2743_v0 }
  0x63   : > { %349 = vst [vmem:[#allocation2 + $0x8] sm:$0xff] %v2743_v0  ;;  %350 = vst [vmem:[#allocation2 + $0x48] sm:$0xff] %v2743_v0 }
  0x64   : > { %351 = vst [vmem:[#allocation2 + $0x40] sm:$0xff] %v2743_v0  ;;  %352 = vst [vmem:[#allocation2 + $0x20] sm:$0xff] %v2743_v0 }
  0x65   : > { %353 = vst [vmem:[#allocation2 + $0x10] sm:$0xff] %v2743_v0  ;;  %354 = vst [vmem:[#allocation2 + $0x38] sm:$0xff] %v2743_v0 }
  0x66   : > { %355 = vst [vmem:[#allocation2 + $0x60] sm:$0xff] %v2743_v0  ;;  %356 = vst [vmem:[#allocation2 + $0x28] sm:$0xff] %v2743_v0 }
  0x67 PF: > { %v2355_v1 = vld [vmem:[#allocation3 + $0x8] sm:$0xff]   ;;  %v2356_v2 = vld [vmem:[#allocation3] sm:$0xff]   ;;  %vm391_vm0 = vcmask 261120   ;;  %v2357_v3 = vld [vmem:[%s325_s15] sm:$0xff]   ;;  %v2744_v22 = vmov 0   ;;  %vm874_vm1 = vcmask 523264  }
  0x68   : > { %2240 = vmatprep.subr.bf16.mxu0 %v2355_v1  ;;  %2244 = vmatprep.mubr.msk.bf16.mxu0 %vm391_vm0, %v2357_v3  ;;  %v2358_v4 = vld [vmem:[%s325_s15 + $0x8] ss:$0 sps:$4 sm:$0xff]   ;;  %v2359_v5 = vld [vmem:[#allocation7 + $0x154] ss:$56 sps:$4 sm:$0xff]   ;;  %v2361_v7 = vld [vmem:[#allocation7 + $0x150] ss:$56 sps:$4 sm:$0xff]  }
  0x69   : > { %2241 = vmatpush3.bf16.msra.mxu0 %v2355_v1  ;;  %v2364_v6 = vld [vmem:[#allocation7 + $0x15c] ss:$56 sps:$4 sm:$0xff]   ;;  %v2362_v8 = vld [vmem:[#allocation7 + $0x158] ss:$56 sps:$4 sm:$0xff]   ;;  %889 = vmatprep.subr.bf16.mxu1 %v2359_v5  ;;  %v2370_v10 = vld [vmem:[#allocation7 + $0xec] ss:$56 sps:$4 sm:$0xff]  }
  0x6a   : > { %2242 = vmatprep.subr.bf16.mxu0 %v2356_v2  ;;  %890 = vmatpush1.bf16.msra.mxu1 %v2361_v7  ;;  %v2365_v9 = vld [vmem:[#allocation7 + $0xe4] ss:$56 sps:$4 sm:$0xff]   ;;  %v2367_v11 = vld [vmem:[#allocation7 + $0xe0] ss:$56 sps:$4 sm:$0xff]   ;;  %v2371_v13 = vld [vmem:[#allocation7 + $0x74] ss:$56 sps:$4 sm:$0xff]  }
  0x6b   : > { %v2368_v12 = vld [vmem:[#allocation7 + $0xe8] ss:$56 sps:$4 sm:$0xff]   ;;  %891 = vmatprep.subr.bf16.mxu1 %v2365_v9  ;;  %v2376_v14 = vld [vmem:[#allocation7 + $0x7c] ss:$56 sps:$4 sm:$0xff]   ;;  %v2374_v16 = vld [vmem:[#allocation7 + $0x78] ss:$56 sps:$4 sm:$0xff]   ;;  %913 = vmatprep.mubr.bf16.mxu1 %v2744_v22 }
  0x6c   : > { %v2373_v15 = vld [vmem:[#allocation7 + $0x70] ss:$56 sps:$4 sm:$0xff]   ;;  %v2377_v17 = vld [vmem:[#allocation7 + $0x4] ss:$56 sps:$4 sm:$0xff]   ;;  %v2379_v19 = vld [vmem:[#allocation7] ss:$56 sps:$4 sm:$0xff]  }
  0x6d   : > { %2243 = vmatpush3.bf16.msra.mxu0 %v2356_v2  ;;  %v2382_v18 = vld [vmem:[#allocation7 + $0xc] ss:$56 sps:$4 sm:$0xff]   ;;  %v2380_v20 = vld [vmem:[#allocation7 + $0x8] ss:$56 sps:$4 sm:$0xff]   ;;  %v2123_v24 = vld [vmem:[#allocation5] ss:$0 sm:$0xff] }
  0x6e   : > { %940 = vmatprep.subr.bf16.mxu0 %v2364_v6  ;;  %892 = vmatpush1.bf16.msra.mxu1 %v2367_v11  ;;  %v2385_v21 = vld [vmem:[#allocation7 + $0x164] ss:$56 sps:$4 sm:$0xff]   ;;  %v2383_v42 = vld [vmem:[#allocation7 + $0x160] ss:$56 sps:$4 sm:$0xff]   ;;  %v2391_v45 = vld [vmem:[#allocation7 + $0xf4] ss:$56 sps:$4 sm:$0xff]  }
  0x6f   : > { %893 = vmatprep.subr.bf16.mxu1 %v2371_v13  ;;  %v2388_v23 = vld [vmem:[#allocation7 + $0x16c] ss:$56 sps:$4 sm:$0xff]   ;;  %v2386_v43 = vld [vmem:[#allocation7 + $0x168] ss:$56 sps:$4 sm:$0xff]   ;;  %v2394_v46 = vld [vmem:[#allocation7 + $0xfc] ss:$56 sps:$4 sm:$0xff]  }
  0x70   : > { %2245 = vmatmul.mubr.msk.bf16.vlgmr.msra.gmra.mxu0 %vm391_vm0, %v2358_v4  ;;  %v2389_v48 = vld [vmem:[#allocation7 + $0xf0] ss:$56 sps:$4 sm:$0xff]   ;;  %v2397_v51 = vld [vmem:[#allocation7 + $0x84] ss:$56 sps:$4 sm:$0xff]   ;;  %v2395_v53 = vld [vmem:[#allocation7 + $0x80] ss:$56 sps:$4 sm:$0xff]  }
  0x71   : > { %941 = vmatpush1.bf16.msra.mxu0 %v2362_v8  ;;  %964 = vmatprep.mubr.bf16.mxu0 %v2744_v22  ;;  %v2392_v49 = vld [vmem:[#allocation7 + $0xf8] ss:$56 sps:$4 sm:$0xff]   ;;  %v2400_v52 = vld [vmem:[#allocation7 + $0x8c] ss:$56 sps:$4 sm:$0xff]   ;;  %v2398_v54 = vld [vmem:[#allocation7 + $0x88] ss:$56 sps:$4 sm:$0xff]  }
  0x72   : > { %942 = vmatprep.subr.bf16.mxu0 %v2370_v10  ;;  %894 = vmatpush1.bf16.msra.mxu1 %v2373_v15  ;;  %v2403_v56 = vld [vmem:[#allocation7 + $0x14] ss:$56 sps:$4 sm:$0xff]   ;;  %v2401_v58 = vld [vmem:[#allocation7 + $0x10] ss:$56 sps:$4 sm:$0xff]   ;;  %v2415_v0 = vld [vmem:[#allocation7 + $0x104] ss:$56 sps:$4 sm:$0xff]  }
  0x73   : > { %895 = vmatprep.subr.bf16.mxu1 %v2377_v17  ;;  %v2406_v57 = vld [vmem:[#allocation7 + $0x1c] ss:$56 sps:$4 sm:$0xff]   ;;  %v2404_v59 = vld [vmem:[#allocation7 + $0x18] ss:$56 sps:$4 sm:$0xff]   ;;  %v2418_v1 = vld [vmem:[#allocation7 + $0x10c] ss:$56 sps:$4 sm:$0xff]  }
  0x74   : > { %v2409_v60 = vld [vmem:[#allocation7 + $0x174] ss:$56 sps:$4 sm:$0xff]   ;;  %v2407_v62 = vld [vmem:[#allocation7 + $0x170] ss:$56 sps:$4 sm:$0xff]   ;;  %v2413_v2 = vld [vmem:[#allocation7 + $0x100] ss:$56 sps:$4 sm:$0xff]  }
  0x75   : > { %943 = vmatpush1.bf16.msra.mxu0 %v2368_v12  ;;  %v2412_v61 = vld [vmem:[#allocation7 + $0x17c] ss:$56 sps:$4 sm:$0xff]   ;;  %v2410_v63 = vld [vmem:[#allocation7 + $0x178] ss:$56 sps:$4 sm:$0xff]   ;;  %v2416_v3 = vld [vmem:[#allocation7 + $0x108] ss:$56 sps:$4 sm:$0xff]  }
  0x76   : > { %944 = vmatprep.subr.bf16.mxu0 %v2376_v14  ;;  %896 = vmatpush1.bf16.msra.mxu1 %v2379_v19  ;;  %v2421_v4 = vld [vmem:[#allocation7 + $0x94] ss:$56 sps:$4 sm:$0xff]   ;;  %v2419_v6 = vld [vmem:[#allocation7 + $0x90] ss:$56 sps:$4 sm:$0xff]   ;;  %v2427_v8 = vld [vmem:[#allocation7 + $0x24] ss:$56 sps:$4 sm:$0xff]  }
  0x77   : > { %991 = vmatprep.subr.bf16.mxu1 %v2385_v21  ;;  %v2424_v5 = vld [vmem:[#allocation7 + $0x9c] ss:$56 sps:$4 sm:$0xff]   ;;  %v2422_v7 = vld [vmem:[#allocation7 + $0x98] ss:$56 sps:$4 sm:$0xff]   ;;  %v2430_v9 = vld [vmem:[#allocation7 + $0x2c] ss:$56 sps:$4 sm:$0xff]  }
  0x78   : > { %v2425_v10 = vld [vmem:[#allocation7 + $0x20] ss:$56 sps:$4 sm:$0xff]   ;;  %v2433_v12 = vld [vmem:[#allocation7 + $0x184] ss:$56 sps:$4 sm:$0xff]   ;;  %v2436_v14 = vld [vmem:[#allocation7 + $0x114] ss:$56 sps:$4 sm:$0xff]  }
  0x79   : > { %945 = vmatpush1.bf16.msra.mxu0 %v2374_v16  ;;  %v2428_v11 = vld [vmem:[#allocation7 + $0x28] ss:$56 sps:$4 sm:$0xff]   ;;  %v2439_v16 = vld [vmem:[#allocation7 + $0xa4] ss:$56 sps:$4 sm:$0xff]   ;;  %s1534_s19 = sadd.s32 1, %s2894_s30 }
  0x7a   : > { %946 = vmatprep.subr.bf16.mxu0 %v2382_v18  ;;  %v2431_v13 = vld [vmem:[#allocation7 + $0x180] ss:$56 sps:$4 sm:$0xff]   ;;  %v2434_v15 = vld [vmem:[#allocation7 + $0x110] ss:$56 sps:$4 sm:$0xff]   ;;  %v2442_v18 = vld [vmem:[#allocation7 + $0x34] ss:$56 sps:$4 sm:$0xff]  }
  0x7b   : > { %v2437_v17 = vld [vmem:[#allocation7 + $0xa0] ss:$56 sps:$4 sm:$0xff]   ;;  %v2440_v19 = vld [vmem:[#allocation7 + $0x30] ss:$56 sps:$4 sm:$0xff]   ;;  %s2956_s20 = smul.u32 24, %s1534_s19 }
  0x7d   : > { %947 = vmatpush1.bf16.msra.mxu0 %v2380_v20  ;;  %v3554_v20 = vlaneseq  ;;  %p2231_p9 = scmp.gt.s32.totalorder %s2956_s20, 64 }
  0x7e   : > { %1042 = vmatprep.subr.bf16.mxu0 %v2388_v23 }
  0x7f   : > { %v2959_v21 = vshrl.u32 %v3554_v20, 7 }
  0x81   : > { %v526_v23 = vsub.s32 0, %v2959_v21 }
 0x130   : > { %v2246_v25 = vpop.f32.mrf.mxu0 }
 0x131   : > { %v441_v26 = vadd.f32 %v2246_v25, %v2123_v24  ;;  %v2963_v25 = vld [vmem:[#allocation8] sm:$0xff] }
 0x132   : > { %v432_v27 = vpop.f32.mrf.mxu0 }
 0x133   : > { %v447_v28 = vpack.c.bf16 %v441_v26, %v441_v26  ;;  %v433_v31 = vadd.f32 %v2123_v24, %v432_v27  ;;  %v530_v26 = vsub.s32 1, %v2959_v21 }
 0x134   : > { %v2247_v29 = vpop.f32.mrf.mxu0 }
 0x135   : > { %v2131_v33 = vmul.bf16 3216621497, %v447_v28  ;;  %v527_v29 = vrot.slane %v2963_v25, %v526_v23 }
 0x136   : > { %v435_v30 = vpop.f32.mrf.mxu0 }
 0x137   : > { %v436_v32 = vadd.f32 %v2123_v24, %v435_v30  ;;  %2443 = vpow.bf16 %v2131_v33  ;;  %v534_v24 = vsub.s32 2, %v2959_v21 }
 0x139   : > { %v446_v34 = vpack.c.bf16 %v436_v32, %v433_v31  ;;  %v535_v30 = vrot.slane %v2963_v25, %v534_v24  ;;  %v531_v31 = vrot.slane %v2963_v25, %v530_v26 }
 0x13b   : > { %v2130_v35 = vmul.bf16 3216621497, %v446_v34 }
 0x13d   : > { %2445 = vpow.bf16 %v2130_v35 }
 0x145   : > { %v2444_v36 = vpop.eup %2443 }
 0x146   : > { %v457_v39 = vadd.bf16 1065369472, %v2444_v36 }
 0x14b   : > { %v2446_v37 = vpop.eup %2445 }
 0x14c   : > { %v456_v38 = vadd.bf16 1065369472, %v2446_v37 }
 0x14e   : > { %2447 = vrcp.bf16 %v456_v38 }
 0x14f   : > { %2449 = vrcp.bf16 %v457_v39 }
 0x15c   : > { %v2448_v40 = vpop.eup %2447 }
 0x15d   : > { %v459_v41 = vmul.bf16 1065369472, %v2448_v40  ;;  %v2450_v47 = vpop.eup %2449 }
 0x15e   : > { %v461_v50 = vmul.bf16 1065369472, %v2450_v47 }
 0x15f   : > { %v2911_v44 = vmul.bf16 %v459_v41, %v446_v34 }
 0x160   : > { %v2919_v55 = vmul.bf16 %v461_v50, %v447_v28 }
 0x161   : > { %2188 = vmatmul.mubr.msk.bf16.vlgmr.msra.gmra.mxu1 %vm874_vm1, %v2911_v44  ;;  %2190 = vmatmul.mubr.msk.bf16.vlgmr.msra.gmra.mxu0 %vm874_vm1, %v2911_v44 }
 0x162   : > { %992 = vmatpush1.bf16.msra.mxu1 %v2383_v42  ;;  %1043 = vmatpush1.bf16.msra.mxu0 %v2386_v43 }
 0x163   : > { %993 = vmatprep.subr.bf16.mxu1 %v2391_v45  ;;  %1044 = vmatprep.subr.bf16.mxu0 %v2394_v46 }
 0x164   : > { %923 = vmatprep.mubr.bf16.mxu1 %v2744_v22  ;;  %974 = vmatprep.mubr.bf16.mxu0 %v2744_v22 }
 0x166   : > { %994 = vmatpush1.bf16.msra.mxu1 %v2389_v48  ;;  %1045 = vmatpush1.bf16.msra.mxu0 %v2392_v49 }
 0x167   : > { %995 = vmatprep.subr.bf16.mxu1 %v2397_v51  ;;  %1046 = vmatprep.subr.bf16.mxu0 %v2400_v52 }
 0x169   : > { %2189 = vmatmul.mubr.msk.bf16.gmra.mxu1 %vm874_vm1, %v2919_v55  ;;  %2191 = vmatmul.mubr.msk.bf16.gmra.mxu0 %vm874_vm1, %v2919_v55 }
 0x16a   : > { %996 = vmatpush1.bf16.msra.mxu1 %v2395_v53  ;;  %1047 = vmatpush1.bf16.msra.mxu0 %v2398_v54 }
 0x16b   : > { %997 = vmatprep.subr.bf16.mxu1 %v2403_v56  ;;  %1048 = vmatprep.subr.bf16.mxu0 %v2406_v57 }
 0x16c   : > { %1015 = vmatprep.mubr.bf16.mxu1 %v2744_v22  ;;  %1066 = vmatprep.mubr.bf16.mxu0 %v2744_v22 }
 0x16e   : > { %998 = vmatpush1.bf16.msra.mxu1 %v2401_v58  ;;  %1049 = vmatpush1.bf16.msra.mxu0 %v2404_v59 }
 0x16f   : > { %1093 = vmatprep.subr.bf16.mxu1 %v2409_v60  ;;  %1144 = vmatprep.subr.bf16.mxu0 %v2412_v61 }
 0x171   : > { %2192 = vmatmul.mubr.msk.bf16.vlgmr.msra.gmra.mxu1 %vm874_vm1, %v2911_v44  ;;  %2194 = vmatmul.mubr.msk.bf16.vlgmr.msra.gmra.mxu0 %vm874_vm1, %v2911_v44 }
 0x172   : > { %1094 = vmatpush1.bf16.msra.mxu1 %v2407_v62  ;;  %1145 = vmatpush1.bf16.msra.mxu0 %v2410_v63 }
 0x173   : > { %1095 = vmatprep.subr.bf16.mxu1 %v2415_v0  ;;  %1146 = vmatprep.subr.bf16.mxu0 %v2418_v1 }
 0x174   : > { %1025 = vmatprep.mubr.bf16.mxu1 %v2744_v22  ;;  %1076 = vmatprep.mubr.bf16.mxu0 %v2744_v22 }
 0x176   : > { %1096 = vmatpush1.bf16.msra.mxu1 %v2413_v2  ;;  %1147 = vmatpush1.bf16.msra.mxu0 %v2416_v3 }
 0x177   : > { %1097 = vmatprep.subr.bf16.mxu1 %v2421_v4  ;;  %1148 = vmatprep.subr.bf16.mxu0 %v2424_v5  ;;  %v542_v4 = vsub.s32 4, %v2959_v21  ;;  %v550_v5 = vsub.s32 6, %v2959_v21 }
 0x179   : > { %2193 = vmatmul.mubr.msk.bf16.gmra.mxu1 %vm874_vm1, %v2919_v55  ;;  %2195 = vmatmul.mubr.msk.bf16.gmra.mxu0 %vm874_vm1, %v2919_v55 }
 0x17a   : > { %1098 = vmatpush1.bf16.msra.mxu1 %v2419_v6  ;;  %1149 = vmatpush1.bf16.msra.mxu0 %v2422_v7 }
 0x17b   : > { %1099 = vmatprep.subr.bf16.mxu1 %v2427_v8  ;;  %1150 = vmatprep.subr.bf16.mxu0 %v2430_v9 }
 0x17c   : > { %1117 = vmatprep.mubr.bf16.mxu1 %v2744_v22  ;;  %1168 = vmatprep.mubr.bf16.mxu0 %v2744_v22 }
 0x17e   : > { %1100 = vmatpush1.bf16.msra.mxu1 %v2425_v10  ;;  %1151 = vmatpush1.bf16.msra.mxu0 %v2428_v11 }
 0x17f   : > { %1195 = vmatprep.subr.bf16.mxu1 %v2433_v12 }
 0x181   : > { %2196 = vmatmul.mubr.msk.bf16.vlgmr.msra.gmra.mxu1 %vm874_vm1, %v2911_v44  ;;  %2198 = vmatmul.mubr.msk.bf16.vlgmr.msra.gmra.mxu0 %vm874_vm1, %v2911_v44 }
 0x182   : > { %1196 = vmatpush1.bf16.msra.mxu1 %v2431_v13  ;;  %1127 = vmatprep.mubr.bf16.mxu1 %v2744_v22 }
 0x183   : > { %1197 = vmatprep.subr.bf16.mxu1 %v2436_v14  ;;  %1178 = vmatprep.mubr.bf16.mxu0 %v2744_v22 }
 0x186   : > { %1198 = vmatpush1.bf16.msra.mxu1 %v2434_v15  ;;  %v543_v15 = vrot.slane %v2963_v25, %v542_v4 }
 0x187   : > { %1199 = vmatprep.subr.bf16.mxu1 %v2439_v16  ;;  %v551_v16 = vrot.slane %v2963_v25, %v550_v5 }
 0x189   : > { %2197 = vmatmul.mubr.msk.bf16.gmra.mxu1 %vm874_vm1, %v2919_v55  ;;  %2199 = vmatmul.mubr.msk.bf16.gmra.mxu0 %vm874_vm1, %v2919_v55 }
 0x18a   : > { %1200 = vmatpush1.bf16.msra.mxu1 %v2437_v17  ;;  %1219 = vmatprep.mubr.bf16.mxu1 %v2744_v22  ;;  %v546_v17 = vsub.s32 5, %v2959_v21 }
 0x18b   : > { %1201 = vmatprep.subr.bf16.mxu1 %v2442_v18 }
 0x18e   : > { %1202 = vmatpush1.bf16.msra.mxu1 %v2440_v19 }
 0x191   : > { %2200 = vmatmul.mubr.msk.bf16.vlgmr.msra.gmra.mxu1 %vm874_vm1, %v2911_v44 }
 0x192   : > { %1229 = vmatprep.mubr.bf16.mxu1 %v2744_v22  ;;  %v538_v22 = vsub.s32 3, %v2959_v21 }
 0x194   : > { %v539_v33 = vrot.slane %v2963_v25, %v538_v22 }
 0x199   : > { %2201 = vmatmul.mubr.msk.bf16.gmra.mxu1 %vm874_vm1, %v2919_v55 }
 0x221   : > { %v915_v27 = vpop.f32.mrf.mxu1  ;;  %v966_v28 = vpop.f32.mrf.mxu0 }
 0x222   : > { %v916_v37 = vadd.f32 %v915_v27, %v527_v29  ;;  %v967_v38 = vadd.f32 %v966_v28, %v535_v30  ;;  %v554_v27 = vsub.s32 7, %v2959_v21 }
 0x223   : > { %v917_v32 = vpop.f32.mrf.mxu1  ;;  %v968_v34 = vpop.f32.mrf.mxu0 }
 0x224   : > { %v918_v41 = vadd.f32 %v917_v32, %v531_v31  ;;  %v969_v42 = vadd.f32 %v968_v34, %v539_v33  ;;  %v547_v34 = vrot.slane %v2963_v25, %v546_v17 }
 0x225   : > { %v919_v35 = vpop.f32.mrf.mxu1  ;;  %v970_v36 = vpop.f32.mrf.mxu0 }
 0x226   : > { %v920_v39 = vadd.f32 %v919_v35, %v527_v29  ;;  %v971_v40 = vadd.f32 %v970_v36, %v535_v30 }
 0x227   : > { %v921_v43 = vpop.f32.mrf.mxu1  ;;  %v972_v44 = vpop.f32.mrf.mxu0 }
 0x228   : > { %v2979_v45 = vpack.c.bf16 %v920_v39, %v916_v37  ;;  %v2981_v46 = vpack.c.bf16 %v971_v40, %v967_v38  ;;  %v922_v47 = vadd.f32 %v921_v43, %v531_v31  ;;  %v973_v48 = vadd.f32 %v972_v44, %v539_v33 }
 0x229   : > { %v925_v49 = vpop.f32.mrf.mxu1  ;;  %v976_v50 = vpop.f32.mrf.mxu0  ;;  %v555_v37 = vrot.slane %v2963_v25, %v554_v27 }
 0x22a   : > { %v2202_v51 = vmul.bf16 3216621497, %v2979_v45  ;;  %v2204_v52 = vmul.bf16 3216621497, %v2981_v46  ;;  %v2985_v53 = vpack.c.bf16 %v922_v47, %v918_v41  ;;  %v2987_v54 = vpack.c.bf16 %v973_v48, %v969_v42 }
 0x22b   : > { %v926_v55 = vadd.f32 %v925_v49, %v527_v29  ;;  %v977_v56 = vadd.f32 %v976_v50, %v535_v30  ;;  %v927_v57 = vpop.f32.mrf.mxu1  ;;  %v978_v58 = vpop.f32.mrf.mxu0 }
 0x22c   : > { %2451 = vpow.bf16 %v2202_v51  ;;  %v2203_v59 = vmul.bf16 3216621497, %v2985_v53  ;;  %v2205_v60 = vmul.bf16 3216621497, %v2987_v54  ;;  %v928_v61 = vadd.f32 %v927_v57, %v531_v31 }
 0x22d   : > { %2453 = vpow.bf16 %v2204_v52  ;;  %v2991_v62 = vpack.c.bf16 %v926_v55, %v926_v55  ;;  %v2993_v63 = vpack.c.bf16 %v977_v56, %v977_v56  ;;  %v979_v0 = vadd.f32 %v978_v58, %v539_v33  ;;  %v929_v1 = vpop.f32.mrf.mxu1  ;;  %v980_v2 = vpop.f32.mrf.mxu0  ;;  %v3020_v58 = vld [vmem:[#allocation8 + $0x8] sm:$0x3f] }
 0x22e   : > { %2455 = vpow.bf16 %v2203_v59  ;;  %v2995_v3 = vpack.c.bf16 %v928_v61, %v928_v61 }
 0x22f   : > { %2457 = vpow.bf16 %v2205_v60  ;;  %v2216_v6 = vmul.bf16 3216621497, %v2991_v62  ;;  %v2218_v7 = vmul.bf16 3216621497, %v2993_v63  ;;  %v3001_v8 = vpack.c.bf16 %v979_v0, %v979_v0  ;;  %v930_v9 = vpop.f32.mrf.mxu1  ;;  %v981_v10 = vpop.f32.mrf.mxu0 }
 0x230   : > { %v2217_v11 = vmul.bf16 3216621497, %v2995_v3 }
 0x231   : > { %2459 = vpow.bf16 %v2216_v6  ;;  %v2219_v12 = vmul.bf16 3216621497, %v3001_v8  ;;  %v1017_v13 = vpop.f32.mrf.mxu1  ;;  %v1068_v14 = vpop.f32.mrf.mxu0 }
 0x232   : > { %2461 = vpow.bf16 %v2218_v7  ;;  %v1018_v30 = vadd.f32 %v1017_v13, %v543_v15  ;;  %v1069_v33 = vadd.f32 %v1068_v14, %v551_v16  ;;  %v559_v14 = vrot.slane %v3020_v58, %v526_v23 }
 0x233   : > { %2463 = vpow.bf16 %v2217_v11  ;;  %v1019_v18 = vpop.f32.mrf.mxu1  ;;  %v1070_v19 = vpop.f32.mrf.mxu0 }
 0x234   : > { %2465 = vpow.bf16 %v2219_v12  ;;  %v1020_v49 = vadd.f32 %v1019_v18, %v547_v34  ;;  %v1071_v57 = vadd.f32 %v1070_v19, %v555_v37  ;;  %v3035_v19 = vrot.slane %v3020_v58, %v534_v24 }
 0x235   : > { %v1021_v28 = vpop.f32.mrf.mxu1  ;;  %v1072_v29 = vpop.f32.mrf.mxu0 }
 0x236   : > { %v1022_v31 = vadd.f32 %v1021_v28, %v543_v15  ;;  %v1073_v32 = vadd.f32 %v1072_v29, %v551_v16 }
 0x237   : > { %v1023_v35 = vpop.f32.mrf.mxu1  ;;  %v1074_v36 = vpop.f32.mrf.mxu0 }
 0x238   : > { %v3015_v38 = vpack.c.bf16 %v1022_v31, %v1018_v30  ;;  %v3017_v39 = vpack.c.bf16 %v1073_v32, %v1069_v33  ;;  %v1024_v44 = vadd.f32 %v1023_v35, %v547_v34  ;;  %v1075_v50 = vadd.f32 %v1074_v36, %v555_v37 }
 0x239   : > { %v1027_v40 = vpop.f32.mrf.mxu1  ;;  %v1078_v41 = vpop.f32.mrf.mxu0  ;;  %v3045_v35 = vrot.slane %v3020_v58, %v530_v26 }
 0x23a   : > { %v2452_v42 = vpop.eup %2451  ;;  %v2206_v43 = vmul.bf16 3216621497, %v3015_v38  ;;  %v1028_v25 = vadd.f32 %v1027_v40, %v543_v15  ;;  %v2208_v61 = vmul.bf16 3216621497, %v3017_v39  ;;  %v1079_v0 = vadd.f32 %v1078_v41, %v551_v16 }
 0x23b   : > { %v2454_v47 = vpop.eup %2453  ;;  %v1378_v48 = vadd.bf16 1065369472, %v2452_v42  ;;  %v1029_v51 = vpop.f32.mrf.mxu1  ;;  %v3023_v6 = vpack.c.bf16 %v1024_v44, %v1020_v49  ;;  %v3025_v10 = vpack.c.bf16 %v1075_v50, %v1071_v57 }
 0x23c   : > { %v1080_v52 = vpop.f32.mrf.mxu0  ;;  %v2456_v55 = vpop.eup %2455  ;;  %v1380_v56 = vadd.bf16 1065369472, %v2454_v47  ;;  %2467 = vpow.bf16 %v2206_v43  ;;  %v1030_v7 = vadd.f32 %v1029_v51, %v547_v34  ;;  %v3030_v18 = vpack.c.bf16 %v1028_v25, %v1028_v25 }
 0x23d   : > { %v2458_v59 = vpop.eup %2457  ;;  %2469 = vrcp.bf16 %v1378_v48  ;;  %v1379_v60 = vadd.bf16 1065369472, %v2456_v55  ;;  %v1031_v1 = vpop.f32.mrf.mxu1  ;;  %v1081_v11 = vadd.f32 %v1080_v52, %v555_v37  ;;  %v3037_v29 = vpack.c.bf16 %v1079_v0, %v1079_v0 }
 0x23e   : > { %v1082_v2 = vpop.f32.mrf.mxu0  ;;  %2471 = vrcp.bf16 %v1380_v56  ;;  %v1381_v5 = vadd.bf16 1065369472, %v2458_v59  ;;  %v3039_v30 = vpack.c.bf16 %v1030_v7, %v1030_v7  ;;  %v2207_v34 = vmul.bf16 3216621497, %v3023_v6 }
 0x23f   : > { %v2460_v9 = vpop.eup %2459  ;;  %2473 = vrcp.bf16 %v1379_v60  ;;  %v1032_v12 = vpop.f32.mrf.mxu1  ;;  %v2209_v36 = vmul.bf16 3216621497, %v3025_v10  ;;  %v3048_v37 = vpack.c.bf16 %v1081_v11, %v1081_v11  ;;  %v2220_v42 = vmul.bf16 3216621497, %v3030_v18 }
 0x240   : > { %v1083_v13 = vpop.f32.mrf.mxu0  ;;  %v2462_v15 = vpop.eup %2461  ;;  %2475 = vrcp.bf16 %v1381_v5  ;;  %v1392_v16 = vadd.bf16 1065369472, %v2460_v9  ;;  %v3054_v43 = vrot.slane %v3020_v58, %v538_v22  ;;  %v2222_v26 = vmul.bf16 3216621497, %v3037_v29 }
 0x241   : > { %v2464_v27 = vpop.eup %2463  ;;  %v1394_v28 = vadd.bf16 1065369472, %v2462_v15  ;;  %2477 = vpow.bf16 %v2208_v61  ;;  %v1119_v31 = vpop.f32.mrf.mxu1  ;;  %v2221_v44 = vmul.bf16 3216621497, %v3039_v30  ;;  %v2223_v55 = vmul.bf16 3216621497, %v3048_v37 }
 0x242   : > { %v1170_v32 = vpop.f32.mrf.mxu0  ;;  %v2466_v23 = vpop.eup %2465  ;;  %2479 = vrcp.bf16 %v1392_v16  ;;  %v1393_v33 = vadd.bf16 1065369472, %v2464_v27  ;;  %v1120_v47 = vadd.f32 %v1119_v31, %v559_v14  ;;  %v3065_v25 = vrot.slane %v3020_v58, %v542_v4 }
 0x243   : > { %2481 = vrcp.bf16 %v1394_v28  ;;  %v1395_v24 = vadd.bf16 1065369472, %v2466_v23  ;;  %v1121_v40 = vpop.f32.mrf.mxu1  ;;  %v1171_v50 = vadd.f32 %v1170_v32, %v3035_v19  ;;  %v3077_v7 = vrot.slane %v3020_v58, %v546_v17 }
 0x244   : > { %v1172_v41 = vpop.f32.mrf.mxu0  ;;  %2483 = vrcp.bf16 %v1393_v33  ;;  %v1122_v22 = vadd.f32 %v1121_v40, %v3045_v35 }
 0x245   : > { %2485 = vrcp.bf16 %v1395_v24  ;;  %v1123_v48 = vpop.f32.mrf.mxu1  ;;  %v1173_v0 = vadd.f32 %v1172_v41, %v3054_v43 }
 0x246   : > { %v1174_v49 = vpop.f32.mrf.mxu0  ;;  %2487 = vpow.bf16 %v2207_v34  ;;  %v1124_v51 = vadd.f32 %v1123_v48, %v559_v14 }
 0x247   : > { %v1175_v52 = vadd.f32 %v1174_v49, %v3035_v19  ;;  %2489 = vpow.bf16 %v2209_v36  ;;  %v1125_v56 = vpop.f32.mrf.mxu1 }
 0x248   : > { %v1176_v57 = vpop.f32.mrf.mxu0  ;;  %2491 = vpow.bf16 %v2220_v42  ;;  %v3067_v59 = vpack.c.bf16 %v1124_v51, %v1120_v47  ;;  %v1126_v61 = vadd.f32 %v1125_v56, %v3045_v35 }
 0x249   : > { %v3069_v60 = vpack.c.bf16 %v1175_v52, %v1171_v50  ;;  %2493 = vpow.bf16 %v2222_v26  ;;  %v1177_v1 = vadd.f32 %v1176_v57, %v3054_v43  ;;  %v1129_v2 = vpop.f32.mrf.mxu1 }
 0x24a   : > { %v1180_v5 = vpop.f32.mrf.mxu0  ;;  %v2468_v4 = vpop.eup %2467  ;;  %2495 = vpow.bf16 %v2221_v44  ;;  %v2210_v9 = vmul.bf16 3216621497, %v3067_v59  ;;  %v3081_v12 = vpack.c.bf16 %v1126_v61, %v1122_v22  ;;  %v1130_v27 = vadd.f32 %v1129_v2, %v559_v14 }
 0x24b   : > { %v2212_v11 = vmul.bf16 3216621497, %v3069_v60  ;;  %v2470_v13 = vpop.eup %2469  ;;  %v1382_v15 = vadd.bf16 1065369472, %v2468_v4  ;;  %2497 = vpow.bf16 %v2223_v55  ;;  %v3083_v16 = vpack.c.bf16 %v1177_v1, %v1173_v0  ;;  %v3085_v28 = vpop.f32.mrf.mxu1 }
 0x24c   : > { %v3087_v31 = vpop.f32.mrf.mxu0  ;;  %v2472_v17 = vpop.eup %2471  ;;  %v1407_v58 = vmul.bf16 1065369472, %v2470_v13  ;;  %2499 = vpow.bf16 %v2210_v9  ;;  %v2211_v32 = vmul.bf16 3216621497, %v3081_v12  ;;  %v1181_v23 = vadd.f32 %v1180_v5, %v3035_v19 }
 0x24d   : > { %v2474_v33 = vpop.eup %2473  ;;  %v1411_v34 = vmul.bf16 1065369472, %v2472_v17  ;;  %2501 = vrcp.bf16 %v1382_v15  ;;  %v2213_v24 = vmul.bf16 3216621497, %v3083_v16  ;;  %v3092_v36 = vpack.c.bf16 %v1130_v27, %v1130_v27  ;;  %v1133_v40 = vpop.f32.mrf.mxu1 }
 0x24e   : > { %v1184_v14 = vpop.f32.mrf.mxu0  ;;  %v2476_v41 = vpop.eup %2475  ;;  %v3095_v42 = vmul.bf16 %v1407_v58, %v2979_v45  ;;  %v1409_v26 = vmul.bf16 1065369472, %v2474_v33  ;;  %2503 = vpow.bf16 %v2212_v11  ;;  %v3097_v44 = vpack.c.bf16 %v1181_v23, %v1181_v23 }
 0x24f   : > { %v2478_v47 = vpop.eup %2477  ;;  %v3100_v19 = vmul.bf16 %v1411_v34, %v2981_v46  ;;  %v1413_v48 = vmul.bf16 1065369472, %v2476_v41  ;;  %2505 = vpow.bf16 %v2211_v32  ;;  %v2224_v49 = vmul.bf16 3216621497, %v3092_v36  ;;  %v1134_v50 = vpop.f32.mrf.mxu1 }
 0x250   : > { %v1185_v51 = vpop.f32.mrf.mxu0  ;;  %v2480_v52 = vpop.eup %2479  ;;  %v3568_v55 = vunpack.c.l.bf16 %v3095_v42  ;;  %v3555_v45 = vunpack.c.h.bf16 %v3095_v42  ;;  %v3106_v22 = vmul.bf16 %v1409_v26, %v2985_v53  ;;  %v1384_v56 = vadd.bf16 1065369472, %v2478_v47 }
 0x251   : > { %v2482_v57 = vpop.eup %2481  ;;  %v3564_v61 = vunpack.c.l.bf16 %v3100_v19  ;;  %v3557_v46 = vunpack.c.h.bf16 %v3100_v19  ;;  %v3111_v0 = vmul.bf16 %v1413_v48, %v2987_v54  ;;  %v1435_v1 = vmul.bf16 1065369472, %v2480_v52  ;;  %v1221_v2 = vpop.f32.mrf.mxu1 }
 0x252   : > { %v2484_v5 = vpop.eup %2483  ;;  %v3565_v4 = vunpack.c.l.bf16 %v3106_v22  ;;  %v3556_v9 = vunpack.c.h.bf16 %v3106_v22  ;;  %v1439_v11 = vmul.bf16 1065369472, %v2482_v57  ;;  %2507 = vrcp.bf16 %v1384_v56 }
 0x253   : > { %v2486_v53 = vpop.eup %2485  ;;  %v3559_v13 = vunpack.c.l.bf16 %v3111_v0  ;;  %v3558_v15 = vunpack.c.h.bf16 %v3111_v0  ;;  %v3118_v27 = vmul.bf16 %v1435_v1, %v2991_v62  ;;  %v1437_v17 = vmul.bf16 1065369472, %v2484_v5  ;;  %v1223_v54 = vpop.f32.mrf.mxu1 }
 0x254   : > { %v2488_v58 = vpop.eup %2487  ;;  %v3121_v32 = vmul.bf16 %v1439_v11, %v2993_v63  ;;  %v1441_v23 = vmul.bf16 1065369472, %v2486_v53  ;;  %2509 = vpow.bf16 %v2213_v24  ;;  %v2226_v33 = vmul.bf16 3216621497, %v3097_v44 }
 0x255   : > { %v2490_v34 = vpop.eup %2489  ;;  %v3571_v40 = vunpack.c.l.bf16 %v3118_v27  ;;  %v3126_v14 = vmul.bf16 %v1437_v17, %v2995_v3  ;;  %v1383_v41 = vadd.bf16 1065369472, %v2488_v58  ;;  %2511 = vpow.bf16 %v2224_v49  ;;  %v1225_v62 = vpop.f32.mrf.mxu1 }
 0x256   : > { %v2492_v26 = vpop.eup %2491  ;;  %v3573_v47 = vunpack.c.l.bf16 %v3121_v32  ;;  %v3130_v48 = vmul.bf16 %v1441_v23, %v3001_v8  ;;  %v1385_v63 = vadd.bf16 1065369472, %v2490_v34  ;;  %2513 = vpow.bf16 %v2226_v33 }
 0x257   : > { %v2494_v24 = vpop.eup %2493  ;;  %v3572_v50 = vunpack.c.l.bf16 %v3126_v14  ;;  %2515 = vrcp.bf16 %v1383_v41  ;;  %v1396_v51 = vadd.bf16 1065369472, %v2492_v26  ;;  %v1132_v3 = vadd.f32 %v3085_v28, %v3045_v35  ;;  %v1227_v52 = vpop.f32.mrf.mxu1 }
 0x258   : > { %v2496_v56 = vpop.eup %2495  ;;  %2517 = vrcp.bf16 %v1385_v63  ;;  %v1398_v57 = vadd.bf16 1065369472, %v2494_v24  ;;  %v1183_v8 = vadd.f32 %v3087_v31, %v3054_v43  ;;  %v1222_v53 = vadd.f32 %v1221_v2, %v3065_v25 }
 0x259   : > { %v2498_v1 = vpop.eup %2497  ;;  %2519 = vrcp.bf16 %v1396_v51  ;;  %v1397_v5 = vadd.bf16 1065369472, %v2496_v56  ;;  %v3138_v11 = vpack.c.bf16 %v1132_v3, %v1132_v3  ;;  %v1231_v17 = vpop.f32.mrf.mxu1  ;;  %v1224_v23 = vadd.f32 %v1223_v54, %v3077_v7 }
 0x25a   : > { %v2500_v58 = vpop.eup %2499  ;;  %2521 = vrcp.bf16 %v1398_v57  ;;  %v1399_v35 = vadd.bf16 1065369472, %v2498_v1  ;;  %v3141_v28 = vpack.c.bf16 %v1183_v8, %v1183_v8  ;;  %v1226_v31 = vadd.f32 %v1225_v62, %v3065_v25 }
 0x25b   : > { %v2502_v33 = vpop.eup %2501  ;;  %2523 = vrcp.bf16 %v1397_v5  ;;  %v1386_v34 = vadd.bf16 1065369472, %v2500_v58  ;;  %v2225_v43 = vmul.bf16 3216621497, %v3138_v11  ;;  %v1233_v41 = vpop.f32.mrf.mxu1  ;;  %v1228_v24 = vadd.f32 %v1227_v52, %v3077_v7 }
 0x25c   : > { %v2504_v26 = vpop.eup %2503  ;;  %v1415_v63 = vmul.bf16 1065369472, %v2502_v33  ;;  %2525 = vrcp.bf16 %v1399_v35  ;;  %v2227_v2 = vmul.bf16 3216621497, %v3141_v28  ;;  %v3148_v56 = vpack.c.bf16 %v1226_v31, %v1222_v53 }
 0x25d   : > { %v2506_v51 = vpop.eup %2505  ;;  %2527 = vrcp.bf16 %v1386_v34  ;;  %v1388_v3 = vadd.bf16 1065369472, %v2504_v26  ;;  %v1232_v54 = vadd.f32 %v1231_v17, %v3065_v25  ;;  %v1235_v57 = vpop.f32.mrf.mxu1  ;;  %v3154_v1 = vpack.c.bf16 %v1228_v24, %v1224_v23 }
 0x25e   : > { %v3152_v8 = vmul.bf16 %v1415_v63, %v3015_v38  ;;  %v1387_v62 = vadd.bf16 1065369472, %v2506_v51  ;;  %2529 = vpow.bf16 %v2225_v43  ;;  %v2214_v5 = vmul.bf16 3216621497, %v3148_v56 }
 0x25f   : > { %2531 = vrcp.bf16 %v1388_v3  ;;  %v3157_v58 = vpack.c.bf16 %v1232_v54, %v1232_v54  ;;  %v1234_v52 = vadd.f32 %v1233_v41, %v3077_v7  ;;  %v1236_v35 = vpop.f32.mrf.mxu1  ;;  %v2215_v38 = vmul.bf16 3216621497, %v3154_v1 }
 0x260   : > { %v2508_v53 = vpop.eup %2507  ;;  %v3561_v33 = vunpack.c.l.bf16 %v3152_v8  ;;  %v3560_v25 = vunpack.c.h.bf16 %v3152_v8  ;;  %2533 = vrcp.bf16 %v1387_v62 }
 0x261   : > { %v1419_v17 = vmul.bf16 1065369472, %v2508_v53  ;;  %2535 = vpow.bf16 %v2227_v2  ;;  %v2228_v23 = vmul.bf16 3216621497, %v3157_v58  ;;  %v3164_v34 = vpack.c.bf16 %v1234_v52, %v1234_v52 }
 0x262   : > { %v2510_v43 = vpop.eup %2509  ;;  %2537 = vpow.bf16 %v2214_v5 }
 0x263   : > { %v2512_v31 = vpop.eup %2511  ;;  %v3167_v7 = vmul.bf16 %v1419_v17, %v3017_v39  ;;  %v1389_v41 = vadd.bf16 1065369472, %v2510_v43  ;;  %2539 = vpow.bf16 %v2215_v38  ;;  %v2229_v24 = vmul.bf16 3216621497, %v3164_v34 }
 0x264   : > { %v2514_v26 = vpop.eup %2513  ;;  %v1400_v63 = vadd.bf16 1065369472, %v2512_v31  ;;  %2541 = vpow.bf16 %v2228_v23 }
 0x265   : > { %v2516_v51 = vpop.eup %2515  ;;  %v3567_v2 = vunpack.c.l.bf16 %v3167_v7  ;;  %v3566_v3 = vunpack.c.h.bf16 %v3167_v7  ;;  %2543 = vrcp.bf16 %v1389_v41  ;;  %v1402_v54 = vadd.bf16 1065369472, %v2514_v26 }
 0x266   : > { %v2518_v57 = vpop.eup %2517  ;;  %v1417_v62 = vmul.bf16 1065369472, %v2516_v51  ;;  %2545 = vrcp.bf16 %v1400_v63 }
 0x267   : > { %v2520_v5 = vpop.eup %2519  ;;  %v1421_v39 = vmul.bf16 1065369472, %v2518_v57  ;;  %2547 = vrcp.bf16 %v1402_v54 }
 0x268   : > { %v2522_v52 = vpop.eup %2521  ;;  %v3173_v35 = vmul.bf16 %v1417_v62, %v3023_v6  ;;  %v1443_v53 = vmul.bf16 1065369472, %v2520_v5  ;;  %2549 = vpow.bf16 %v2229_v24 }
 0x269   : > { %v2524_v38 = vpop.eup %2523  ;;  %v3176_v17 = vmul.bf16 %v1421_v39, %v3025_v10  ;;  %v1447_v23 = vmul.bf16 1065369472, %v2522_v52 }
 0x26a   : > { %v2526_v43 = vpop.eup %2525  ;;  %v3563_v31 = vunpack.c.l.bf16 %v3173_v35  ;;  %v3562_v41 = vunpack.c.h.bf16 %v3173_v35  ;;  %v3181_v26 = vmul.bf16 %v1443_v53, %v3030_v18  ;;  %v1445_v63 = vmul.bf16 1065369472, %v2524_v38 }
 0x26b   : > { %v2528_v51 = vpop.eup %2527  ;;  %v3570_v6 = vunpack.c.l.bf16 %v3176_v17  ;;  %v3569_v54 = vunpack.c.h.bf16 %v3176_v17  ;;  %v3186_v24 = vmul.bf16 %v1447_v23, %v3037_v29  ;;  %v1449_v10 = vmul.bf16 1065369472, %v2526_v43 }
 0x26c   : > { %v2530_v57 = vpop.eup %2529  ;;  %v3190_v5 = vmul.bf16 %v1445_v63, %v3039_v30  ;;  %v1423_v39 = vmul.bf16 1065369472, %v2528_v51 }
 0x26d   : > { %v2532_v52 = vpop.eup %2531  ;;  %v3194_v53 = vmul.bf16 %v1449_v10, %v3048_v37  ;;  %v1401_v38 = vadd.bf16 1065369472, %v2530_v57 }
 0x26e   : > { %v2534_v20 = vpop.eup %2533  ;;  %v3198_v29 = vmul.bf16 %v1423_v39, %v3067_v59  ;;  %v1427_v23 = vmul.bf16 1065369472, %v2532_v52 }
 0x26f   : > { %v2536_v43 = vpop.eup %2535  ;;  %v1425_v30 = vmul.bf16 1065369472, %v2534_v20  ;;  %2551 = vrcp.bf16 %v1401_v38 }
 0x270   : > { %v2538_v63 = vpop.eup %2537  ;;  %v3204_v37 = vmul.bf16 %v1427_v23, %v3069_v60  ;;  %v1403_v10 = vadd.bf16 1065369472, %v2536_v43 }
 0x271   : > { %v2540_v57 = vpop.eup %2539  ;;  %v3207_v49 = vmul.bf16 %v1425_v30, %v3081_v12  ;;  %v1390_v59 = vadd.bf16 1065369472, %v2538_v63 }
 0x272   : > { %v2542_v39 = vpop.eup %2541  ;;  %2553 = vrcp.bf16 %v1403_v10  ;;  %v1391_v38 = vadd.bf16 1065369472, %v2540_v57 }
 0x273   : > { %v2544_v62 = vpop.eup %2543  ;;  %v1513_v18 = vunpack.c.h.bf16 %v3207_v49  ;;  %2555 = vrcp.bf16 %v1390_v59  ;;  %v1404_v60 = vadd.bf16 1065369472, %v2542_v39 }
 0x274   : > { %v2546_v23 = vpop.eup %2545  ;;  %v1429_v43 = vmul.bf16 1065369472, %v2544_v62  ;;  %2557 = vrcp.bf16 %v1391_v38 }
 0x275   : > { %v2548_v12 = vpop.eup %2547  ;;  %v1451_v30 = vmul.bf16 1065369472, %v2546_v23  ;;  %2559 = vrcp.bf16 %v1404_v60 }
 0x276   : > { %v2550_v63 = vpop.eup %2549  ;;  %v3214_v52 = vmul.bf16 %v1429_v43, %v3083_v16  ;;  %v1455_v20 = vmul.bf16 1065369472, %v2548_v12 }
 0x277   : > { %v3217_v10 = vmul.bf16 %v1451_v30, %v3092_v36  ;;  %v1405_v57 = vadd.bf16 1065369472, %v2550_v63 }
 0x278   : > { %v3222_v39 = vmul.bf16 %v1455_v20, %v3097_v44 }
 0x279   : > { %2561 = vrcp.bf16 %v1405_v57 }
 0x27d   : > { %v2552_v60 = vpop.eup %2551 }
 0x27e   : > { %v1453_v16 = vmul.bf16 1065369472, %v2552_v60 }
 0x280   : > { %v2554_v23 = vpop.eup %2553  ;;  %v3227_v43 = vmul.bf16 %v1453_v16, %v3138_v11 }
 0x281   : > { %v2556_v36 = vpop.eup %2555  ;;  %v1457_v12 = vmul.bf16 1065369472, %v2554_v23 }
 0x282   : > { %v2558_v30 = vpop.eup %2557  ;;  %v1431_v59 = vmul.bf16 1065369472, %v2556_v36 }
 0x283   : > { %v2560_v51 = vpop.eup %2559  ;;  %v3231_v44 = vmul.bf16 %v1457_v12, %v3141_v28  ;;  %v1433_v20 = vmul.bf16 1065369472, %v2558_v30 }
 0x284   : > { %v3234_v57 = vmul.bf16 %v1431_v59, %v3148_v56  ;;  %v1459_v38 = vmul.bf16 1065369472, %v2560_v51 }
 0x285   : > { %v3238_v11 = vmul.bf16 %v1433_v20, %v3154_v1 }
 0x286   : > { %v1502_v16 = vunpack.c.l.bf16 %v3234_v57  ;;  %v1516_v23 = vunpack.c.h.bf16 %v3234_v57  ;;  %v3243_v36 = vmul.bf16 %v1459_v38, %v3157_v58  ;;  %1540 = sbr.rel (%p2231_p9) target bundleno = 670 (0x29e), region = 64 }
 0x287   : > { %v2562_v63 = vpop.eup %2561 }
 0x288   : > { %v1461_v51 = vmul.bf16 1065369472, %v2562_v63 }
 0x28a   : > { %v3249_v59 = vmul.bf16 %v1461_v51, %v3164_v34 }
 0x28b   : > { %v1541_v30 = vld [vmem:[#allocation2 + $0x30] sm:$0xff]  ;;  %v1555_v58 = vadd.f32 %v3555_v45, %v3568_v55  ;;  %v1542_v38 = vld [vmem:[#allocation2] sm:$0xff]  ;;  %v1557_v63 = vadd.f32 %v3556_v9, %v3565_v4  ;;  %v1559_v34 = vadd.f32 %v3557_v46, %v3564_v61  ;;  %v1561_v20 = vadd.f32 %v3558_v15, %v3559_v13  ;;  %v1543_v51 = vld [vmem:[#allocation2 + $0x58] sm:$0xff] }
 0x28c   : > { %v1544_v1 = vld [vmem:[#allocation2 + $0x18] sm:$0xff]  ;;  %v1545_v56 = vld [vmem:[#allocation2 + $0x50] sm:$0xff]  ;;  %v1563_v45 = vadd.f32 %v3560_v25, %v3561_v33  ;;  %v1565_v9 = vadd.f32 %v3562_v41, %v3563_v31  ;;  %v1567_v46 = vadd.f32 %v3566_v3, %v3567_v2  ;;  %v1569_v15 = vadd.f32 %v3569_v54, %v3570_v6  ;;  %v1546_v61 = vld [vmem:[#allocation2 + $0x68] sm:$0xff] }
 0x28d   : > { %v1556_v13 = vadd.f32 %v1555_v58, %v3571_v40  ;;  %v1558_v25 = vadd.f32 %v1557_v63, %v3572_v50  ;;  %v1560_v33 = vadd.f32 %v1559_v34, %v3573_v47  ;;  %v3577_v41 = vunpack.c.l.bf16 %v3130_v48  ;;  %v1547_v4 = vld [vmem:[#allocation2 + $0x8] sm:$0xff] }
 0x28e   : > { %v1548_v3 = vld [vmem:[#allocation2 + $0x48] sm:$0xff]  ;;  %v3578_v2 = vunpack.c.l.bf16 %v3181_v26  ;;  %v3579_v54 = vunpack.c.l.bf16 %v3190_v5  ;;  %v3580_v58 = vunpack.c.l.bf16 %v3186_v24  ;;  %v3581_v63 = vunpack.c.l.bf16 %v3194_v53 }
 0x28f   : > { %v1562_v31 = vadd.f32 %v1561_v20, %v3577_v41  ;;  %v1583_v60 = vadd.f32 %v1556_v13, %v1541_v30  ;;  %v1584_v34 = vadd.f32 %v1558_v25, %v1542_v38  ;;  %v1585_v47 = vadd.f32 %v1560_v33, %v1543_v51  ;;  %v1550_v33 = vld [vmem:[#allocation2 + $0x20] sm:$0xff]  ;;  %v1551_v25 = vld [vmem:[#allocation2 + $0x10] sm:$0xff] }
 0x290   : > { %v1564_v55 = vadd.f32 %v1563_v45, %v3578_v2  ;;  %v1566_v6 = vadd.f32 %v1565_v9, %v3579_v54  ;;  %v1568_v40 = vadd.f32 %v1567_v46, %v3580_v58  ;;  %v1570_v50 = vadd.f32 %v1569_v15, %v3581_v63  ;;  %v1549_v45 = vld [vmem:[#allocation2 + $0x40] sm:$0xff]  ;;  %v1554_v63 = vld [vmem:[#allocation2 + $0x28] sm:$0xff] }
 0x291   : > { %v1586_v62 = vadd.f32 %v1562_v31, %v1544_v1  ;;  %1597 = vst [vmem:[#allocation2 + $0x30] sm:$0xff] %v1583_v60  ;;  %1598 = vst [vmem:[#allocation2] sm:$0xff] %v1584_v34  ;;  %v3582_v9 = vunpack.c.l.bf16 %v3198_v29  ;;  %v3583_v46 = vunpack.c.h.bf16 %v3198_v29  ;;  %v3584_v15 = vunpack.c.l.bf16 %v3207_v49  ;;  %v1553_v58 = vld [vmem:[#allocation2 + $0x60] sm:$0xff] }
 0x292   : > { %v1587_v41 = vadd.f32 %v1564_v55, %v1545_v56  ;;  %v1588_v20 = vadd.f32 %v1566_v6, %v1546_v61  ;;  %v1589_v12 = vadd.f32 %v1568_v40, %v1547_v4  ;;  %v1590_v28 = vadd.f32 %v1570_v50, %v1548_v3  ;;  %1599 = vst [vmem:[#allocation2 + $0x58] sm:$0xff] %v1585_v47  ;;  %v1552_v3 = vld [vmem:[#allocation2 + $0x38] sm:$0xff] }
 0x293   : > { %1600 = vst [vmem:[#allocation2 + $0x18] sm:$0xff] %v1586_v62  ;;  %v1571_v2 = vadd.f32 %v3583_v46, %v3582_v9  ;;  %v1573_v13 = vadd.f32 %v1513_v18, %v3584_v15  ;;  %v3585_v55 = vunpack.c.l.bf16 %v3204_v37  ;;  %v3586_v61 = vunpack.c.h.bf16 %v3204_v37 }
 0x294   : > { %v3587_v40 = vunpack.c.l.bf16 %v3214_v52  ;;  %v3588_v47 = vunpack.c.h.bf16 %v3214_v52  ;;  %1601 = vst [vmem:[#allocation2 + $0x50] sm:$0xff] %v1587_v41  ;;  %1602 = vst [vmem:[#allocation2 + $0x68] sm:$0xff] %v1588_v20  ;;  %v1579_v31 = vadd.f32 %v1516_v23, %v1502_v16  ;;  %v3589_v6 = vunpack.c.l.bf16 %v3238_v11 }
 0x295   : > { %v1575_v4 = vadd.f32 %v3586_v61, %v3585_v55  ;;  %1603 = vst [vmem:[#allocation2 + $0x8] sm:$0xff] %v1589_v12  ;;  %1604 = vst [vmem:[#allocation2 + $0x48] sm:$0xff] %v1590_v28  ;;  %v3590_v54 = vunpack.c.h.bf16 %v3238_v11  ;;  %v3591_v60 = vunpack.c.l.bf16 %v3217_v10  ;;  %v3592_v1 = vunpack.c.l.bf16 %v3227_v43 }
 0x296   : > { %v1577_v50 = vadd.f32 %v3588_v47, %v3587_v40  ;;  %v3593_v28 = vunpack.c.l.bf16 %v3222_v39  ;;  %v3594_v38 = vunpack.c.l.bf16 %v3231_v44  ;;  %v3595_v34 = vunpack.c.l.bf16 %v3243_v36 }
 0x297   : > { %v1581_v62 = vadd.f32 %v3590_v54, %v3589_v6  ;;  %v1572_v56 = vadd.f32 %v1571_v2, %v3591_v60  ;;  %v1574_v12 = vadd.f32 %v1573_v13, %v3592_v1  ;;  %v3596_v20 = vunpack.c.l.bf16 %v3249_v59 }
 0x298   : > { %v1576_v30 = vadd.f32 %v1575_v4, %v3593_v28  ;;  %v1578_v51 = vadd.f32 %v1577_v50, %v3594_v38  ;;  %v1580_v41 = vadd.f32 %v1579_v31, %v3595_v34 }
 0x299   : > { %v1582_v9 = vadd.f32 %v1581_v62, %v3596_v20  ;;  %v1591_v46 = vadd.f32 %v1572_v56, %v1549_v45  ;;  %v1592_v15 = vadd.f32 %v1574_v12, %v1550_v33 }
 0x29a   : > { %v1593_v2 = vadd.f32 %v1576_v30, %v1551_v25  ;;  %v1594_v55 = vadd.f32 %v1578_v51, %v1552_v3  ;;  %v1595_v61 = vadd.f32 %v1580_v41, %v1553_v58 }
 0x29b   : > { %v1596_v13 = vadd.f32 %v1582_v9, %v1554_v63  ;;  %1605 = vst [vmem:[#allocation2 + $0x40] sm:$0xff] %v1591_v46  ;;  %1606 = vst [vmem:[#allocation2 + $0x20] sm:$0xff] %v1592_v15 }
 0x29c   : > { %1607 = vst [vmem:[#allocation2 + $0x10] sm:$0xff] %v1593_v2  ;;  %1608 = vst [vmem:[#allocation2 + $0x38] sm:$0xff] %v1594_v55 }
 0x29d   : > { %1609 = vst [vmem:[#allocation2 + $0x60] sm:$0xff] %v1595_v61  ;;  %1610 = vst [vmem:[#allocation2 + $0x28] sm:$0xff] %v1596_v13 }
 0x29e PF: > { %p2232_p10 = scmp.le.s32.totalorder %s2956_s20, 64 }
 0x29f   : > { %s1614_s29 = smul.u32 (!%p2232_p10), 24, %s2894_s30 }
 0x2a0   : > { %1613 = sbr.rel (%p2232_p10) target bundleno = 716 (0x2cc), region = 68 }
 0x2a5   : > { %v1617_v4 = vadd.s32 8, %v2959_v21  ;;  %v1618_v45 = vadd.s32 16, %v2959_v21  ;;  %v1619_v40 = vstv %s1614_s29  ;;  %v3597_v25 = vunpack.c.l.bf16 %v3095_v42  ;;  %v1674_v51 = vld [vmem:[#allocation2 + $0x30] sm:$0xff]  ;;  %v1675_v46 = vld [vmem:[#allocation2] sm:$0xff]  ;;  %v1676_v13 = vld [vmem:[#allocation2 + $0x58] sm:$0xff] }
 0x2a6   : > { %v3342_v47 = vadd.s32 %v1619_v40, %v2959_v21  ;;  %v3598_v31 = vunpack.c.h.bf16 %v3095_v42  ;;  %v3599_v54 = vunpack.c.l.bf16 %v3118_v27  ;;  %v3600_v60 = vunpack.c.l.bf16 %v3106_v22 }
 0x2a7   : > { %v3344_v50 = vadd.s32 %v1619_v40, %v1617_v4  ;;  %v3346_v33 = vadd.s32 %v1619_v40, %v1618_v45  ;;  %v3601_v12 = vunpack.c.h.bf16 %v3106_v22  ;;  %v3602_v42 = vunpack.c.l.bf16 %v3126_v14 }
 0x2a8   : > { %vm1623_vm2 = vcmp.lt.s32.totalorder %v3342_v47, 64  ;;  %v3603_v27 = vunpack.c.l.bf16 %v3100_v19  ;;  %v3604_v63 = vunpack.c.h.bf16 %v3100_v19  ;;  %v3605_v34 = vunpack.c.l.bf16 %v3121_v32 }
 0x2a9   : > { %vm1624_vm3 = vcmp.lt.s32.totalorder %v3344_v50, 64  ;;  %vm1625_vm4 = vcmp.lt.s32.totalorder %v3346_v33, 64  ;;  %v1632_v3 = vsel %vm1623_vm2, %v3597_v25, 0.0  ;;  %v1633_v56 = vsel %vm1623_vm2, %v3600_v60, 0.0 }
 0x2aa   : > { %v1646_v6 = vsel %vm1624_vm3, %v3598_v31, 0.0  ;;  %v1660_v62 = vsel %vm1625_vm4, %v3599_v54, 0.0  ;;  %v1647_v28 = vsel %vm1624_vm3, %v3601_v12, 0.0  ;;  %v1661_v30 = vsel %vm1625_vm4, %v3602_v42, 0.0 }
 0x2ab   : > { %v1688_v1 = vadd.f32 %v1646_v6, %v1632_v3  ;;  %v1634_v38 = vsel %vm1623_vm2, %v3603_v27, 0.0  ;;  %v1690_v58 = vadd.f32 %v1647_v28, %v1633_v56  ;;  %v1648_v22 = vsel %vm1624_vm3, %v3604_v63, 0.0  ;;  %v1677_v6 = vld [vmem:[#allocation2 + $0x18] sm:$0xff]  ;;  %v1679_v63 = vld [vmem:[#allocation2 + $0x68] sm:$0xff] }
 0x2ac   : > { %v1662_v14 = vsel %vm1625_vm4, %v3605_v34, 0.0  ;;  %v3606_v41 = vunpack.c.l.bf16 %v3111_v0  ;;  %v1692_v15 = vadd.f32 %v1648_v22, %v1634_v38  ;;  %v3607_v2 = vunpack.c.h.bf16 %v3111_v0 }
 0x2ad   : > { %v1689_v9 = vadd.f32 %v1688_v1, %v1660_v62  ;;  %v3608_v55 = vunpack.c.l.bf16 %v3130_v48  ;;  %v1691_v61 = vadd.f32 %v1690_v58, %v1661_v30  ;;  %v3609_v45 = vunpack.c.l.bf16 %v3152_v8  ;;  %v1678_v1 = vld [vmem:[#allocation2 + $0x50] sm:$0xff] }
 0x2ae   : > { %v1635_v20 = vsel %vm1623_vm2, %v3606_v41, 0.0  ;;  %v1649_v19 = vsel %vm1624_vm3, %v3607_v2, 0.0  ;;  %v3610_v25 = vunpack.c.h.bf16 %v3152_v8  ;;  %v1693_v31 = vadd.f32 %v1692_v15, %v1662_v14 }
 0x2af   : > { %v1663_v32 = vsel %vm1625_vm4, %v3608_v55, 0.0  ;;  %v1694_v4 = vadd.f32 %v1649_v19, %v1635_v20  ;;  %v1636_v40 = vsel %vm1623_vm2, %v3609_v45, 0.0  ;;  %v1716_v3 = vadd.f32 %v1689_v9, %v1674_v51  ;;  %v1680_v19 = vld [vmem:[#allocation2 + $0x8] sm:$0xff] }
 0x2b0   : > { %v1650_v0 = vsel %vm1624_vm3, %v3610_v25, 0.0  ;;  %v3611_v48 = vunpack.c.l.bf16 %v3181_v26  ;;  %v1717_v60 = vadd.f32 %v1691_v61, %v1675_v46  ;;  %v3612_v12 = vunpack.c.l.bf16 %v3173_v35 }
 0x2b1   : > { %v1696_v62 = vadd.f32 %v1650_v0, %v1636_v40  ;;  %v1695_v56 = vadd.f32 %v1694_v4, %v1663_v32  ;;  %v3613_v28 = vunpack.c.h.bf16 %v3173_v35  ;;  %1730 = vst [vmem:[#allocation2 + $0x30] sm:$0xff] %v1716_v3  ;;  %v1718_v30 = vadd.f32 %v1693_v31, %v1676_v13  ;;  %v1681_v3 = vld [vmem:[#allocation2 + $0x48] sm:$0xff] }
 0x2b2   : > { %v1664_v54 = vsel %vm1625_vm4, %v3611_v48, 0.0  ;;  %v1637_v8 = vsel %vm1623_vm2, %v3612_v12, 0.0  ;;  %v3614_v27 = vunpack.c.l.bf16 %v3190_v5  ;;  %1731 = vst [vmem:[#allocation2] sm:$0xff] %v1717_v60  ;;  %v3615_v22 = vunpack.c.l.bf16 %v3167_v7 }
 0x2b3   : > { %v1651_v42 = vsel %vm1624_vm3, %v3613_v28, 0.0  ;;  %v1697_v26 = vadd.f32 %v1696_v62, %v1664_v54  ;;  %v1719_v58 = vadd.f32 %v1695_v56, %v1677_v6  ;;  %v3616_v34 = vunpack.c.h.bf16 %v3167_v7  ;;  %1732 = vst [vmem:[#allocation2 + $0x58] sm:$0xff] %v1718_v30  ;;  %v1682_v56 = vld [vmem:[#allocation2 + $0x40] sm:$0xff] }
 0x2b4   : > { %v1665_v38 = vsel %vm1625_vm4, %v3614_v27, 0.0  ;;  %v1698_v51 = vadd.f32 %v1651_v42, %v1637_v8  ;;  %v1638_v35 = vsel %vm1623_vm2, %v3615_v22, 0.0  ;;  %v3617_v41 = vunpack.c.l.bf16 %v3186_v24 }
 0x2b5   : > { %v1652_v14 = vsel %vm1624_vm3, %v3616_v34, 0.0  ;;  %v1720_v20 = vadd.f32 %v1697_v26, %v1678_v1  ;;  %v3618_v15 = vunpack.c.l.bf16 %v3176_v17  ;;  %1733 = vst [vmem:[#allocation2 + $0x18] sm:$0xff] %v1719_v58  ;;  %v3619_v7 = vunpack.c.h.bf16 %v3176_v17 }
 0x2b6   : > { %v1666_v5 = vsel %vm1625_vm4, %v3617_v41, 0.0  ;;  %v1699_v9 = vadd.f32 %v1698_v51, %v1665_v38  ;;  %v1700_v46 = vadd.f32 %v1652_v14, %v1638_v35  ;;  %v3620_v24 = vunpack.c.l.bf16 %v3194_v53  ;;  %v1684_v35 = vld [vmem:[#allocation2 + $0x10] sm:$0xff] }
 0x2b7   : > { %v1639_v2 = vsel %vm1623_vm2, %v3618_v15, 0.0  ;;  %v1653_v55 = vsel %vm1624_vm3, %v3619_v7, 0.0  ;;  %v3621_v61 = vunpack.c.l.bf16 %v3198_v29  ;;  %v3622_v4 = vunpack.c.h.bf16 %v3198_v29  ;;  %1734 = vst [vmem:[#allocation2 + $0x50] sm:$0xff] %v1720_v20 }
 0x2b8   : > { %v1667_v32 = vsel %vm1625_vm4, %v3620_v24, 0.0  ;;  %v1721_v17 = vadd.f32 %v1699_v9, %v1679_v63  ;;  %v1701_v40 = vadd.f32 %v1700_v46, %v1666_v5  ;;  %v1702_v25 = vadd.f32 %v1653_v55, %v1639_v2  ;;  %v1686_v55 = vld [vmem:[#allocation2 + $0x60] sm:$0xff] }
 0x2b9   : > { %v1640_v13 = vsel %vm1623_vm2, %v3621_v61, 0.0  ;;  %v1654_v45 = vsel %vm1624_vm3, %v3622_v4, 0.0  ;;  %v3623_v0 = vunpack.c.l.bf16 %v3217_v10  ;;  %v3624_v6 = vunpack.c.l.bf16 %v3207_v49  ;;  %v1683_v49 = vld [vmem:[#allocation2 + $0x20] sm:$0xff]  ;;  %v1687_v4 = vld [vmem:[#allocation2 + $0x28] sm:$0xff] }
 0x2ba   : > { %v1704_v31 = vadd.f32 %v1654_v45, %v1640_v13  ;;  %v1655_v29 = vsel %vm1624_vm3, %v1513_v18, 0.0  ;;  %v3625_v54 = vunpack.c.l.bf16 %v3227_v43  ;;  %1735 = vst [vmem:[#allocation2 + $0x68] sm:$0xff] %v1721_v17  ;;  %v1722_v62 = vadd.f32 %v1701_v40, %v1680_v19 }
 0x2bb   : > { %v1668_v53 = vsel %vm1625_vm4, %v3623_v0, 0.0  ;;  %v1641_v48 = vsel %vm1623_vm2, %v3624_v6, 0.0  ;;  %v1703_v60 = vadd.f32 %v1702_v25, %v1667_v32  ;;  %v3626_v12 = vunpack.c.l.bf16 %v3204_v37 }
 0x2bc   : > { %v1669_v10 = vsel %vm1625_vm4, %v3625_v54, 0.0  ;;  %v1706_v1 = vadd.f32 %v1655_v29, %v1641_v48  ;;  %v1705_v28 = vadd.f32 %v1704_v31, %v1668_v53  ;;  %v3627_v42 = vunpack.c.h.bf16 %v3204_v37  ;;  %1736 = vst [vmem:[#allocation2 + $0x8] sm:$0xff] %v1722_v62 }
 0x2bd   : > { %v1642_v8 = vsel %vm1623_vm2, %v3626_v12, 0.0  ;;  %v3628_v43 = vunpack.c.l.bf16 %v3222_v39  ;;  %v3629_v26 = vunpack.c.l.bf16 %v3214_v52  ;;  %v1723_v38 = vadd.f32 %v1703_v60, %v1681_v3 }
 0x2be   : > { %v1656_v18 = vsel %vm1624_vm3, %v3627_v42, 0.0  ;;  %v1707_v51 = vadd.f32 %v1706_v1, %v1669_v10  ;;  %v3630_v63 = vunpack.c.h.bf16 %v3214_v52  ;;  %v1724_v22 = vadd.f32 %v1705_v28, %v1682_v56  ;;  %v1685_v52 = vld [vmem:[#allocation2 + $0x38] sm:$0xff] }
 0x2bf   : > { %v1670_v30 = vsel %vm1625_vm4, %v3628_v43, 0.0  ;;  %v1643_v27 = vsel %vm1623_vm2, %v3629_v26, 0.0  ;;  %v1708_v58 = vadd.f32 %v1656_v18, %v1642_v8  ;;  %v3631_v39 = vunpack.c.l.bf16 %v3231_v44  ;;  %1737 = vst [vmem:[#allocation2 + $0x48] sm:$0xff] %v1723_v38 }
 0x2c0   : > { %v1657_v37 = vsel %vm1624_vm3, %v3630_v63, 0.0  ;;  %v1644_v41 = vsel %vm1623_vm2, %v1502_v16, 0.0  ;;  %v1725_v5 = vadd.f32 %v1707_v51, %v1683_v49  ;;  %v1658_v9 = vsel %vm1624_vm3, %v1516_v23, 0.0  ;;  %1738 = vst [vmem:[#allocation2 + $0x40] sm:$0xff] %v1724_v22 }
 0x2c1   : > { %v1671_v34 = vsel %vm1625_vm4, %v3631_v39, 0.0  ;;  %v1710_v14 = vadd.f32 %v1657_v37, %v1643_v27  ;;  %v1709_v20 = vadd.f32 %v1708_v58, %v1670_v30  ;;  %v3632_v44 = vunpack.c.l.bf16 %v3243_v36 }
 0x2c2   : > { %v1712_v2 = vadd.f32 %v1658_v9, %v1644_v41  ;;  %v3633_v19 = vunpack.c.l.bf16 %v3238_v11  ;;  %v3634_v7 = vunpack.c.h.bf16 %v3238_v11  ;;  %1739 = vst [vmem:[#allocation2 + $0x20] sm:$0xff] %v1725_v5  ;;  %v3635_v36 = vunpack.c.l.bf16 %v3249_v59 }
 0x2c3   : > { %v1672_v46 = vsel %vm1625_vm4, %v3632_v44, 0.0  ;;  %v1711_v15 = vadd.f32 %v1710_v14, %v1671_v34  ;;  %v1726_v23 = vadd.f32 %v1709_v20, %v1684_v35 }
 0x2c4   : > { %v1645_v16 = vsel %vm1623_vm2, %v3633_v19, 0.0  ;;  %v1659_v57 = vsel %vm1624_vm3, %v3634_v7, 0.0  ;;  %v1673_v24 = vsel %vm1625_vm4, %v3635_v36, 0.0  ;;  %v1713_v13 = vadd.f32 %v1712_v2, %v1672_v46 }
 0x2c5   : > { %v1714_v32 = vadd.f32 %v1659_v57, %v1645_v16  ;;  %v1727_v61 = vadd.f32 %v1711_v15, %v1685_v52  ;;  %1740 = vst [vmem:[#allocation2 + $0x10] sm:$0xff] %v1726_v23 }
 0x2c6   : > { %v1728_v45 = vadd.f32 %v1713_v13, %v1686_v55 }
 0x2c7   : > { %v1715_v47 = vadd.f32 %v1714_v32, %v1673_v24  ;;  %1741 = vst [vmem:[#allocation2 + $0x38] sm:$0xff] %v1727_v61 }
 0x2c8   : > { %1742 = vst [vmem:[#allocation2 + $0x60] sm:$0xff] %v1728_v45 }
 0x2c9   : > { %v1729_v11 = vadd.f32 %v1715_v47, %v1687_v4 }
 0x2cb   : > { %1743 = vst [vmem:[#allocation2 + $0x28] sm:$0xff] %v1729_v11 }
 0x2cc PF: > { %p2233_p11 = scmp.ne.s32.totalorder %s2709_s18, 1 }
 0x2ce   : > { %1747 = sbr.rel (%p2233_p11) target bundleno = 764 (0x2fc), region = 72 }
 0x2d3   : > { %v1748_v50 = vld [vmem:[#allocation2 + $0x30] sm:$0xff]  ;;  %v1749_v59 = vld [vmem:[#allocation2] sm:$0xff]  ;;  %v1750_v17 = vld [vmem:[#allocation2 + $0x58] sm:$0xff]  ;;  %v2745_v24 = vmov 1966171168  }
 0x2d4   : > { %v1751_v33 = vld [vmem:[#allocation2 + $0x18] sm:$0xff]  ;;  %v1752_v40 = vld [vmem:[#allocation2 + $0x50] sm:$0xff]  ;;  %v1753_v25 = vld [vmem:[#allocation2 + $0x68] sm:$0xff]  ;;  %v1762_v0 = vrot.slane %v1748_v50, 4  ;;  %v1768_v53 = vrot.slane %v1749_v59, 4  ;;  %v1774_v3 = vrot.slane %v1750_v17, 4  ;;  %v3520_v32 = vunpack.c.l.s4 %v2745_v24 }
 0x2d5   : > { %v1754_v31 = vld [vmem:[#allocation2 + $0x8] sm:$0xff]  ;;  %v1780_v48 = vrot.slane %v1751_v33, 4  ;;  %v1786_v29 = vrot.slane %v1752_v40, 4  ;;  %v1792_v54 = vrot.slane %v1753_v25, 4  ;;  %v1756_v52 = vld [vmem:[#allocation2 + $0x40] sm:$0xff]  ;;  %v1758_v44 = vld [vmem:[#allocation2 + $0x10] sm:$0xff] }
 0x2d6   : > { %v1755_v6 = vld [vmem:[#allocation2 + $0x48] sm:$0xff]  ;;  %v1763_v10 = vadd.f32 %v1762_v0, %v1748_v50  ;;  %v1769_v62 = vadd.f32 %v1768_v53, %v1749_v59  ;;  %v1775_v60 = vadd.f32 %v1774_v3, %v1750_v17  ;;  %v1798_v56 = vrot.slane %v1754_v31, 4  ;;  %v1757_v9 = vld [vmem:[#allocation2 + $0x20] sm:$0xff]  ;;  %v1759_v16 = vld [vmem:[#allocation2 + $0x38] sm:$0xff] }
 0x2d7   : > { %v1781_v1 = vadd.f32 %v1780_v48, %v1751_v33  ;;  %v1787_v12 = vadd.f32 %v1786_v29, %v1752_v40  ;;  %v1793_v8 = vadd.f32 %v1792_v54, %v1753_v25  ;;  %v1804_v28 = vrot.slane %v1755_v6, 4  ;;  %v1760_v7 = vld [vmem:[#allocation2 + $0x60] sm:$0xff]  ;;  %v1761_v57 = vld [vmem:[#allocation2 + $0x28] sm:$0xff] }
 0x2d8   : > { %v1764_v49 = vrot.slane %v1763_v10, 2  ;;  %v1770_v42 = vrot.slane %v1769_v62, 2  ;;  %v1776_v18 = vrot.slane %v1775_v60, 2  ;;  %v1799_v43 = vadd.f32 %v1798_v56, %v1754_v31 }
 0x2d9   : > { %v1782_v30 = vrot.slane %v1781_v1, 2  ;;  %v1788_v26 = vrot.slane %v1787_v12, 2  ;;  %v1794_v27 = vrot.slane %v1793_v8, 2  ;;  %v1805_v38 = vadd.f32 %v1804_v28, %v1755_v6 }
 0x2da   : > { %v1765_v51 = vadd.f32 %v1764_v49, %v1763_v10  ;;  %v1771_v58 = vadd.f32 %v1770_v42, %v1769_v62  ;;  %v1777_v63 = vadd.f32 %v1776_v18, %v1775_v60  ;;  %v1800_v37 = vrot.slane %v1799_v43, 2 }
 0x2db   : > { %v1783_v22 = vadd.f32 %v1782_v30, %v1781_v1  ;;  %v1789_v35 = vadd.f32 %v1788_v26, %v1787_v12  ;;  %v1795_v39 = vadd.f32 %v1794_v27, %v1793_v8  ;;  %v1806_v34 = vrot.slane %v1805_v38, 2 }
 0x2dc   : > { %v1766_v14 = vrot.slane %v1765_v51, 1  ;;  %v1772_v41 = vrot.slane %v1771_v58, 1  ;;  %v1778_v5 = vrot.slane %v1777_v63, 1  ;;  %v1801_v20 = vadd.f32 %v1800_v37, %v1799_v43 }
 0x2dd   : > { %v1784_v46 = vrot.slane %v1783_v22, 1  ;;  %v1790_v15 = vrot.slane %v1789_v35, 1  ;;  %v1796_v2 = vrot.slane %v1795_v39, 1  ;;  %v1807_v19 = vadd.f32 %v1806_v34, %v1805_v38 }
 0x2de   : > { %v1767_v23 = vadd.f32 %v1766_v14, %v1765_v51  ;;  %v1773_v55 = vadd.f32 %v1772_v41, %v1771_v58  ;;  %v1802_v36 = vrot.slane %v1801_v20, 1  ;;  %v1779_v61 = vadd.f32 %v1778_v5, %v1777_v63 }
 0x2df   : > { %v1785_v13 = vadd.f32 %v1784_v46, %v1783_v22  ;;  %v1791_v4 = vadd.f32 %v1790_v15, %v1789_v35  ;;  %v1808_v47 = vrot.slane %v1807_v19, 1  ;;  %v1797_v45 = vadd.f32 %v1796_v2, %v1795_v39 }
 0x2e0   : > { %v1810_v11 = vrot.slane %v1756_v52, 4  ;;  %v1816_v50 = vrot.slane %v1757_v9, 4  ;;  %v1822_v59 = vrot.slane %v1758_v44, 4  ;;  %v1803_v17 = vadd.f32 %v1802_v36, %v1801_v20 }
 0x2e1   : > { %v1828_v33 = vrot.slane %v1759_v16, 4  ;;  %v1834_v40 = vrot.slane %v1760_v7, 4  ;;  %v1840_v25 = vrot.slane %v1761_v57, 4  ;;  %v1809_v0 = vadd.f32 %v1808_v47, %v1807_v19 }
 0x2e2   : > { %v1811_v53 = vadd.f32 %v1810_v11, %v1756_v52  ;;  %v1817_v3 = vadd.f32 %v1816_v50, %v1757_v9  ;;  %v1823_v31 = vadd.f32 %v1822_v59, %v1758_v44  ;;  %v1846_v54 = vmul.f32 0.015625, %v1767_v23 }
 0x2e3   : > { %v1829_v6 = vadd.f32 %v1828_v33, %v1759_v16  ;;  %v1835_v48 = vadd.f32 %v1834_v40, %v1760_v7  ;;  %v1841_v29 = vadd.f32 %v1840_v25, %v1761_v57  ;;  %v1847_v56 = vmul.f32 0.015625, %v1773_v55 }
 0x2e4   : > { %v1812_v10 = vrot.slane %v1811_v53, 2  ;;  %v1818_v62 = vrot.slane %v1817_v3, 2  ;;  %v1824_v60 = vrot.slane %v1823_v31, 2  ;;  %v1848_v28 = vmul.f32 0.015625, %v1779_v61 }
 0x2e5   : > { %v1830_v1 = vrot.slane %v1829_v6, 2  ;;  %v1836_v12 = vrot.slane %v1835_v48, 2  ;;  %v1842_v8 = vrot.slane %v1841_v29, 2  ;;  %v1849_v43 = vmul.f32 0.015625, %v1785_v13 }
 0x2e6   : > { %v1813_v49 = vadd.f32 %v1812_v10, %v1811_v53  ;;  %v1819_v42 = vadd.f32 %v1818_v62, %v1817_v3  ;;  %v1825_v18 = vadd.f32 %v1824_v60, %v1823_v31  ;;  %v1850_v38 = vmul.f32 0.015625, %v1791_v4 }
 0x2e7   : > { %v1831_v30 = vadd.f32 %v1830_v1, %v1829_v6  ;;  %v1837_v26 = vadd.f32 %v1836_v12, %v1835_v48  ;;  %v1843_v27 = vadd.f32 %v1842_v8, %v1841_v29  ;;  %v1851_v37 = vmul.f32 0.015625, %v1797_v45 }
 0x2e8   : > { %v1814_v51 = vrot.slane %v1813_v49, 1  ;;  %v1820_v58 = vrot.slane %v1819_v42, 1  ;;  %v1826_v63 = vrot.slane %v1825_v18, 1  ;;  %v1852_v34 = vmul.f32 0.015625, %v1803_v17 }
 0x2e9   : > { %v1832_v22 = vrot.slane %v1831_v30, 1  ;;  %v1838_v35 = vrot.slane %v1837_v26, 1  ;;  %v1844_v39 = vrot.slane %v1843_v27, 1  ;;  %v1853_v20 = vmul.f32 0.015625, %v1809_v0 }
 0x2ea   : > { %v1815_v14 = vadd.f32 %v1814_v51, %v1813_v49  ;;  %v1821_v41 = vadd.f32 %v1820_v58, %v1819_v42  ;;  %v1827_v5 = vadd.f32 %v1826_v63, %v1825_v18  ;;  %v1874_v57 = vcombine.low %v1846_v54, %v1847_v56 }
 0x2eb   : > { %v1833_v52 = vadd.f32 %v1832_v22, %v1831_v30  ;;  %v1839_v9 = vadd.f32 %v1838_v35, %v1837_v26  ;;  %v1845_v44 = vadd.f32 %v1844_v39, %v1843_v27  ;;  %v1875_v23 = vcombine.low %v1848_v28, %v1849_v43 }
 0x2ec   : > { %v1854_v46 = vmul.f32 0.015625, %v1815_v14  ;;  %v1855_v15 = vmul.f32 0.015625, %v1821_v41  ;;  %v1856_v2 = vmul.f32 0.015625, %v1827_v5  ;;  %v1876_v55 = vcombine.low %v1850_v38, %v1851_v37 }
 0x2ed   : > { %v1857_v19 = vmul.f32 0.015625, %v1833_v52  ;;  %v1858_v16 = vmul.f32 0.015625, %v1839_v9  ;;  %v1859_v7 = vmul.f32 0.015625, %v1845_v44  ;;  %v1877_v36 = vcombine.low %v1852_v34, %v1853_v20 }
 0x2ee   : > { %v1880_v24 = vunpack.c.0.s8 %v3520_v32  ;;  %v1923_v61 = vcombine.low %v1854_v46, %v1855_v15  ;;  %v3636_v29 = vlaneseq }
 0x2ef   : > { %v1924_v13 = vcombine.low %v1856_v2, %v1857_v19  ;;  %v1925_v4 = vcombine.low %v1858_v16, %v1859_v7 }
 0x2f0   : > { %v1883_v47 = vsub.s32 %v1880_v24, %v2959_v21  ;;  %vm1968_vm5 = vcmp.lt.s32.totalorder %v3636_v29, 768 }
 0x2f2   : > { %v1884_v45 = vrot.slane %v1874_v57, %v1883_v47  ;;  %v1891_v11 = vrot.slane %v1875_v23, %v1883_v47  ;;  %v1898_v50 = vrot.slane %v1876_v55, %v1883_v47  ;;  %v1905_v59 = vrot.slane %v1877_v36, %v1883_v47 }
 0x2f3   : > { %v1932_v17 = vrot.slane %v1923_v61, %v1883_v47  ;;  %v1939_v33 = vrot.slane %v1924_v13, %v1883_v47  ;;  %v1946_v40 = vrot.slane %v1925_v4, %v1883_v47 }
 0x2f4   : > { %v1906_v25 = vcombine.low %v1884_v45, %v1891_v11  ;;  %v1907_v0 = vcombine.low %v1898_v50, %v1905_v59 }
 0x2f5   : > { %v1947_v53 = vcombine.low %v1932_v17, %v1939_v33  ;;  %v1961_v3 = vrot.slane %v1946_v40, %v1883_v47 }
 0x2f6   : > { %v1914_v31 = vrot.slane %v1906_v25, %v1883_v47  ;;  %v1921_v32 = vrot.slane %v1907_v0, %v1883_v47 }
 0x2f7   : > { %v1954_v6 = vrot.slane %v1947_v53, %v1883_v47 }
 0x2f8   : > { %v1922_v48 = vcombine.low %v1914_v31, %v1921_v32 }
 0x2f9   : > { %v1962_v21 = vcombine.low %v1954_v6, %v1961_v3 }
 0x2fa   : > { %1965 = vst [vmem:[%s2906_s26] sm:$0xff] %v1922_v48 }
 0x2fb   : > { %1970 = vst.msk [vmem:[%s2906_s26 + $0x8] sm:$0x3f] %vm1968_vm5, %v1962_v21 }
 0x2fc PF: > { %s18_s24 = sadd.s32 1, %s2733_s24   ;;  %s3637_s18 = smov %s2721_s21 }
 0x2fd   : > { %p15_p1 = scmp.ge.s32.totalorder %s18_s24, 10   ;;  %s3638_s19 = smov %s2725_s22 }
 0x2fe   : > { %s3639_s20 = smov %s2729_s23  ;;  %s3640_s21 = smov %s3644_s10 }
 0x2ff   : > { %s3641_s22 = smov %s2855_s27  ;;  %s3642_s23 = smov %s3650_s12 }
 0x300   :  { %17 = sbr.rel (!%p15_p1) target bundleno = 6 (0x6), region = 103 }
 0x305   :  { %1998 = vsyncpa [#allocation4], 1 }
 0x306   :  { %2000 = vsyncpa [#allocation4 + $0x1], 1 }
 0x307   :  { %2001 = vsyncpa [#allocation6], 1 }
 0x308   :  { %2002 = vsyncpa [#allocation9], 1 }

// kernel: _forward.3
= control target key start
LH: loop header
LB: loop body
LE: loop exit
PB: predicated region body
PF: predicated region fallthrough
CT: control target
= control target key end

     0   :  { %s6891_s0 = inlined_call_operand.vmem [shape: f32[2,1792], index: 0, kind: input, shape index: {}]   ;;  %s6892_s1 = inlined_call_operand.vmem [shape: bf16[2,128], index: 1, kind: input, shape index: {}]   ;;  %s6893_s2 = inlined_call_operand.hbm [shape: bf16[128,1792], index: 2, kind: input, shape index: {}]   ;;  %s6894_s3 = inlined_call_operand.hbm [shape: f32[1,1792], index: 3, kind: input, shape index: {}]   ;;  %s6895_s4 = inlined_call_operand.hbm [shape: bf16[1792,1024], index: 4, kind: input, shape index: {}]   ;;  %s6896_s5 = inlined_call_operand.hbm [shape: f32[1,1024], index: 5, kind: input, shape index: {}]   ;;  %s6897_s6 = inlined_call_operand.hbm [shape: bf16[1024,512], index: 6, kind: input, shape index: {}]   ;;  %s6898_s7 = inlined_call_operand.hbm [shape: f32[1,512], index: 7, kind: input, shape index: {}]   ;;  %s6899_s8 = inlined_call_operand.hbm [shape: bf16[512,256], index: 8, kind: input, shape index: {}]   ;;  %s6900_s9 = inlined_call_operand.hbm [shape: f32[1,256], index: 9, kind: input, shape index: {}]   ;;  %s6901_s10 = inlined_call_operand.hbm [shape: bf16[256,128], index: 10, kind: input, shape index: {}]   ;;  %s6902_s11 = inlined_call_operand.hbm [shape: f32[1,128], index: 11, kind: input, shape index: {}]   ;;  %s6903_s12 = inlined_call_operand.hbm [shape: f32[2,128], index: 12, kind: output, shape index: {}]  }
   0x1   :  { %6915 = sst [smem:[#allocation31_spill]] %s6892_s1 }
   0x2   :  { %6916 = sst [smem:[#allocation32_spill]] %s6896_s5 }
   0x3   :  { %6917 = sst [smem:[#allocation33_spill]] %s6898_s7 }
   0x4   :  { %6918 = sst [smem:[#allocation34_spill]] %s6900_s9 }
   0x5   :  { %6919 = sst [smem:[#allocation35_spill]] %s6903_s12 }
   0x6   :  { %17 = vsyncpa [#allocation4], 0 }
   0x7   :  { %19 = vsyncpa [#allocation4 + $0x1], 0 }
   0x8   :  { %20 = vsyncpa [#allocation7], 0 }
   0x9   :  { %22 = vsyncpa [#allocation7 + $0x1], 0 }
   0xa   :  { %23 = vsyncpa [#allocation10], 0 }
   0xb   :  { %24 = vsyncpa [#allocation13], 0 }
   0xc   :  { %25 = vsyncpa [#allocation16], 0 }
   0xd   :  { %26 = vsyncpa [#allocation19], 0 }
   0xe   :  { %27 = vsyncpa [#allocation5], 0  ;;  %s6304_s21 = smov 0   ;;  %s6306_s22 = smov 0  }
   0xf   :  { %s6308_s23 = smov 0   ;;  %s6310_s24 = smov 0  }
  0x10 LB: > { %6920 = sst [smem:[#allocation28_spill]] %s6210_s23  ;;  %s6216_s25 = smov [#allocation9]   ;;  %s6214_s24 = sphi %s6310_s24, %s6951_s24   ;;  %s6210_s23 = sphi %s6308_s23, %s6953_s23   ;;  %s6206_s22 = sphi %s6306_s22, %s6955_s22   ;;  %s6202_s21 = sphi %s6304_s21, %s6954_s21  }
  0x11   : > { %s347_s26 = sshll.u32 %s6216_s25, 4  ;;  %s6325_s27 = sadd.s32 4294967295, %s6214_s24   ;;  %s348_s26 = int_to_ptr.vmem [resolvable:$true] %s347_s26 }
  0x12   : > { %p4654_p0 = scmp.ge.s32.totalorder %s6214_s24, 1  ;;  %p6904_p1 = scmp.eq.s32.totalorder %s6325_s27, 0 }
  0x13   : > { %p331_p2 = scmp.lt.s32.totalorder %s6214_s24, 8  ;;  %s6217_s29 = smov [#allocation12]  }
  0x14   : > { %s371_s30 = sshll.u32 %s6217_s29, 4  ;;  %s6218_s13 = smov [#allocation15]   ;;  %s372_s30 = int_to_ptr.vmem [resolvable:$true] %s371_s30 }
  0x15   : > { %p6331_p4 = pnand %p4654_p0, %p331_p2  ;;  %s395_s14 = sshll.u32 %s6218_s13, 4  ;;  %s6343_s14 = int_to_ptr.vmem [resolvable:$true] %s395_s14 }
  0x16   : > { %s5877_s17 = scalar_lea.vmem %s348_s26, 128  ;;  %p5885_p11 = scmp.lt.s32.totalorder %s348_s26, %s348_s26 }
  0x17   : > { %s6921_s28 = scalar_select %p6331_p4, 1, 0 }
  0x18   : > { %p5237_p5 = pneg %p6331_p4  ;;  %p5878_p8 = scmp.ne.s32.totalorder %s348_s26, %s5877_s17 }
  0x19   : > { %p5886_p12 = scmp.lt.s32.totalorder %s5877_s17, %s5877_s17 }
  0x1a   : > { %p6339_p6 = pnand %p5237_p5, %p6904_p1 }
  0x1b   : > { %p5887_p13 = por %p5886_p12, %p5885_p11 }
  0x1c   : > { %s6922_s15 = scalar_select %p6339_p6, 1, 0 }
  0x1d   : > { %p6347_p7 = pneg %p6339_p6 }
  0x1f   : > { %s6923_s16 = scalar_select %p6347_p7, 1, 0 }
  0x20   : > { %p5880_p9 = pnand %p5878_p8, %p6347_p7 }
  0x22   : > { %p5881_p10 = pneg %p5880_p9 }
  0x24   : > { %p5888_p0 = pnand %p5887_p13, %p5881_p10 }
  0x26   : > { %5891 = shalt.err (!%p5888_p0)
}
  0x27   : > { %s6924_s5 = sld [smem:[#allocation32_spill]]  ;;  %s5903_s20 = scalar_lea.vmem %s372_s30, 64 }
  0x28   : > { %p5904_p2 = scmp.ne.s32.totalorder %s372_s30, %s5903_s20  ;;  %p5911_p1 = scmp.lt.s32.totalorder %s372_s30, %s372_s30 }
  0x29   : > { %p5912_p8 = scmp.lt.s32.totalorder %s5903_s20, %s5903_s20 }
  0x2a   : > { %p5906_p5 = pnand %p5904_p2, %p6347_p7 }
  0x2b   : > { %p5913_p9 = por %p5912_p8, %p5911_p1 }
  0x2c   : > { %p5907_p3 = pneg %p5906_p5 }
  0x2d   : > { %5240 = dma.hbm_to_vmem [thread:$0]  (!%p6339_p6), %s6924_s5, 128, %s348_s26, [#allocation10]  }
  0x2e   : > { %p5914_p4 = pnand %p5913_p9, %p5907_p3 }
  0x30   : > { %5917 = shalt.err (!%p5914_p4)
}
  0x31   : > { %s6925_s7 = sld [smem:[#allocation33_spill]]  ;;  %s5929_s26 = scalar_lea.vmem %s6343_s14, 32 }
  0x32   : > { %p5930_p10 = scmp.ne.s32.totalorder %s6343_s14, %s5929_s26  ;;  %p5937_p13 = scmp.lt.s32.totalorder %s6343_s14, %s6343_s14 }
  0x33   : > { %p5938_p1 = scmp.lt.s32.totalorder %s5929_s26, %s5929_s26 }
  0x34   : > { %p5932_p11 = pnand %p5930_p10, %p6347_p7 }
  0x35   : > { %p5939_p3 = por %p5938_p1, %p5937_p13 }
  0x36   : > { %p5933_p12 = pneg %p5932_p11 }
  0x37   : > { %5246 = dma.hbm_to_vmem [thread:$0]  (!%p6339_p6), %s6925_s7, 64, %s372_s30, [#allocation13]  }
  0x38   : > { %p5940_p4 = pnand %p5939_p3, %p5933_p12 }
  0x3a   : > { %5943 = shalt.err (!%p5940_p4)
}
  0x3b   : > { %s6926_s9 = sld [smem:[#allocation34_spill]]  ;;  %s6378_s30 = sadd.s32 1, %s6214_s24  }
  0x3c   : > { %6927 = sst [smem:[#allocation29_spill]] %s6378_s30  ;;  %s84_s18 = ssub.s32 %s6214_s24, %s6378_s30 }
  0x3d   : > { %s87_s19 = sadd.s32 1, %s6210_s23  ;;  %p85_p0 = scmp.eq.s32.totalorder %s84_s18, 0 }
  0x3e   : > { %p94_p2 = scmp.ne.s32.totalorder %s6210_s23, %s6206_s22  ;;  %p95_p5 = scmp.eq.s32.totalorder %s6214_s24, 0 }
  0x3f   : > { %p100_p8 = scmp.ne.s32.totalorder %s6206_s22, %s6202_s21  ;;  %p6929_p10 = scmp.eq.s32.totalorder %s6325_s27, 0 }
  0x40   : > { %s6389_s20 = scalar_select %p85_p0, %s6210_s23, %s87_s19  }
  0x41   : > { %5252 = dma.hbm_to_vmem [thread:$0]  (!%p6339_p6), %s6926_s9, 32, %s6343_s14, [#allocation16]  }
  0x42   : > { %6928 = sst [smem:[#allocation30_spill]] %s6389_s20  ;;  %p96_p9 = por %p95_p5, %p94_p2 }
  0x43   : > { %p6393_p11 = por %p6929_p10, %p100_p8  ;;  %p5276_p12 = scmp.lt.s32.totalorder %s6214_s24, 7 }
  0x44   : > { %s6399_s14 = sand.u32 1, %s6210_s23   ;;  %s460_s26 = sand.u32 1, %s6214_s24  }
  0x45   : > { %s6930_s25 = scalar_select %p6393_p11, 1, 0 }
  0x46   : > { %p6403_p13 = pnand %p5276_p12, %p96_p9  ;;  %s4666_s21 = sshll.u32 %s6399_s14, 1 }
  0x47   : > { %s5174_s17 = sshll.u32 %s6214_s24, 5  ;;  %s464_s7 = scalar_lea.vmem [#allocation6], %s4666_s21 }
  0x48   : > { %s6412_s5 = scalar_lea.hbm %s6894_s3, %s5174_s17  ;;  %s472_s9 = sshll.u32 %s464_s7, 4  ;;  %s473_s9 = int_to_ptr.vmem [resolvable:$true] %s472_s9 }
  0x49   : > { %s6415_s20 = scalar_lea.sflag [#allocation7], %s460_s26  ;;  %s5944_s23 = scalar_lea.hbm %s6412_s5, 32 }
  0x4a   : > { %p5945_p1 = scmp.ne.s32.totalorder %s6412_s5, %s5944_s23  ;;  %p6421_p3 = pneg %p6403_p13 }
  0x4b   : > { %s5949_s21 = scalar_lea.hbm %s6894_s3, 224  ;;  %p5950_p2 = scmp.lt.s32.totalorder %s6412_s5, %s6894_s3 }
  0x4c   : > { %p5947_p4 = pnand %p6421_p3, %p5945_p1  ;;  %p5951_p5 = scmp.lt.s32.totalorder %s5949_s21, %s5944_s23 }
  0x4e   : > { %p5948_p0 = pneg %p5947_p4  ;;  %p5952_p8 = por %p5951_p5, %p5950_p2 }
  0x50   : > { %p5953_p9 = pnand %p5952_p8, %p5948_p0 }
  0x52   : > { %5956 = shalt.err (!%p5953_p9)
}
  0x53   : > { %s5957_s26 = scalar_lea.vmem %s473_s9, 32  ;;  %s6219_s29 = smov [#allocation6]  }
  0x54   : > { %p5958_p10 = scmp.ne.s32.totalorder %s473_s9, %s5957_s26  ;;  %s5962_s12 = sshll.u32 %s6219_s29, 4  ;;  %s5963_s12 = int_to_ptr.vmem [resolvable:$false] %s5962_s12 }
  0x55   : > { %s5964_s1 = scalar_lea.vmem %s5963_s12, 64  ;;  %p5965_p1 = scmp.lt.s32.totalorder %s473_s9, %s5963_s12 }
  0x56   : > { %p5960_p12 = pnand %p5958_p10, %p6421_p3  ;;  %p5966_p4 = scmp.lt.s32.totalorder %s5964_s1, %s5957_s26 }
  0x58   : > { %p5961_p11 = pneg %p5960_p12  ;;  %p5967_p6 = por %p5966_p4, %p5965_p1 }
  0x5a   : > { %p5968_p7 = pnand %p5967_p6, %p5961_p11 }
  0x5c   : > { %5971 = shalt.err (!%p5968_p7)
}
  0x5d   : > { %5265 = dma.hbm_to_vmem [thread:$0]  (!%p6403_p13), %s6412_s5, 32, %s473_s9, %s6415_s20  }
  0x5e   : > { %s6220_s23 = smov [#allocation11]   ;;  %p6933_p2 = scmp.ne.s32.totalorder %s6923_s16, 0 }
  0x5f   : > { %s357_s17 = sshll.u32 %s6220_s23, 4  ;;  %s358_s17 = int_to_ptr.vmem [resolvable:$true] %s357_s17 }
  0x60   : > { %s5983_s18 = scalar_lea.vmem %s358_s17, 32768  ;;  %p5991_p9 = scmp.lt.s32.totalorder %s358_s17, %s358_s17 }
  0x61   : > { %p5984_p0 = scmp.ne.s32.totalorder %s358_s17, %s5983_s18  ;;  %p5992_p10 = scmp.lt.s32.totalorder %s5983_s18, %s5983_s18 }
  0x63   : > { %p5986_p5 = pnand %p5984_p0, %p6933_p2  ;;  %p5993_p12 = por %p5992_p10, %p5991_p9 }
  0x65   : > { %p5987_p8 = pneg %p5986_p5 }
  0x67   : > { %p5994_p1 = pnand %p5993_p12, %p5987_p8 }
  0x69   : > { %5997 = shalt.err (!%p5994_p1)
}
  0x6a   : > { %s6221_s1 = smov 256   ;;  %s6222_s12 = smov 16  }
  0x6b   : > { %p6934_p6 = scmp.ne.s32.totalorder %s6922_s15, 0  ;;  %s6223_s9 = smov [#allocation14]  }
  0x6c   : > { %s381_s21 = sshll.u32 %s6223_s9, 4  ;;  %s382_s21 = int_to_ptr.vmem [resolvable:$true] %s381_s21 }
  0x6d   : > { %5243 = dma.hbm_to_vmem [thread:$0]  (!%p6934_p6), %s6897_s6, 32768, %s358_s17, [#allocation10], %s6221_s1, %s6221_s1, %s6222_s12  }
  0x6e   : > { %s6009_s7 = scalar_lea.vmem %s382_s21, 8192  ;;  %p6017_p0 = scmp.lt.s32.totalorder %s382_s21, %s382_s21 }
  0x6f   : > { %p6010_p7 = scmp.ne.s32.totalorder %s382_s21, %s6009_s7  ;;  %p6018_p5 = scmp.lt.s32.totalorder %s6009_s7, %s6009_s7 }
  0x71   : > { %p6012_p11 = pnand %p6010_p7, %p6933_p2  ;;  %p6019_p8 = por %p6018_p5, %p6017_p0 }
  0x73   : > { %p6013_p4 = pneg %p6012_p11 }
  0x75   : > { %p6020_p9 = pnand %p6019_p8, %p6013_p4 }
  0x77   : > { %6023 = shalt.err (!%p6020_p9)
}
  0x78   : > { %s6914_s19 = smov 128   ;;  %s6225_s26 = smov 8  }
  0x79   : > { %5249 = dma.hbm_to_vmem [thread:$0]  (!%p6934_p6), %s6899_s8, 8192, %s382_s21, [#allocation13], %s6914_s19, %s6914_s19, %s6225_s26  }
  0x7a   : > { %s6226_s18 = smov [#allocation17]  }
  0x7b   : > { %s405_s1 = sshll.u32 %s6226_s18, 4  ;;  %s406_s1 = int_to_ptr.vmem [resolvable:$true] %s405_s1 }
  0x7c   : > { %s6035_s12 = scalar_lea.vmem %s406_s1, 2048  ;;  %p6043_p7 = scmp.lt.s32.totalorder %s406_s1, %s406_s1 }
  0x7d   : > { %p6036_p10 = scmp.ne.s32.totalorder %s406_s1, %s6035_s12  ;;  %p6044_p11 = scmp.lt.s32.totalorder %s6035_s12, %s6035_s12 }
  0x7f   : > { %p6038_p12 = pnand %p6036_p10, %p6933_p2  ;;  %p6045_p4 = por %p6044_p11, %p6043_p7 }
  0x81   : > { %p6039_p1 = pneg %p6038_p12 }
  0x83   : > { %p6046_p0 = pnand %p6045_p4, %p6039_p1 }
  0x85   : > { %6049 = shalt.err (!%p6046_p0)
}
  0x86   : > { %s6227_s29 = smov 64   ;;  %s6228_s5 = smov 4  }
  0x87   : > { %5255 = dma.hbm_to_vmem [thread:$0]  (!%p6934_p6), %s6901_s10, 2048, %s406_s1, [#allocation16], %s6227_s29, %s6227_s29, %s6228_s5  }
  0x88   : > { %s6229_s7 = smov [#allocation18]  }
  0x89   : > { %s419_s23 = sshll.u32 %s6229_s7, 4  ;;  %s420_s23 = int_to_ptr.vmem [resolvable:$true] %s419_s23 }
  0x8a   : > { %s6061_s17 = scalar_lea.vmem %s420_s23, 16  ;;  %s6068_s18 = scalar_lea.vmem %s420_s23, 32 }
  0x8b   : > { %p6062_p5 = scmp.ne.s32.totalorder %s420_s23, %s6061_s17  ;;  %p6069_p10 = scmp.lt.s32.totalorder %s420_s23, %s420_s23 }
  0x8c   : > { %p6070_p12 = scmp.lt.s32.totalorder %s6068_s18, %s6061_s17 }
  0x8d   : > { %p6064_p8 = pnand %p6062_p5, %p6933_p2 }
  0x8e   : > { %p6071_p1 = por %p6070_p12, %p6069_p10 }
  0x8f   : > { %p6065_p9 = pneg %p6064_p8 }
  0x91   : > { %p6072_p7 = pnand %p6071_p1, %p6065_p9 }
  0x93   : > { %6075 = shalt.err (!%p6072_p7)
}
  0x94   : > { %5258 = dma.hbm_to_vmem [thread:$0]  (!%p6934_p6), %s6902_s11, 16, %s420_s23, [#allocation19]  }
  0x95   : > { %s5173_s1 = sshll.u32 %s6214_s24, 7  ;;  %s6935_s16 = sshll.u32 %s6399_s14, 7 }
  0x96   : > { %s443_s29 = scalar_lea.vmem [#allocation3], %s6935_s16  ;;  %s6477_s7 = scalar_lea.hbm %s6893_s2, %s5173_s1 }
  0x97   : > { %s450_s5 = sshll.u32 %s443_s29, 4  ;;  %s440_s15 = scalar_lea.sflag [#allocation4], %s6399_s14  ;;  %s6479_s5 = int_to_ptr.vmem [resolvable:$true] %s450_s5 }
  0x98   : > { %s6076_s19 = scalar_lea.hbm %s6477_s7, 2048  ;;  %s6081_s18 = scalar_lea.hbm %s6893_s2, 14336 }
  0x99   : > { %p6077_p2 = scmp.ne.s32.totalorder %s6477_s7, %s6076_s19  ;;  %p6082_p4 = scmp.lt.s32.totalorder %s6477_s7, %s6893_s2 }
  0x9a   : > { %p6083_p0 = scmp.lt.s32.totalorder %s6081_s18, %s6076_s19 }
  0x9b   : > { %p6079_p11 = pnand %p6077_p2, %p6421_p3 }
  0x9c   : > { %p6084_p5 = por %p6083_p0, %p6082_p4 }
  0x9d   : > { %p6080_p6 = pneg %p6079_p11 }
  0x9f   : > { %p6085_p8 = pnand %p6084_p5, %p6080_p6 }
  0xa1   : > { %6088 = shalt.err (!%p6085_p8)
}
  0xa2   : > { %s6089_s1 = scalar_lea.vmem %s6479_s5, 2048  ;;  %s6230_s29 = smov [#allocation3]  }
  0xa3   : > { %p6090_p9 = scmp.ne.s32.totalorder %s6479_s5, %s6089_s1  ;;  %s6094_s9 = sshll.u32 %s6230_s29, 4  ;;  %s6095_s9 = int_to_ptr.vmem [resolvable:$false] %s6094_s9 }
  0xa4   : > { %s6096_s21 = scalar_lea.vmem %s6095_s9, 4096  ;;  %p6097_p1 = scmp.lt.s32.totalorder %s6479_s5, %s6095_s9 }
  0xa5   : > { %p6092_p10 = pnand %p6090_p9, %p6421_p3  ;;  %p6098_p7 = scmp.lt.s32.totalorder %s6096_s21, %s6089_s1 }
  0xa7   : > { %p6093_p12 = pneg %p6092_p10  ;;  %p6099_p2 = por %p6098_p7, %p6097_p1 }
  0xa9   : > { %p6100_p11 = pnand %p6099_p2, %p6093_p12 }
  0xab   : > { %6103 = shalt.err (!%p6100_p11)
}
  0xac   : > { %s6231_s19 = smov 896   ;;  %s6936_s23 = smov 128  }
  0xad   : > { %5262 = dma.hbm_to_vmem [thread:$0]  (!%p6403_p13), %s6477_s7, 2048, %s6479_s5, %s440_s15, %s6231_s19, %s6936_s23, %s6225_s26  }
  0xae   : > { %s5176_s17 = sshll.u32 %s6214_s24, 14  ;;  %s6937_s18 = sshll.u32 %s6399_s14, 10 }
  0xaf   : > { %s483_s12 = scalar_lea.vmem [#allocation8], %s6937_s18  ;;  %s6512_s9 = scalar_lea.hbm %s6895_s4, %s5176_s17 }
  0xb0   : > { %s491_s16 = sshll.u32 %s483_s12, 4  ;;  %s6104_s21 = scalar_lea.hbm %s6512_s9, 16384  ;;  %s6514_s16 = int_to_ptr.vmem [resolvable:$true] %s491_s16 }
  0xb1   : > { %p6105_p6 = scmp.ne.s32.totalorder %s6512_s9, %s6104_s21  ;;  %s6109_s14 = scalar_lea.hbm %s6895_s4, 114688 }
  0xb2   : > { %p6110_p5 = scmp.lt.s32.totalorder %s6512_s9, %s6895_s4  ;;  %p6111_p8 = scmp.lt.s32.totalorder %s6109_s14, %s6104_s21 }
  0xb3   : > { %p6107_p4 = pnand %p6105_p6, %p6421_p3 }
  0xb4   : > { %p6112_p9 = por %p6111_p8, %p6110_p5 }
  0xb5   : > { %p6108_p0 = pneg %p6107_p4 }
  0xb7   : > { %p6113_p10 = pnand %p6112_p9, %p6108_p0 }
  0xb9   : > { %6116 = shalt.err (!%p6113_p10)
}
  0xba   : > { %s6117_s15 = scalar_lea.vmem %s6514_s16, 16384  ;;  %s6232_s19 = smov [#allocation8]  }
  0xbb   : > { %p6118_p12 = scmp.ne.s32.totalorder %s6514_s16, %s6117_s15  ;;  %s6122_s23 = sshll.u32 %s6232_s19, 4  ;;  %s6123_s23 = int_to_ptr.vmem [resolvable:$false] %s6122_s23 }
  0xbc   : > { %s6124_s17 = scalar_lea.vmem %s6123_s23, 32768  ;;  %p6125_p2 = scmp.lt.s32.totalorder %s6514_s16, %s6123_s23 }
  0xbd   : > { %p6120_p1 = pnand %p6118_p12, %p6421_p3  ;;  %p6126_p11 = scmp.lt.s32.totalorder %s6124_s17, %s6117_s15 }
  0xbf   : > { %p6121_p7 = pneg %p6120_p1  ;;  %p6127_p6 = por %p6126_p11, %p6125_p2 }
  0xc1   : > { %p6128_p4 = pnand %p6127_p6, %p6121_p7 }
  0xc3   : > { %6131 = shalt.err (!%p6128_p4)
}
  0xc4   : > { %s6233_s18 = smov 512   ;;  %s6234_s12 = smov 32  }
  0xc5   : > { %5268 = dma.hbm_to_vmem [thread:$0]  (!%p6403_p13), %s6512_s9, 16384, %s6514_s16, %s6415_s20, %s6233_s18, %s6233_s18, %s6234_s12  }
  0xc6   : > { %p6938_p3 = scmp.ne.s32.totalorder %s6921_s28, 0 }
  0xc7   : > { %s505_s30 = sand.u32 (!%p6938_p3), 1, %s6206_s22   ;;  %p6939_p0 = scmp.ne.s32.totalorder (!%p6938_p3), %s6930_s25, 0 }
  0xc8   : > { %503 = sbr.rel (%p6938_p3) target bundleno = 1660 (0x67c), region = 68  ;;  %s4674_s1 = sshll.u32 (!%p6938_p3), %s505_s30, 7 }
  0xc9   : > { %s506_s29 = scalar_lea.sflag (!%p6938_p3), [#allocation4], %s505_s30  ;;  %s6540_s21 = scalar_lea.vmem (!%p6938_p3), [#allocation3], %s4674_s1 }
  0xcd   : > { %6173 = dma.done.wait (%p6939_p0), %s506_s29, 2048  }
  0xce   : > { %6175 = vsyncadd (%p6939_p0), %s506_s29, 4294965248  ;;  %s514_s26 = sand.u32 1, %s6325_s27   ;;  %s4675_s13 = sshll.u32 %s505_s30, 1 }
  0xcf   : > { %s515_s20 = scalar_lea.sflag [#allocation7], %s514_s26  ;;  %s6547_s16 = scalar_lea.vmem [#allocation6], %s4675_s13 }
  0xd0   : > { %6177 = dma.done.wait (%p6939_p0), %s515_s20, 16416  }
  0xd1   : > { %6179 = vsyncadd (%p6939_p0), %s515_s20, 4294950880  ;;  %s4676_s28 = sshll.u32 %s505_s30, 10  ;;  %p6940_p13 = scmp.eq.s32.totalorder %s6325_s27, 0 }
  0xd2   : > { %s6553_s9 = scalar_lea.vmem [#allocation8], %s4676_s28 }
  0xd3   : > { %6181 = dma.done.wait (%p6940_p13), [#allocation10], 32896   ;;  %p6941_p5 = pmov %p6940_p13 }
  0xd5   : > { %6183 = vsyncadd (%p6941_p5), [#allocation10], 4294934400  ;;  %p6942_p8 = pmov %p6941_p5 }
  0xd6   : > { %p6943_p9 = pmov %p6941_p5 }
  0xd7   : > { %6185 = dma.done.wait (%p6942_p8), [#allocation13], 8256  }
  0xd8   : > { %6187 = vsyncadd (%p6943_p9), [#allocation13], 4294959040  ;;  %p6944_p10 = pmov %p6941_p5 }
  0xd9   : > { %p6945_p12 = pmov %p6941_p5 }
  0xda   : > { %6189 = dma.done.wait (%p6944_p10), [#allocation16], 2080  }
  0xdb   : > { %6191 = vsyncadd (%p6945_p12), [#allocation16], 4294965216  ;;  %p6946_p1 = pmov %p6941_p5 }
  0xdd   : > { %6193 = dma.done.wait (%p6946_p1), [#allocation19], 16   ;;  %p6947_p7 = pmov %p6946_p1 }
  0xde   : > { %s4684_s25 = sshll.u32 %s6325_s27, 1  ;;  %p6948_p11 = scmp.ne.s32.totalorder %s6325_s27, 0 }
  0xdf   : > { %6195 = vsyncadd (%p6947_p7), [#allocation19], 4294967280  ;;  %p607_p2 = scmp.lt.s32.totalorder %s4684_s25, 13 }
  0xe0   : > { %619 = sbr.rel (%p6948_p11) target bundleno = 231 (0xe7), region = 112 }
  0xe1   : > { %s6957_s25 = smov (!%p607_p2, %s4684_s25), 13 }
  0xe2   : > { %s4685_s24 = sshll.u32 %s6957_s25, 1 }
  0xe3   : > { %s6575_s7 = scalar_lea.vmem %s6891_s0, %s4685_s24 }
  0xe5   : > { %v6235_v0 = vmov 0.0  }
  0xe6   : > { %620 = vst [vmem:[#allocation2] sm:$0xff] %v6235_v0  ;;  %621 = vst [vmem:[#allocation2 + $0x8] sm:$0xff] %v6235_v0 }
  0xe7 PF: > { %v5338_v1 = vld [vmem:[%s6540_s21 + $0x74] ss:$8 sps:$4 sm:$0xff]   ;;  %v5340_v2 = vld [vmem:[%s6540_s21 + $0x70] ss:$8 sps:$4 sm:$0xff]   ;;  %v6236_v3 = vmov 0   ;;  %v866_v10 = vld [vmem:[%s6553_s9 + $0x1c0] sm:$0xff] }
  0xe8   : > { %763 = vmatprep.mubr.bf16.mxu0 %v6236_v3  ;;  %731 = vmatprep.subr.bf16.mxu0 %v5338_v1  ;;  %v5341_v4 = vld [vmem:[%s6540_s21 + $0x64] ss:$8 sps:$4 sm:$0xff]   ;;  %v5343_v5 = vld [vmem:[%s6540_s21 + $0x60] ss:$8 sps:$4 sm:$0xff]   ;;  %v5344_v6 = vld [vmem:[%s6540_s21 + $0x54] ss:$8 sps:$4 sm:$0xff]  }
  0xe9   : > { %732 = vmatpush1.bf16.msra.mxu0 %v5340_v2  ;;  %v5346_v7 = vld [vmem:[%s6540_s21 + $0x50] ss:$8 sps:$4 sm:$0xff]   ;;  %v5347_v8 = vld [vmem:[%s6540_s21 + $0x44] ss:$8 sps:$4 sm:$0xff]   ;;  %v5349_v9 = vld [vmem:[%s6540_s21 + $0x40] ss:$8 sps:$4 sm:$0xff]  }
  0xea   : > { %733 = vmatprep.subr.bf16.mxu0 %v5341_v4  ;;  %v870_v11 = vld [vmem:[%s6553_s9 + $0x1e0] sm:$0xff]  ;;  %v5350_v12 = vld [vmem:[%s6540_s21 + $0x34] ss:$8 sps:$4 sm:$0xff]   ;;  %v5352_v20 = vld [vmem:[%s6540_s21 + $0x30] ss:$8 sps:$4 sm:$0xff]   ;;  %s6949_s23 = sld [smem:[#allocation31_spill]] }
  0xeb   : > { %v4760_v13 = vcombine.high %v866_v10, %v870_v11  ;;  %v4759_v14 = vcombine.low %v866_v10, %v870_v11  ;;  %v858_v15 = vld [vmem:[%s6553_s9 + $0x180] sm:$0xff]  ;;  %v5356_v28 = vld [vmem:[%s6540_s21 + $0x14] ss:$8 sps:$4 sm:$0xff]   ;;  %v5358_v30 = vld [vmem:[%s6540_s21 + $0x10] ss:$8 sps:$4 sm:$0xff]   ;;  %p4831_p6 = scmp.ne.s32.totalorder %s6325_s27, 6 }
  0xec   : > { %v862_v16 = vld [vmem:[%s6553_s9 + $0x1a0] sm:$0xff]  ;;  %v867_v32 = vld [vmem:[%s6553_s9 + $0x1c8] sm:$0xff] }
  0xed   : > { %734 = vmatpush1.bf16.msra.mxu0 %v5343_v5  ;;  %v4752_v17 = vcombine.high %v858_v15, %v862_v16  ;;  %v850_v18 = vld [vmem:[%s6553_s9 + $0x140] sm:$0xff]  ;;  %1578 = vmatprep.subr.bf16.mxu1 %v4760_v13  ;;  %v4751_v21 = vcombine.low %v858_v15, %v862_v16  ;;  %v871_v33 = vld [vmem:[%s6553_s9 + $0x1e8] sm:$0xff] }
  0xee   : > { %735 = vmatprep.subr.bf16.mxu0 %v5344_v6  ;;  %v854_v19 = vld [vmem:[%s6553_s9 + $0x160] sm:$0xff]  ;;  %1579 = vmatpush1.bf16.msra.mxu1 %v4759_v14  ;;  %v4762_v35 = vcombine.high %v867_v32, %v871_v33  ;;  %v859_v36 = vld [vmem:[%s6553_s9 + $0x188] sm:$0xff]  ;;  %v4761_v39 = vcombine.low %v867_v32, %v871_v33 }
  0xef   : > { %v5353_v22 = vld [vmem:[%s6540_s21 + $0x24] ss:$8 sps:$4 sm:$0xff]   ;;  %1580 = vmatprep.subr.bf16.mxu1 %v4752_v17  ;;  %v4744_v23 = vcombine.high %v850_v18, %v854_v19  ;;  %v5355_v26 = vld [vmem:[%s6540_s21 + $0x20] ss:$8 sps:$4 sm:$0xff]   ;;  %v4743_v27 = vcombine.low %v850_v18, %v854_v19 }
  0xf0   : > { %v842_v24 = vld [vmem:[%s6553_s9 + $0x100] sm:$0xff]  ;;  %v863_v37 = vld [vmem:[%s6553_s9 + $0x1a8] sm:$0xff] }
  0xf1   : > { %736 = vmatpush1.bf16.msra.mxu0 %v5346_v7  ;;  %v846_v25 = vld [vmem:[%s6553_s9 + $0x120] sm:$0xff]  ;;  %v622_v38 = vld [vmem:[%s6949_s23] sm:$0x1]  ;;  %v4754_v40 = vcombine.high %v859_v36, %v863_v37  ;;  %v4753_v43 = vcombine.low %v859_v36, %v863_v37 }
  0xf2   : > { %737 = vmatprep.subr.bf16.mxu0 %v5347_v8  ;;  %1581 = vmatpush1.bf16.msra.mxu1 %v4751_v21  ;;  %v4736_v29 = vcombine.high %v842_v24, %v846_v25  ;;  %v5359_v31 = vld [vmem:[%s6540_s21 + $0x4] ss:$8 sps:$4 sm:$0xff]   ;;  %v5361_v34 = vld [vmem:[%s6540_s21] ss:$8 sps:$4 sm:$0xff]   ;;  %v4735_v50 = vcombine.low %v842_v24, %v846_v25 }
  0xf3   : > { %1582 = vmatprep.subr.bf16.mxu1 %v4744_v23  ;;  %v851_v41 = vld [vmem:[%s6553_s9 + $0x148] sm:$0xff]  ;;  %v834_v51 = vld [vmem:[%s6553_s9 + $0xc0] sm:$0xff] }
  0xf4   : > { %v855_v42 = vld [vmem:[%s6553_s9 + $0x168] sm:$0xff]  ;;  %v838_v52 = vld [vmem:[%s6553_s9 + $0xe0] sm:$0xff] }
  0xf5   : > { %738 = vmatpush1.bf16.msra.mxu0 %v5349_v9  ;;  %v4746_v44 = vcombine.high %v851_v41, %v855_v42  ;;  %v843_v45 = vld [vmem:[%s6553_s9 + $0x108] sm:$0xff]  ;;  %v4745_v47 = vcombine.low %v851_v41, %v855_v42  ;;  %v4728_v54 = vcombine.high %v834_v51, %v838_v52  ;;  %v4727_v58 = vcombine.low %v834_v51, %v838_v52  ;;  %v826_v59 = vld [vmem:[%s6553_s9 + $0x80] sm:$0xff] }
  0xf6   : > { %739 = vmatprep.subr.bf16.mxu0 %v5350_v12  ;;  %1583 = vmatpush1.bf16.msra.mxu1 %v4743_v27  ;;  %v847_v46 = vld [vmem:[%s6553_s9 + $0x128] sm:$0xff]  ;;  %v830_v60 = vld [vmem:[%s6553_s9 + $0xa0] sm:$0xff] }
  0xf7   : > { %1584 = vmatprep.subr.bf16.mxu1 %v4736_v29  ;;  %v4738_v48 = vcombine.high %v843_v45, %v847_v46  ;;  %v4737_v49 = vcombine.low %v843_v45, %v847_v46  ;;  %v835_v53 = vld [vmem:[%s6553_s9 + $0xc8] sm:$0xff]  ;;  %v4720_v62 = vcombine.high %v826_v59, %v830_v60  ;;  %v4719_v2 = vcombine.low %v826_v59, %v830_v60  ;;  %v818_v3 = vld [vmem:[%s6553_s9 + $0x40] sm:$0xff] }
  0xf8   : > { %v839_v55 = vld [vmem:[%s6553_s9 + $0xe8] sm:$0xff]  ;;  %v822_v4 = vld [vmem:[%s6553_s9 + $0x60] sm:$0xff] }
  0xf9   : > { %740 = vmatpush1.bf16.msra.mxu0 %v5352_v20  ;;  %v4729_v56 = vcombine.low %v835_v53, %v839_v55  ;;  %v4730_v57 = vcombine.high %v835_v53, %v839_v55  ;;  %v827_v61 = vld [vmem:[%s6553_s9 + $0x88] sm:$0xff]  ;;  %v4712_v6 = vcombine.high %v818_v3, %v822_v4  ;;  %v4711_v10 = vcombine.low %v818_v3, %v822_v4  ;;  %v810_v11 = vld [vmem:[%s6553_s9] sm:$0xff] }
  0xfa   : > { %741 = vmatprep.subr.bf16.mxu0 %v5353_v22  ;;  %1585 = vmatpush1.bf16.msra.mxu1 %v4735_v50  ;;  %v831_v63 = vld [vmem:[%s6553_s9 + $0xa8] sm:$0xff]  ;;  %v814_v12 = vld [vmem:[%s6553_s9 + $0x20] sm:$0xff] }
  0xfb   : > { %1586 = vmatprep.subr.bf16.mxu1 %v4728_v54  ;;  %v4721_v0 = vcombine.low %v827_v61, %v831_v63  ;;  %v4722_v1 = vcombine.high %v827_v61, %v831_v63  ;;  %v819_v5 = vld [vmem:[%s6553_s9 + $0x48] sm:$0xff]  ;;  %v4704_v14 = vcombine.high %v810_v11, %v814_v12  ;;  %v4703_v18 = vcombine.low %v810_v11, %v814_v12  ;;  %v930_v19 = vld [vmem:[%s6553_s9 + $0x3c0] sm:$0xff] }
  0xfc   : > { %v823_v7 = vld [vmem:[%s6553_s9 + $0x68] sm:$0xff]  ;;  %v934_v20 = vld [vmem:[%s6553_s9 + $0x3e0] sm:$0xff] }
  0xfd   : > { %742 = vmatpush1.bf16.msra.mxu0 %v5355_v26  ;;  %v4713_v8 = vcombine.low %v819_v5, %v823_v7  ;;  %v4714_v9 = vcombine.high %v819_v5, %v823_v7  ;;  %v811_v13 = vld [vmem:[%s6553_s9 + $0x8] sm:$0xff]  ;;  %v4824_v22 = vcombine.high %v930_v19, %v934_v20  ;;  %v4823_v26 = vcombine.low %v930_v19, %v934_v20  ;;  %v922_v27 = vld [vmem:[%s6553_s9 + $0x380] sm:$0xff]  ;;  %v6663_v19 = vld [vmem:[%s6553_s9 + $0x1d0] sm:$0xff] }
  0xfe   : > { %743 = vmatprep.subr.bf16.mxu0 %v5356_v28  ;;  %1587 = vmatpush1.bf16.msra.mxu1 %v4727_v58  ;;  %v815_v15 = vld [vmem:[%s6553_s9 + $0x28] sm:$0xff]  ;;  %v926_v28 = vld [vmem:[%s6553_s9 + $0x3a0] sm:$0xff]  ;;  %v6666_v20 = vld [vmem:[%s6553_s9 + $0x1f0] sm:$0xff] }
  0xff   : > { %1588 = vmatprep.subr.bf16.mxu1 %v4720_v62  ;;  %v4705_v16 = vcombine.low %v811_v13, %v815_v15  ;;  %v4706_v17 = vcombine.high %v811_v13, %v815_v15  ;;  %v931_v21 = vld [vmem:[%s6553_s9 + $0x3c8] sm:$0xff]  ;;  %v918_v36 = vld [vmem:[%s6553_s9 + $0x360] sm:$0xff] }
 0x100   : > { %v935_v23 = vld [vmem:[%s6553_s9 + $0x3e8] sm:$0xff]  ;;  %v906_v41 = vld [vmem:[%s6553_s9 + $0x300] sm:$0xff] }
 0x101   : > { %744 = vmatpush1.bf16.msra.mxu0 %v5358_v30  ;;  %v4825_v24 = vcombine.low %v931_v21, %v935_v23  ;;  %v4826_v25 = vcombine.high %v931_v21, %v935_v23  ;;  %v923_v29 = vld [vmem:[%s6553_s9 + $0x388] sm:$0xff]  ;;  %v4816_v30 = vcombine.high %v922_v27, %v926_v28  ;;  %v910_v42 = vld [vmem:[%s6553_s9 + $0x320] sm:$0xff]  ;;  %v6669_v21 = vld [vmem:[%s6553_s9 + $0x1d8] sm:$0xff] }
 0x102   : > { %745 = vmatprep.subr.bf16.mxu0 %v5359_v31  ;;  %1589 = vmatpush1.bf16.msra.mxu1 %v4719_v2  ;;  %v927_v31 = vld [vmem:[%s6553_s9 + $0x3a8] sm:$0xff]  ;;  %v4800_v45 = vcombine.high %v906_v41, %v910_v42  ;;  %v902_v50 = vld [vmem:[%s6553_s9 + $0x2e0] sm:$0xff]  ;;  %v4799_v53 = vcombine.low %v906_v41, %v910_v42  ;;  %v873_v23 = vld [vmem:[%s6553_s9 + $0x1f8] sm:$0xff] }
 0x103   : > { %1590 = vmatprep.subr.bf16.mxu1 %v4712_v6  ;;  %v4817_v32 = vcombine.low %v923_v29, %v927_v31  ;;  %v4818_v33 = vcombine.high %v923_v29, %v927_v31  ;;  %v915_v37 = vld [vmem:[%s6553_s9 + $0x348] sm:$0xff]  ;;  %v894_v58 = vld [vmem:[%s6553_s9 + $0x2a0] sm:$0xff] }
 0x104   : > { %v907_v46 = vld [vmem:[%s6553_s9 + $0x308] sm:$0xff]  ;;  %v886_v2 = vld [vmem:[%s6553_s9 + $0x260] sm:$0xff] }
 0x105   : > { %746 = vmatpush1.bf16.msra.mxu0 %v5361_v34  ;;  %v4815_v34 = vcombine.low %v922_v27, %v926_v28  ;;  %v899_v51 = vld [vmem:[%s6553_s9 + $0x2c8] sm:$0xff]  ;;  %v641_v27 = vlaneseq }
 0x106   : > { %1619 = vmatprep.subr.bf16.mxu0 %v4762_v35  ;;  %1591 = vmatpush1.bf16.msra.mxu1 %v4711_v10  ;;  %v914_v35 = vld [vmem:[%s6553_s9 + $0x340] sm:$0xff]  ;;  %v903_v52 = vld [vmem:[%s6553_s9 + $0x2e8] sm:$0xff] }
 0x107   : > { %1592 = vmatprep.subr.bf16.mxu1 %v4704_v14  ;;  %v891_v59 = vld [vmem:[%s6553_s9 + $0x288] sm:$0xff]  ;;  %v4793_v62 = vcombine.low %v899_v51, %v903_v52  ;;  %v878_v10 = vld [vmem:[%s6553_s9 + $0x220] sm:$0xff]  ;;  %v6678_v28 = vshrl.u32 %v641_v27, 7 }
 0x108   : > { %764 = vmatmul.mubr.bf16.vlgmr.msra.gmra.mxu0 %v622_v38  ;;  %v4808_v38 = vcombine.high %v914_v35, %v918_v36  ;;  %v895_v60 = vld [vmem:[%s6553_s9 + $0x2a8] sm:$0xff] }
 0x109   : > { %1620 = vmatpush1.bf16.msra.mxu0 %v4761_v39  ;;  %v919_v39 = vld [vmem:[%s6553_s9 + $0x368] sm:$0xff]  ;;  %v4785_v6 = vcombine.low %v891_v59, %v895_v60  ;;  %v6681_v29 = vsub.s32 0, %v6678_v28  ;;  %v6685_v31 = vsub.s32 1, %v6678_v28 }
 0x10a   : > { %1621 = vmatprep.subr.bf16.mxu0 %v4754_v40  ;;  %1593 = vmatpush1.bf16.msra.mxu1 %v4703_v18  ;;  %v4807_v40 = vcombine.low %v914_v35, %v918_v36  ;;  %v883_v3 = vld [vmem:[%s6553_s9 + $0x248] sm:$0xff] }
 0x10b   : > { %1594 = vmatprep.subr.bf16.mxu1 %v4824_v22  ;;  %v887_v4 = vld [vmem:[%s6553_s9 + $0x268] sm:$0xff]  ;;  %v4764_v22 = vcombine.high %v6663_v19, %v6666_v20 }
 0x10c   : > { %v875_v11 = vld [vmem:[%s6553_s9 + $0x208] sm:$0xff]  ;;  %v4777_v14 = vcombine.low %v883_v3, %v887_v4 }
 0x10d   : > { %1622 = vmatpush1.bf16.msra.mxu0 %v4753_v43  ;;  %v4809_v43 = vcombine.low %v915_v37, %v919_v39  ;;  %v879_v12 = vld [vmem:[%s6553_s9 + $0x228] sm:$0xff] }
 0x10e   : > { %1623 = vmatprep.subr.bf16.mxu0 %v4746_v44  ;;  %1595 = vmatpush2.bf16.msra.mxu1 %v4823_v26  ;;  %v4810_v44 = vcombine.high %v915_v37, %v919_v39  ;;  %v4769_v18 = vcombine.low %v875_v11, %v879_v12  ;;  %v4766_v26 = vcombine.high %v6669_v21, %v873_v23 }
 0x10f   : > { %1596 = vmatprep.subr.bf16.mxu1 %v4816_v30  ;;  %v639_v30 = vld [vmem:[%s6547_s16] sm:$0x3] }
 0x111   : > { %1624 = vmatpush1.bf16.msra.mxu0 %v4745_v47  ;;  %v911_v47 = vld [vmem:[%s6553_s9 + $0x328] sm:$0xff] }
 0x112   : > { %1625 = vmatprep.subr.bf16.mxu0 %v4738_v48  ;;  %1597 = vmatpush2.bf16.msra.mxu1 %v4815_v34  ;;  %v898_v48 = vld [vmem:[%s6553_s9 + $0x2c0] sm:$0xff]  ;;  %v4801_v54 = vcombine.low %v907_v46, %v911_v47 }
 0x113   : > { %1598 = vmatprep.subr.bf16.mxu1 %v4808_v38  ;;  %v4792_v55 = vcombine.high %v898_v48, %v902_v50  ;;  %v4791_v61 = vcombine.low %v898_v48, %v902_v50  ;;  %v6237_v48 = vmov 1983009808  }
 0x115   : > { %1626 = vmatpush1.bf16.msra.mxu0 %v4737_v49  ;;  %v4802_v49 = vcombine.high %v907_v46, %v911_v47 }
 0x116   : > { %1627 = vmatprep.subr.bf16.mxu0 %v4730_v57  ;;  %1599 = vmatpush2.bf16.msra.mxu1 %v4807_v40  ;;  %v890_v57 = vld [vmem:[%s6553_s9 + $0x280] sm:$0xff] }
 0x117   : > { %1600 = vmatprep.subr.bf16.mxu1 %v4800_v45  ;;  %v4784_v63 = vcombine.high %v890_v57, %v894_v58  ;;  %v4783_v5 = vcombine.low %v890_v57, %v894_v58 }
 0x119   : > { %1628 = vmatpush1.bf16.msra.mxu0 %v4729_v56  ;;  %v4794_v56 = vcombine.high %v899_v51, %v903_v52 }
 0x11a   : > { %1629 = vmatprep.subr.bf16.mxu0 %v4722_v1  ;;  %1601 = vmatpush2.bf16.msra.mxu1 %v4799_v53  ;;  %v882_v1 = vld [vmem:[%s6553_s9 + $0x240] sm:$0xff] }
 0x11b   : > { %1602 = vmatprep.subr.bf16.mxu1 %v4792_v55  ;;  %v4776_v7 = vcombine.high %v882_v1, %v886_v2  ;;  %v4775_v13 = vcombine.low %v882_v1, %v886_v2  ;;  %v782_v55 = vld [vmem:[%s6575_s7] sm:$0xf]  ;;  %v852_v2 = vld [vmem:[%s6553_s9 + $0x150] sm:$0xff] }
 0x11d   : > { %1630 = vmatpush1.bf16.msra.mxu0 %v4721_v0  ;;  %v4786_v0 = vcombine.high %v891_v59, %v895_v60  ;;  %v860_v60 = vld [vmem:[%s6553_s9 + $0x190] sm:$0xff] }
 0x11e   : > { %1631 = vmatprep.subr.bf16.mxu0 %v4714_v9  ;;  %1603 = vmatpush2.bf16.msra.mxu1 %v4791_v61  ;;  %v874_v9 = vld [vmem:[%s6553_s9 + $0x200] sm:$0xff]  ;;  %v864_v61 = vld [vmem:[%s6553_s9 + $0x1b0] sm:$0xff] }
 0x11f   : > { %1604 = vmatprep.subr.bf16.mxu1 %v4784_v63  ;;  %v4768_v15 = vcombine.high %v874_v9, %v878_v10  ;;  %v865_v63 = vld [vmem:[%s6553_s9 + $0x1b8] sm:$0xff] }
 0x121   : > { %1632 = vmatpush1.bf16.msra.mxu0 %v4713_v8  ;;  %v4778_v8 = vcombine.high %v883_v3, %v887_v4  ;;  %v4756_v3 = vcombine.high %v860_v60, %v864_v61 }
 0x122   : > { %1633 = vmatprep.subr.bf16.mxu0 %v4706_v17  ;;  %1605 = vmatpush2.bf16.msra.mxu1 %v4783_v5  ;;  %v4767_v17 = vcombine.low %v874_v9, %v878_v10  ;;  %v856_v5 = vld [vmem:[%s6553_s9 + $0x170] sm:$0xff] }
 0x123   : > { %1606 = vmatprep.subr.bf16.mxu1 %v4776_v7  ;;  %v857_v7 = vld [vmem:[%s6553_s9 + $0x178] sm:$0xff]  ;;  %v4748_v10 = vcombine.high %v852_v2, %v856_v5 }
 0x125   : > { %1634 = vmatpush1.bf16.msra.mxu0 %v4705_v16  ;;  %v4770_v16 = vcombine.high %v875_v11, %v879_v12  ;;  %v844_v12 = vld [vmem:[%s6553_s9 + $0x110] sm:$0xff] }
 0x126   : > { %1635 = vmatprep.subr.bf16.mxu0 %v4826_v25  ;;  %1607 = vmatpush2.bf16.msra.mxu1 %v4775_v13  ;;  %v4765_v25 = vcombine.low %v6669_v21, %v873_v23  ;;  %v848_v13 = vld [vmem:[%s6553_s9 + $0x130] sm:$0xff]  ;;  %v841_v23 = vld [vmem:[%s6553_s9 + $0xf8] sm:$0xff] }
 0x127   : > { %1608 = vmatprep.subr.bf16.mxu1 %v4768_v15  ;;  %v849_v15 = vld [vmem:[%s6553_s9 + $0x138] sm:$0xff]  ;;  %v840_v21 = vld [vmem:[%s6553_s9 + $0xf0] sm:$0xff] }
 0x129   : > { %1636 = vmatpush2.bf16.msra.mxu0 %v4825_v24  ;;  %v4763_v24 = vcombine.low %v6663_v19, %v6666_v20  ;;  %v836_v20 = vld [vmem:[%s6553_s9 + $0xd0] sm:$0xff] }
 0x12a   : > { %1637 = vmatprep.subr.bf16.mxu0 %v4818_v33  ;;  %1609 = vmatpush2.bf16.msra.mxu1 %v4767_v17  ;;  %v648_v33 = vrot.slane %v639_v30, %v6685_v31 }
 0x12b   : > { %1660 = vmatprep.subr.bf16.mxu1 %v4764_v22  ;;  %v837_v22 = vld [vmem:[%s6553_s9 + $0xd8] sm:$0xff] }
 0x12c   : > { %v4734_v27 = vcombine.high %v837_v22, %v841_v23 }
 0x12d   : > { %1638 = vmatpush2.bf16.msra.mxu0 %v4817_v32  ;;  %v644_v32 = vrot.slane %v639_v30, %v6681_v29  ;;  %v828_v30 = vld [vmem:[%s6553_s9 + $0x90] sm:$0xff] }
 0x12e   : > { %1639 = vmatprep.subr.bf16.mxu0 %v4810_v44 }
 0x131   : > { %1640 = vmatpush2.bf16.msra.mxu0 %v4809_v43 }
 0x132   : > { %1641 = vmatprep.subr.bf16.mxu0 %v4802_v49  ;;  %v787_v49 = vunpack.c.l.s4 %v6237_v48  ;;  %v816_v48 = vld [vmem:[%s6553_s9 + $0x30] sm:$0xff] }
 0x134   : > { %v788_v50 = vunpack.c.0.s8 %v787_v49  ;;  %v813_v49 = vld [vmem:[%s6553_s9 + $0x18] sm:$0xff] }
 0x135   : > { %1642 = vmatpush2.bf16.msra.mxu0 %v4801_v54 }
 0x136   : > { %1643 = vmatprep.subr.bf16.mxu0 %v4794_v56  ;;  %v6690_v52 = vsub.s32 %v788_v50, %v6678_v28  ;;  %v817_v50 = vld [vmem:[%s6553_s9 + $0x38] sm:$0xff] }
 0x139   : > { %1644 = vmatpush2.bf16.msra.mxu0 %v4793_v62  ;;  %v861_v62 = vld [vmem:[%s6553_s9 + $0x198] sm:$0xff] }
 0x13a   : > { %1645 = vmatprep.subr.bf16.mxu0 %v4786_v0  ;;  %v4758_v4 = vcombine.high %v861_v62, %v865_v63  ;;  %v4757_v9 = vcombine.low %v861_v62, %v865_v63 }
 0x13d   : > { %1646 = vmatpush2.bf16.msra.mxu0 %v4785_v6  ;;  %v853_v6 = vld [vmem:[%s6553_s9 + $0x158] sm:$0xff] }
 0x13e   : > { %1647 = vmatprep.subr.bf16.mxu0 %v4778_v8  ;;  %v4755_v8 = vcombine.low %v860_v60, %v864_v61  ;;  %v4750_v11 = vcombine.high %v853_v6, %v857_v7  ;;  %v4749_v17 = vcombine.low %v853_v6, %v857_v7  ;;  %v4709_v61 = vcombine.low %v813_v49, %v817_v50 }
 0x141   : > { %1648 = vmatpush2.bf16.msra.mxu0 %v4777_v14  ;;  %v845_v14 = vld [vmem:[%s6553_s9 + $0x118] sm:$0xff] }
 0x142   : > { %1649 = vmatprep.subr.bf16.mxu0 %v4770_v16  ;;  %v4747_v16 = vcombine.low %v852_v2, %v856_v5  ;;  %v4742_v19 = vcombine.high %v845_v14, %v849_v15  ;;  %v928_v2 = vld [vmem:[%s6553_s9 + $0x3b0] sm:$0xff] }
 0x145   : > { %1650 = vmatpush2.bf16.msra.mxu0 %v4769_v18  ;;  %v4740_v18 = vcombine.high %v844_v12, %v848_v13 }
 0x146   : > { %1701 = vmatprep.subr.bf16.mxu0 %v4766_v26  ;;  %v4732_v26 = vcombine.high %v836_v20, %v840_v21 }
 0x1c8   : > { %v765_v34 = vpop.f32.mrf.mxu0 }
 0x1c9   : > { %v766_v35 = vadd.f32 %v765_v34, %v644_v32  ;;  %v832_v32 = vld [vmem:[%s6553_s9 + $0xb0] sm:$0xff]  ;;  %v833_v34 = vld [vmem:[%s6553_s9 + $0xb8] sm:$0xff] }
 0x1ca   : > { %v767_v36 = vpop.f32.mrf.mxu0 }
 0x1cb   : > { %v772_v37 = vsub.f32 0.0, %v766_v35  ;;  %v768_v38 = vadd.f32 %v767_v36, %v648_v33  ;;  %v829_v33 = vld [vmem:[%s6553_s9 + $0x98] sm:$0xff]  ;;  %v4731_v35 = vcombine.low %v836_v20, %v840_v21  ;;  %v4733_v36 = vcombine.low %v837_v22, %v841_v23 }
 0x1cc   : > { %v769_v39 = vpop.f32.mrf.mxu0  ;;  %v913_v20 = vld [vmem:[%s6553_s9 + $0x338] sm:$0xff] }
 0x1cd   : > { %v774_v40 = vmul.f32 1.442695, %v772_v37  ;;  %v773_v41 = vsub.f32 0.0, %v768_v38  ;;  %v4724_v37 = vcombine.high %v828_v30, %v832_v32  ;;  %v4726_v38 = vcombine.high %v829_v33, %v833_v34  ;;  %v820_v39 = vld [vmem:[%s6553_s9 + $0x50] sm:$0xff] }
 0x1ce   : > { %v770_v42 = vpop.f32.mrf.mxu0 }
 0x1cf   : > { %5362 = vpow2.f32 %v774_v40  ;;  %v776_v43 = vmul.f32 1.442695, %v773_v41  ;;  %v824_v40 = vld [vmem:[%s6553_s9 + $0x70] sm:$0xff]  ;;  %v821_v41 = vld [vmem:[%s6553_s9 + $0x58] sm:$0xff] }
 0x1d0   : > { %v825_v42 = vld [vmem:[%s6553_s9 + $0x78] sm:$0xff] }
 0x1d1   : > { %5364 = vpow2.f32 %v776_v43  ;;  %v4723_v43 = vcombine.low %v828_v30, %v832_v32  ;;  %v905_v30 = vld [vmem:[%s6553_s9 + $0x2f8] sm:$0xff] }
 0x1dc   : > { %v5363_v44 = vpop.eup %5362 }
 0x1dd   : > { %v778_v45 = vadd.f32 1.0, %v5363_v44  ;;  %v4725_v44 = vcombine.low %v829_v33, %v833_v34 }
 0x1de   : > { %v5365_v46 = vpop.eup %5364 }
 0x1df   : > { %v779_v47 = vadd.f32 1.0, %v5365_v46  ;;  %5366 = vrcp.f32 %v778_v45  ;;  %v4716_v45 = vcombine.high %v820_v39, %v824_v40  ;;  %v4718_v46 = vcombine.high %v821_v41, %v825_v42 }
 0x1e1   : > { %5368 = vrcp.f32 %v779_v47  ;;  %v812_v47 = vld [vmem:[%s6553_s9 + $0x10] sm:$0xff] }
 0x1e2   : > { %v4707_v60 = vcombine.low %v812_v47, %v816_v48 }
 0x1ec   : > { %v5367_v51 = vpop.eup %5366 }
 0x1ee   : > { %v5369_v53 = vpop.eup %5368 }
 0x1ef   : > { %v785_v54 = vcombine.low %v5367_v51, %v5369_v53  ;;  %v4715_v51 = vcombine.low %v820_v39, %v824_v40  ;;  %v4717_v53 = vcombine.low %v821_v41, %v825_v42  ;;  %v897_v39 = vld [vmem:[%s6553_s9 + $0x2b8] sm:$0xff] }
 0x1f1   : > { %v792_v56 = vrot.slane %v785_v54, %v6690_v52  ;;  %v4708_v54 = vcombine.high %v812_v47, %v816_v48  ;;  %v889_v47 = vld [vmem:[%s6553_s9 + $0x278] sm:$0xff] }
 0x1f3   : > { %v794_v57 = vmul.f32 %v792_v56, %v782_v55  ;;  %v4710_v55 = vcombine.high %v813_v49, %v817_v50  ;;  %v932_v56 = vld [vmem:[%s6553_s9 + $0x3d0] sm:$0xff] }
 0x1f5   : > { %v802_v58 = vrot.slane %v794_v57, %v6690_v52  ;;  %v936_v57 = vld [vmem:[%s6553_s9 + $0x3f0] sm:$0xff] }
 0x1f6   : > { %v4828_v62 = vcombine.high %v932_v56, %v936_v57  ;;  %v4827_v5 = vcombine.low %v932_v56, %v936_v57  ;;  %v881_v56 = vld [vmem:[%s6553_s9 + $0x238] sm:$0xff] }
 0x1f7   : > { %v803_v59 = vcombine.high %v802_v58, %v802_v58  ;;  %v6699_v1 = vpack.c.bf16 %v802_v58, %v802_v58  ;;  %v933_v58 = vld [vmem:[%s6553_s9 + $0x3d8] sm:$0xff] }
 0x1f9   : > { %v807_v0 = vpack.c.bf16 %v803_v59, %v803_v59  ;;  %v937_v59 = vld [vmem:[%s6553_s9 + $0x3f8] sm:$0xff] }
 0x1fa   : > { %v4830_v63 = vcombine.high %v933_v58, %v937_v59  ;;  %v4829_v6 = vcombine.low %v933_v58, %v937_v59 }
 0x1fb   : > { %1610 = vmatprep.mubr.bf16.mxu1 %v807_v0  ;;  %1651 = vmatprep.mubr.bf16.mxu0 %v807_v0 }
 0x1fc   : > { %1611 = vmatmul.mubr.bf16.vlgmr.msra.gmra.mxu1 %v6699_v1  ;;  %1652 = vmatmul.mubr.bf16.vlgmr.msra.gmra.mxu0 %v6699_v1 }
 0x1fd   : > { %1661 = vmatpush1.bf16.msra.mxu1 %v4763_v24  ;;  %1702 = vmatpush1.bf16.msra.mxu0 %v4765_v25  ;;  %v4739_v24 = vcombine.low %v844_v12, %v848_v13  ;;  %v4741_v25 = vcombine.low %v845_v14, %v849_v15  ;;  %v921_v12 = vld [vmem:[%s6553_s9 + $0x378] sm:$0xff] }
 0x1fe   : > { %1692 = vmatprep.mubr.bf16.mxu1 %v807_v0  ;;  %1733 = vmatprep.mubr.bf16.mxu0 %v807_v0  ;;  %v924_v0 = vld [vmem:[%s6553_s9 + $0x390] sm:$0xff] }
 0x1ff   : > { %1662 = vmatprep.subr.bf16.mxu1 %v4756_v3  ;;  %1703 = vmatprep.subr.bf16.mxu0 %v4758_v4  ;;  %v925_v3 = vld [vmem:[%s6553_s9 + $0x398] sm:$0xff]  ;;  %v4820_v7 = vcombine.high %v924_v0, %v928_v2  ;;  %v4819_v13 = vcombine.low %v924_v0, %v928_v2 }
 0x200   : > { %v929_v4 = vld [vmem:[%s6553_s9 + $0x3b8] sm:$0xff] }
 0x201   : > { %1663 = vmatpush1.bf16.msra.mxu1 %v4755_v8  ;;  %1704 = vmatpush1.bf16.msra.mxu0 %v4757_v9  ;;  %v4822_v8 = vcombine.high %v925_v3, %v929_v4  ;;  %v916_v9 = vld [vmem:[%s6553_s9 + $0x350] sm:$0xff]  ;;  %v4821_v14 = vcombine.low %v925_v3, %v929_v4 }
 0x202   : > { %1664 = vmatprep.subr.bf16.mxu1 %v4748_v10  ;;  %1705 = vmatprep.subr.bf16.mxu0 %v4750_v11  ;;  %v920_v10 = vld [vmem:[%s6553_s9 + $0x370] sm:$0xff]  ;;  %v917_v11 = vld [vmem:[%s6553_s9 + $0x358] sm:$0xff] }
 0x203   : > { %v4812_v15 = vcombine.high %v916_v9, %v920_v10  ;;  %v4811_v21 = vcombine.low %v916_v9, %v920_v10  ;;  %v4813_v22 = vcombine.low %v917_v11, %v921_v12  ;;  %v808_v10 = vld [vmem:[#allocation2] sm:$0xff] }
 0x205   : > { %1665 = vmatpush1.bf16.msra.mxu1 %v4747_v16  ;;  %1706 = vmatpush1.bf16.msra.mxu0 %v4749_v17  ;;  %v4814_v16 = vcombine.high %v917_v11, %v921_v12  ;;  %v908_v17 = vld [vmem:[%s6553_s9 + $0x310] sm:$0xff] }
 0x206   : > { %1666 = vmatprep.subr.bf16.mxu1 %v4740_v18  ;;  %1707 = vmatprep.subr.bf16.mxu0 %v4742_v19  ;;  %v912_v18 = vld [vmem:[%s6553_s9 + $0x330] sm:$0xff]  ;;  %v909_v19 = vld [vmem:[%s6553_s9 + $0x318] sm:$0xff] }
 0x207   : > { %v4804_v23 = vcombine.high %v908_v17, %v912_v18  ;;  %v4803_v32 = vcombine.low %v908_v17, %v912_v18  ;;  %v4805_v33 = vcombine.low %v909_v19, %v913_v20 }
 0x209   : > { %1667 = vmatpush1.bf16.msra.mxu1 %v4739_v24  ;;  %1708 = vmatpush1.bf16.msra.mxu0 %v4741_v25  ;;  %v4806_v24 = vcombine.high %v909_v19, %v913_v20  ;;  %v900_v25 = vld [vmem:[%s6553_s9 + $0x2d0] sm:$0xff] }
 0x20a   : > { %1668 = vmatprep.subr.bf16.mxu1 %v4732_v26  ;;  %1709 = vmatprep.subr.bf16.mxu0 %v4734_v27  ;;  %v904_v26 = vld [vmem:[%s6553_s9 + $0x2f0] sm:$0xff]  ;;  %v901_v27 = vld [vmem:[%s6553_s9 + $0x2d8] sm:$0xff] }
 0x20b   : > { %v4796_v34 = vcombine.high %v900_v25, %v904_v26  ;;  %v4795_v40 = vcombine.low %v900_v25, %v904_v26  ;;  %v4797_v41 = vcombine.low %v901_v27, %v905_v30 }
 0x20d   : > { %1669 = vmatpush1.bf16.msra.mxu1 %v4731_v35  ;;  %1710 = vmatpush1.bf16.msra.mxu0 %v4733_v36  ;;  %v4798_v35 = vcombine.high %v901_v27, %v905_v30  ;;  %v892_v36 = vld [vmem:[%s6553_s9 + $0x290] sm:$0xff] }
 0x20e   : > { %1670 = vmatprep.subr.bf16.mxu1 %v4724_v37  ;;  %1711 = vmatprep.subr.bf16.mxu0 %v4726_v38  ;;  %v896_v37 = vld [vmem:[%s6553_s9 + $0x2b0] sm:$0xff]  ;;  %v893_v38 = vld [vmem:[%s6553_s9 + $0x298] sm:$0xff] }
 0x20f   : > { %v4788_v42 = vcombine.high %v892_v36, %v896_v37  ;;  %v4787_v48 = vcombine.low %v892_v36, %v896_v37  ;;  %v4789_v49 = vcombine.low %v893_v38, %v897_v39 }
 0x211   : > { %1671 = vmatpush1.bf16.msra.mxu1 %v4723_v43  ;;  %1712 = vmatpush1.bf16.msra.mxu0 %v4725_v44  ;;  %v4790_v43 = vcombine.high %v893_v38, %v897_v39  ;;  %v884_v44 = vld [vmem:[%s6553_s9 + $0x250] sm:$0xff] }
 0x212   : > { %1672 = vmatprep.subr.bf16.mxu1 %v4716_v45  ;;  %1713 = vmatprep.subr.bf16.mxu0 %v4718_v46  ;;  %v888_v45 = vld [vmem:[%s6553_s9 + $0x270] sm:$0xff]  ;;  %v885_v46 = vld [vmem:[%s6553_s9 + $0x258] sm:$0xff] }
 0x213   : > { %v4780_v50 = vcombine.high %v884_v44, %v888_v45  ;;  %v4779_v57 = vcombine.low %v884_v44, %v888_v45  ;;  %v4781_v58 = vcombine.low %v885_v46, %v889_v47 }
 0x215   : > { %1673 = vmatpush1.bf16.msra.mxu1 %v4715_v51  ;;  %1714 = vmatpush1.bf16.msra.mxu0 %v4717_v53  ;;  %v4782_v51 = vcombine.high %v885_v46, %v889_v47  ;;  %v876_v53 = vld [vmem:[%s6553_s9 + $0x210] sm:$0xff] }
 0x216   : > { %1674 = vmatprep.subr.bf16.mxu1 %v4708_v54  ;;  %1715 = vmatprep.subr.bf16.mxu0 %v4710_v55  ;;  %v880_v54 = vld [vmem:[%s6553_s9 + $0x230] sm:$0xff]  ;;  %v877_v55 = vld [vmem:[%s6553_s9 + $0x218] sm:$0xff] }
 0x217   : > { %v4772_v59 = vcombine.high %v876_v53, %v880_v54 }
 0x219   : > { %1675 = vmatpush1.bf16.msra.mxu1 %v4707_v60  ;;  %1716 = vmatpush1.bf16.msra.mxu0 %v4709_v61  ;;  %v4774_v60 = vcombine.high %v877_v55, %v881_v56  ;;  %v4771_v61 = vcombine.low %v876_v53, %v880_v54 }
 0x21a   : > { %1676 = vmatprep.subr.bf16.mxu1 %v4828_v62  ;;  %1717 = vmatprep.subr.bf16.mxu0 %v4830_v63  ;;  %v4773_v62 = vcombine.low %v877_v55, %v881_v56 }
 0x21d   : > { %1677 = vmatpush2.bf16.msra.mxu1 %v4827_v5  ;;  %1718 = vmatpush2.bf16.msra.mxu0 %v4829_v6 }
 0x21e   : > { %1678 = vmatprep.subr.bf16.mxu1 %v4820_v7  ;;  %1719 = vmatprep.subr.bf16.mxu0 %v4822_v8 }
 0x221   : > { %1679 = vmatpush2.bf16.msra.mxu1 %v4819_v13  ;;  %1720 = vmatpush2.bf16.msra.mxu0 %v4821_v14 }
 0x222   : > { %1680 = vmatprep.subr.bf16.mxu1 %v4812_v15  ;;  %1721 = vmatprep.subr.bf16.mxu0 %v4814_v16 }
 0x225   : > { %1681 = vmatpush2.bf16.msra.mxu1 %v4811_v21  ;;  %1722 = vmatpush2.bf16.msra.mxu0 %v4813_v22 }
 0x226   : > { %1682 = vmatprep.subr.bf16.mxu1 %v4804_v23  ;;  %1723 = vmatprep.subr.bf16.mxu0 %v4806_v24  ;;  %v809_v24 = vld [vmem:[#allocation2 + $0x8] sm:$0xff] }
 0x229   : > { %1683 = vmatpush2.bf16.msra.mxu1 %v4803_v32  ;;  %1724 = vmatpush2.bf16.msra.mxu0 %v4805_v33 }
 0x22a   : > { %1684 = vmatprep.subr.bf16.mxu1 %v4796_v34  ;;  %1725 = vmatprep.subr.bf16.mxu0 %v4798_v35 }
 0x22d   : > { %1685 = vmatpush2.bf16.msra.mxu1 %v4795_v40  ;;  %1726 = vmatpush2.bf16.msra.mxu0 %v4797_v41 }
 0x22e   : > { %1686 = vmatprep.subr.bf16.mxu1 %v4788_v42  ;;  %1727 = vmatprep.subr.bf16.mxu0 %v4790_v43 }
 0x231   : > { %1687 = vmatpush2.bf16.msra.mxu1 %v4787_v48  ;;  %1728 = vmatpush2.bf16.msra.mxu0 %v4789_v49 }
 0x232   : > { %1688 = vmatprep.subr.bf16.mxu1 %v4780_v50  ;;  %1729 = vmatprep.subr.bf16.mxu0 %v4782_v51 }
 0x235   : > { %1689 = vmatpush2.bf16.msra.mxu1 %v4779_v57  ;;  %1730 = vmatpush2.bf16.msra.mxu0 %v4781_v58 }
 0x236   : > { %1690 = vmatprep.subr.bf16.mxu1 %v4772_v59  ;;  %1731 = vmatprep.subr.bf16.mxu0 %v4774_v60 }
 0x239   : > { %1691 = vmatpush2.bf16.msra.mxu1 %v4771_v61  ;;  %1732 = vmatpush2.bf16.msra.mxu0 %v4773_v62 }
 0x23c   : > { %1693 = vmatmul.mubr.bf16.vlgmr.msra.gmra.mxu1 %v6699_v1  ;;  %1734 = vmatmul.mubr.bf16.vlgmr.msra.gmra.mxu0 %v6699_v1 }
 0x2bc   : > { %v1612_v63 = vpop.f32.mrf.mxu1  ;;  %v1653_v0 = vpop.f32.mrf.mxu0 }
 0x2be   : > { %v1614_v2 = vpop.f32.mrf.mxu1  ;;  %v1655_v3 = vpop.f32.mrf.mxu0 }
 0x2bf   : > { %v1750_v4 = vcombine.low %v1612_v63, %v1614_v2  ;;  %v1751_v5 = vcombine.low %v1653_v0, %v1655_v3 }
 0x2c0   : > { %v1616_v6 = vpop.f32.mrf.mxu1  ;;  %v1657_v7 = vpop.f32.mrf.mxu0 }
 0x2c1   : > { %v1758_v8 = vrot.slane %v1750_v4, %v6690_v52  ;;  %v1765_v9 = vrot.slane %v1751_v5, %v6690_v52 }
 0x2c2   : > { %v1617_v11 = vpop.f32.mrf.mxu1  ;;  %v1658_v12 = vpop.f32.mrf.mxu0 }
 0x2c3   : > { %v1766_v13 = vcombine.low %v1758_v8, %v1765_v9 }
 0x2c5   : > { %v1786_v14 = vadd.f32 %v1766_v13, %v808_v10 }
 0x2c7   : > { %1788 = vst [vmem:[#allocation2] sm:$0xff] %v1786_v14 }
 0x2fc   : > { %v1694_v15 = vpop.f32.mrf.mxu1  ;;  %v1735_v1 = vpop.f32.mrf.mxu0 }
 0x2fe   : > { %v1696_v16 = vpop.f32.mrf.mxu1  ;;  %v1737_v17 = vpop.f32.mrf.mxu0 }
 0x2ff   : > { %v1767_v18 = vcombine.low %v1694_v15, %v1696_v16  ;;  %v1768_v19 = vcombine.low %v1735_v1, %v1737_v17 }
 0x300   : > { %v1698_v20 = vpop.f32.mrf.mxu1  ;;  %v1739_v21 = vpop.f32.mrf.mxu0 }
 0x301   : > { %v1775_v22 = vrot.slane %v1767_v18, %v6690_v52  ;;  %v1782_v23 = vrot.slane %v1768_v19, %v6690_v52 }
 0x302   : > { %v1699_v25 = vpop.f32.mrf.mxu1  ;;  %v1740_v26 = vpop.f32.mrf.mxu0 }
 0x303   : > { %v1783_v27 = vcombine.low %v1775_v22, %v1782_v23  ;;  %1793 = sbr.rel (%p4831_p6) target bundleno = 1639 (0x667), region = 116 }
 0x305   : > { %v1787_v30 = vadd.f32 %v1783_v27, %v809_v24 }
 0x307   : > { %1789 = vst [vmem:[#allocation2 + $0x8] sm:$0xff] %v1787_v30 }
 0x308   : > { %v5370_v32 = vld [vmem:[#allocation11 + $0xe4] ss:$16 sps:$4 sm:$0xff]   ;;  %v5374_v34 = vld [vmem:[#allocation11 + $0xe0] ss:$16 sps:$4 sm:$0xff]   ;;  %v1808_v15 = vsub.s32 2, %v6678_v28  ;;  %v1812_v16 = vsub.s32 3, %v6678_v28 }
 0x309   : > { %v5372_v33 = vld [vmem:[#allocation11 + $0x2e4] ss:$16 sps:$4 sm:$0xff]   ;;  %3480 = vmatprep.subr.bf16.mxu0 %v5370_v32  ;;  %v5375_v35 = vld [vmem:[#allocation11 + $0x2e0] ss:$16 sps:$4 sm:$0xff]   ;;  %v6768_v17 = vld [vmem:[#allocation9] sm:$0xff] }
 0x30a   : > { %3521 = vmatprep.subr.bf16.mxu1 %v5372_v33  ;;  %v5376_v36 = vld [vmem:[#allocation11 + $0xc4] ss:$16 sps:$4 sm:$0xff]   ;;  %3481 = vmatpush1.bf16.msra.mxu0 %v5374_v34  ;;  %v5380_v38 = vld [vmem:[#allocation11 + $0xc0] ss:$16 sps:$4 sm:$0xff]   ;;  %v1801_v20 = vrot.slane %v6768_v17, %v6681_v29  ;;  %v1805_v21 = vrot.slane %v6768_v17, %v6685_v31  ;;  %v1809_v22 = vrot.slane %v6768_v17, %v1808_v15 }
 0x30b   : > { %3522 = vmatpush1.bf16.msra.mxu1 %v5375_v35  ;;  %v5378_v37 = vld [vmem:[#allocation11 + $0x2c4] ss:$16 sps:$4 sm:$0xff]   ;;  %3482 = vmatprep.subr.bf16.mxu0 %v5376_v36  ;;  %v5381_v39 = vld [vmem:[#allocation11 + $0x2c0] ss:$16 sps:$4 sm:$0xff]   ;;  %v1813_v25 = vrot.slane %v6768_v17, %v1812_v16 }
 0x30c   : > { %3523 = vmatprep.subr.bf16.mxu1 %v5378_v37  ;;  %v5382_v40 = vld [vmem:[#allocation11 + $0xa4] ss:$16 sps:$4 sm:$0xff]   ;;  %v5386_v42 = vld [vmem:[#allocation11 + $0xa0] ss:$16 sps:$4 sm:$0xff]   ;;  %v1830_v26 = vcombine.low %v1801_v20, %v1805_v21 }
 0x30d   : > { %v5384_v41 = vld [vmem:[#allocation11 + $0x2a4] ss:$16 sps:$4 sm:$0xff]   ;;  %v5387_v43 = vld [vmem:[#allocation11 + $0x2a0] ss:$16 sps:$4 sm:$0xff]   ;;  %v1831_v27 = vcombine.low %v1809_v22, %v1813_v25 }
 0x30e   : > { %3483 = vmatpush1.bf16.msra.mxu0 %v5380_v38  ;;  %v5388_v44 = vld [vmem:[#allocation11 + $0x84] ss:$16 sps:$4 sm:$0xff]   ;;  %v5392_v46 = vld [vmem:[#allocation11 + $0x80] ss:$16 sps:$4 sm:$0xff]   ;;  %v1838_v33 = vrot.slane %v1830_v26, %v6690_v52 }
 0x30f   : > { %3524 = vmatpush1.bf16.msra.mxu1 %v5381_v39  ;;  %3484 = vmatprep.subr.bf16.mxu0 %v5382_v40  ;;  %v5390_v45 = vld [vmem:[#allocation11 + $0x284] ss:$16 sps:$4 sm:$0xff]   ;;  %v5393_v47 = vld [vmem:[#allocation11 + $0x280] ss:$16 sps:$4 sm:$0xff]   ;;  %v1845_v36 = vrot.slane %v1831_v27, %v6690_v52 }
 0x310   : > { %3525 = vmatprep.subr.bf16.mxu1 %v5384_v41  ;;  %v5394_v48 = vld [vmem:[#allocation11 + $0x64] ss:$16 sps:$4 sm:$0xff]   ;;  %v5398_v50 = vld [vmem:[#allocation11 + $0x60] ss:$16 sps:$4 sm:$0xff]  }
 0x311   : > { %v5396_v49 = vld [vmem:[#allocation11 + $0x264] ss:$16 sps:$4 sm:$0xff]   ;;  %v5399_v51 = vld [vmem:[#allocation11 + $0x260] ss:$16 sps:$4 sm:$0xff]   ;;  %v1846_v38 = vcombine.low %v1838_v33, %v1845_v36 }
 0x312   : > { %3485 = vmatpush1.bf16.msra.mxu0 %v5386_v42  ;;  %v5400_v53 = vld [vmem:[#allocation11 + $0x44] ss:$16 sps:$4 sm:$0xff]   ;;  %v5404_v55 = vld [vmem:[#allocation11 + $0x40] ss:$16 sps:$4 sm:$0xff]  }
 0x313   : > { %3526 = vmatpush1.bf16.msra.mxu1 %v5387_v43  ;;  %3486 = vmatprep.subr.bf16.mxu0 %v5388_v44  ;;  %v5402_v54 = vld [vmem:[#allocation11 + $0x244] ss:$16 sps:$4 sm:$0xff]   ;;  %v5405_v56 = vld [vmem:[#allocation11 + $0x240] ss:$16 sps:$4 sm:$0xff]  }
 0x314   : > { %3527 = vmatprep.subr.bf16.mxu1 %v5390_v45  ;;  %v5406_v57 = vld [vmem:[#allocation11 + $0x24] ss:$16 sps:$4 sm:$0xff]   ;;  %v5410_v59 = vld [vmem:[#allocation11 + $0x20] ss:$16 sps:$4 sm:$0xff]  }
 0x315   : > { %v5408_v58 = vld [vmem:[#allocation11 + $0x224] ss:$16 sps:$4 sm:$0xff]   ;;  %v5411_v60 = vld [vmem:[#allocation11 + $0x220] ss:$16 sps:$4 sm:$0xff]  }
 0x316   : > { %3487 = vmatpush1.bf16.msra.mxu0 %v5392_v46  ;;  %v5412_v61 = vld [vmem:[#allocation11 + $0x4] ss:$16 sps:$4 sm:$0xff]   ;;  %v5416_v63 = vld [vmem:[#allocation11] ss:$16 sps:$4 sm:$0xff]  }
 0x317   : > { %3528 = vmatpush1.bf16.msra.mxu1 %v5393_v47  ;;  %3488 = vmatprep.subr.bf16.mxu0 %v5394_v48  ;;  %v5414_v62 = vld [vmem:[#allocation11 + $0x204] ss:$16 sps:$4 sm:$0xff]   ;;  %v5417_v0 = vld [vmem:[#allocation11 + $0x200] ss:$16 sps:$4 sm:$0xff]  }
 0x318   : > { %3529 = vmatprep.subr.bf16.mxu1 %v5396_v49  ;;  %v5418_v2 = vld [vmem:[#allocation11 + $0x1e4] ss:$16 sps:$4 sm:$0xff]   ;;  %v5422_v4 = vld [vmem:[#allocation11 + $0x1e0] ss:$16 sps:$4 sm:$0xff]  }
 0x319   : > { %v5420_v3 = vld [vmem:[#allocation11 + $0x3e4] ss:$16 sps:$4 sm:$0xff]   ;;  %v5423_v5 = vld [vmem:[#allocation11 + $0x3e0] ss:$16 sps:$4 sm:$0xff]  }
 0x31a   : > { %3489 = vmatpush1.bf16.msra.mxu0 %v5398_v50  ;;  %v5424_v6 = vld [vmem:[#allocation11 + $0x1c4] ss:$16 sps:$4 sm:$0xff]   ;;  %v5428_v8 = vld [vmem:[#allocation11 + $0x1c0] ss:$16 sps:$4 sm:$0xff]  }
 0x31b   : > { %3530 = vmatpush1.bf16.msra.mxu1 %v5399_v51  ;;  %3490 = vmatprep.subr.bf16.mxu0 %v5400_v53  ;;  %v5426_v7 = vld [vmem:[#allocation11 + $0x3c4] ss:$16 sps:$4 sm:$0xff]   ;;  %v5429_v9 = vld [vmem:[#allocation11 + $0x3c0] ss:$16 sps:$4 sm:$0xff]  }
 0x31c   : > { %3531 = vmatprep.subr.bf16.mxu1 %v5402_v54  ;;  %v5430_v10 = vld [vmem:[#allocation11 + $0x1a4] ss:$16 sps:$4 sm:$0xff]   ;;  %v5434_v12 = vld [vmem:[#allocation11 + $0x1a0] ss:$16 sps:$4 sm:$0xff]  }
 0x31d   : > { %v5432_v11 = vld [vmem:[#allocation11 + $0x3a4] ss:$16 sps:$4 sm:$0xff]   ;;  %v5435_v13 = vld [vmem:[#allocation11 + $0x3a0] ss:$16 sps:$4 sm:$0xff]  }
 0x31e   : > { %3491 = vmatpush1.bf16.msra.mxu0 %v5404_v55  ;;  %v5436_v14 = vld [vmem:[#allocation11 + $0x184] ss:$16 sps:$4 sm:$0xff]   ;;  %v5440_v18 = vld [vmem:[#allocation11 + $0x180] ss:$16 sps:$4 sm:$0xff]  }
 0x31f   : > { %3532 = vmatpush1.bf16.msra.mxu1 %v5405_v56  ;;  %3492 = vmatprep.subr.bf16.mxu0 %v5406_v57  ;;  %v5438_v1 = vld [vmem:[#allocation11 + $0x384] ss:$16 sps:$4 sm:$0xff]   ;;  %v5441_v19 = vld [vmem:[#allocation11 + $0x380] ss:$16 sps:$4 sm:$0xff]  }
 0x320   : > { %3533 = vmatprep.subr.bf16.mxu1 %v5408_v58  ;;  %v5442_v23 = vld [vmem:[#allocation11 + $0x164] ss:$16 sps:$4 sm:$0xff]   ;;  %v5446_v30 = vld [vmem:[#allocation11 + $0x160] ss:$16 sps:$4 sm:$0xff]  }
 0x321   : > { %v5444_v24 = vld [vmem:[#allocation11 + $0x364] ss:$16 sps:$4 sm:$0xff]   ;;  %v5447_v32 = vld [vmem:[#allocation11 + $0x360] ss:$16 sps:$4 sm:$0xff]  }
 0x322   : > { %3493 = vmatpush1.bf16.msra.mxu0 %v5410_v59  ;;  %v5448_v34 = vld [vmem:[#allocation11 + $0x144] ss:$16 sps:$4 sm:$0xff]   ;;  %v5452_v39 = vld [vmem:[#allocation11 + $0x140] ss:$16 sps:$4 sm:$0xff]  }
 0x323   : > { %3534 = vmatpush1.bf16.msra.mxu1 %v5411_v60  ;;  %3494 = vmatprep.subr.bf16.mxu0 %v5412_v61  ;;  %v5450_v35 = vld [vmem:[#allocation11 + $0x344] ss:$16 sps:$4 sm:$0xff]   ;;  %v5453_v40 = vld [vmem:[#allocation11 + $0x340] ss:$16 sps:$4 sm:$0xff]  }
 0x324   : > { %3535 = vmatprep.subr.bf16.mxu1 %v5414_v62  ;;  %v1794_v37 = vld [vmem:[#allocation2] sm:$0xff]  ;;  %v5458_v45 = vld [vmem:[#allocation11 + $0x120] ss:$16 sps:$4 sm:$0xff]  }
 0x325   : > { %v5454_v41 = vld [vmem:[#allocation11 + $0x124] ss:$16 sps:$4 sm:$0xff]   ;;  %v1866_v43 = vadd.f32 %v1846_v38, %v1794_v37  ;;  %v5459_v46 = vld [vmem:[#allocation11 + $0x320] ss:$16 sps:$4 sm:$0xff]  }
 0x326   : > { %3495 = vmatpush1.bf16.msra.mxu0 %v5416_v63  ;;  %v5456_v42 = vld [vmem:[#allocation11 + $0x324] ss:$16 sps:$4 sm:$0xff]   ;;  %v5464_v54 = vld [vmem:[#allocation11 + $0x100] ss:$16 sps:$4 sm:$0xff]  }
 0x327   : > { %3536 = vmatpush1.bf16.msra.mxu1 %v5417_v0  ;;  %3496 = vmatprep.subr.bf16.mxu0 %v5418_v2  ;;  %v1868_v44 = vmax.f32 %v1866_v43, 0.0  ;;  %v5460_v47 = vld [vmem:[#allocation11 + $0x104] ss:$16 sps:$4 sm:$0xff]   ;;  %v5465_v55 = vld [vmem:[#allocation11 + $0x300] ss:$16 sps:$4 sm:$0xff]  }
 0x328   : > { %3537 = vmatprep.subr.bf16.mxu1 %v5420_v3  ;;  %v5462_v48 = vld [vmem:[#allocation11 + $0x304] ss:$16 sps:$4 sm:$0xff]   ;;  %v5466_v63 = vld [vmem:[#allocation11 + $0x4e0] ss:$16 sps:$4 sm:$0xff]  }
 0x329   : > { %v1879_v49 = vrot.slane %v1868_v44, %v6690_v52  ;;  %v1872_v50 = vcombine.high %v1868_v44, %v1868_v44  ;;  %v5468_v58 = vld [vmem:[#allocation11 + $0x4e4] ss:$16 sps:$4 sm:$0xff]   ;;  %v5469_v0 = vld [vmem:[#allocation11 + $0x6e0] ss:$16 sps:$4 sm:$0xff]  }
 0x32a   : > { %3497 = vmatpush2.bf16.msra.mxu0 %v5422_v4  ;;  %v5471_v59 = vld [vmem:[#allocation11 + $0x6e4] ss:$16 sps:$4 sm:$0xff]   ;;  %v1816_v4 = vsub.s32 4, %v6678_v28  ;;  %v5487_v25 = vld [vmem:[#allocation11 + $0x680] ss:$16 sps:$4 sm:$0xff]  }
 0x32b   : > { %3538 = vmatpush2.bf16.msra.mxu1 %v5423_v5  ;;  %3498 = vmatprep.subr.bf16.mxu0 %v5424_v6  ;;  %v1887_v51 = vcombine.high %v1879_v49, %v1879_v49  ;;  %v1886_v53 = vrot.slane %v1872_v50, %v6690_v52  ;;  %v6789_v61 = vpack.c.bf16 %v1879_v49, %v1879_v49  ;;  %v5474_v2 = vld [vmem:[#allocation11 + $0x4c4] ss:$16 sps:$4 sm:$0xff]   ;;  %v1820_v5 = vsub.s32 5, %v6678_v28  ;;  %v5493_v33 = vld [vmem:[#allocation11 + $0x660] ss:$16 sps:$4 sm:$0xff]  }
 0x32c   : > { %3539 = vmatprep.subr.bf16.mxu1 %v5426_v7  ;;  %v5477_v3 = vld [vmem:[#allocation11 + $0x6c4] ss:$16 sps:$4 sm:$0xff]   ;;  %v1824_v6 = vsub.s32 6, %v6678_v28  ;;  %v1828_v7 = vsub.s32 7, %v6678_v28  ;;  %v5496_v37 = vld [vmem:[#allocation11 + $0x440] ss:$16 sps:$4 sm:$0xff]  }
 0x32d   : > { %v6784_v56 = vpack.c.bf16 %v1887_v51, %v1887_v51  ;;  %v1888_v57 = vcombine.high %v1886_v53, %v1886_v53  ;;  %v6791_v62 = vpack.c.bf16 %v1886_v53, %v1886_v53  ;;  %v5486_v20 = vld [vmem:[#allocation11 + $0x484] ss:$16 sps:$4 sm:$0xff]   ;;  %v5499_v38 = vld [vmem:[#allocation11 + $0x640] ss:$16 sps:$4 sm:$0xff]  }
 0x32e   : > { %3499 = vmatpush2.bf16.msra.mxu0 %v5428_v8  ;;  %v5472_v8 = vld [vmem:[#allocation11 + $0x4c0] ss:$16 sps:$4 sm:$0xff]   ;;  %v5489_v21 = vld [vmem:[#allocation11 + $0x684] ss:$16 sps:$4 sm:$0xff]  }
 0x32f   : > { %3540 = vmatpush2.bf16.msra.mxu1 %v5429_v9  ;;  %3500 = vmatprep.subr.bf16.mxu0 %v5430_v10  ;;  %v6787_v60 = vpack.c.bf16 %v1888_v57, %v1888_v57  ;;  %v5475_v9 = vld [vmem:[#allocation11 + $0x6c0] ss:$16 sps:$4 sm:$0xff]   ;;  %v5480_v10 = vld [vmem:[#allocation11 + $0x4a4] ss:$16 sps:$4 sm:$0xff]  }
 0x330   : > { %3541 = vmatprep.subr.bf16.mxu1 %v5432_v11  ;;  %3512 = vmatprep.mubr.bf16.mxu0 %v6784_v56  ;;  %v5483_v11 = vld [vmem:[#allocation11 + $0x6a4] ss:$16 sps:$4 sm:$0xff]   ;;  %v5505_v44 = vld [vmem:[#allocation11 + $0x620] ss:$16 sps:$4 sm:$0xff]  }
 0x331   : > { %3553 = vmatprep.mubr.bf16.mxu1 %v6787_v60  ;;  %v5492_v26 = vld [vmem:[#allocation11 + $0x464] ss:$16 sps:$4 sm:$0xff]   ;;  %v5511_v51 = vld [vmem:[#allocation11 + $0x600] ss:$16 sps:$4 sm:$0xff]  }
 0x332   : > { %3501 = vmatpush2.bf16.msra.mxu0 %v5434_v12  ;;  %v1817_v12 = vrot.slane %v6768_v17, %v1816_v4  ;;  %v5495_v27 = vld [vmem:[#allocation11 + $0x664] ss:$16 sps:$4 sm:$0xff]  }
 0x333   : > { %3542 = vmatpush2.bf16.msra.mxu1 %v5435_v13  ;;  %3502 = vmatprep.subr.bf16.mxu0 %v5436_v14  ;;  %v1821_v13 = vrot.slane %v6768_v17, %v1820_v5  ;;  %v1825_v14 = vrot.slane %v6768_v17, %v1824_v6  ;;  %v5516_v53 = vld [vmem:[#allocation11 + $0x5e4] ss:$16 sps:$4 sm:$0xff]   ;;  %v5520_v5 = vld [vmem:[#allocation11 + $0x5c0] ss:$16 sps:$4 sm:$0xff]  }
 0x334   : > { %3543 = vmatprep.subr.bf16.mxu1 %v5438_v1  ;;  %v1829_v1 = vrot.slane %v6768_v17, %v1828_v7  ;;  %v5528_v6 = vld [vmem:[#allocation11 + $0x5a4] ss:$16 sps:$4 sm:$0xff]  }
 0x335   : > { %v1847_v22 = vcombine.low %v1817_v12, %v1821_v13  ;;  %v5531_v7 = vld [vmem:[#allocation11 + $0x7a4] ss:$16 sps:$4 sm:$0xff]   ;;  %v5532_v12 = vld [vmem:[#allocation11 + $0x580] ss:$16 sps:$4 sm:$0xff]  }
 0x336   : > { %3503 = vmatpush2.bf16.msra.mxu0 %v5440_v18  ;;  %v5478_v18 = vld [vmem:[#allocation11 + $0x4a0] ss:$16 sps:$4 sm:$0xff]  }
 0x337   : > { %3544 = vmatpush2.bf16.msra.mxu1 %v5441_v19  ;;  %3504 = vmatprep.subr.bf16.mxu0 %v5442_v23  ;;  %v5481_v19 = vld [vmem:[#allocation11 + $0x6a0] ss:$16 sps:$4 sm:$0xff]   ;;  %v1848_v23 = vcombine.low %v1825_v14, %v1829_v1  ;;  %v1855_v17 = vrot.slane %v1847_v22, %v6690_v52  ;;  %v5540_v14 = vld [vmem:[#allocation11 + $0x564] ss:$16 sps:$4 sm:$0xff]  }
 0x338   : > { %3545 = vmatprep.subr.bf16.mxu1 %v5444_v24  ;;  %v5484_v24 = vld [vmem:[#allocation11 + $0x480] ss:$16 sps:$4 sm:$0xff]   ;;  %v5543_v1 = vld [vmem:[#allocation11 + $0x764] ss:$16 sps:$4 sm:$0xff]  }
 0x339   : > { %v5535_v13 = vld [vmem:[#allocation11 + $0x780] ss:$16 sps:$4 sm:$0xff]  }
 0x33a   : > { %3505 = vmatpush2.bf16.msra.mxu0 %v5446_v30  ;;  %v1862_v30 = vrot.slane %v1848_v23, %v6690_v52  ;;  %v5544_v22 = vld [vmem:[#allocation11 + $0x540] ss:$16 sps:$4 sm:$0xff]  }
 0x33b   : > { %3546 = vmatpush2.bf16.msra.mxu1 %v5447_v32  ;;  %3506 = vmatprep.subr.bf16.mxu0 %v5448_v34  ;;  %v5490_v32 = vld [vmem:[#allocation11 + $0x460] ss:$16 sps:$4 sm:$0xff]   ;;  %v5498_v34 = vld [vmem:[#allocation11 + $0x444] ss:$16 sps:$4 sm:$0xff]  }
 0x33c   : > { %3547 = vmatprep.subr.bf16.mxu1 %v5450_v35  ;;  %v5501_v35 = vld [vmem:[#allocation11 + $0x644] ss:$16 sps:$4 sm:$0xff]   ;;  %v1863_v36 = vcombine.low %v1855_v17, %v1862_v30  ;;  %v5547_v23 = vld [vmem:[#allocation11 + $0x740] ss:$16 sps:$4 sm:$0xff]  }
 0x33d   : > { %v5558_v17 = vld [vmem:[#allocation11 + $0x504] ss:$16 sps:$4 sm:$0xff]  }
 0x33e   : > { %3507 = vmatpush2.bf16.msra.mxu0 %v5452_v39  ;;  %v5504_v39 = vld [vmem:[#allocation11 + $0x424] ss:$16 sps:$4 sm:$0xff]  }
 0x33f   : > { %3548 = vmatpush2.bf16.msra.mxu1 %v5453_v40  ;;  %3508 = vmatprep.subr.bf16.mxu0 %v5454_v41  ;;  %v5507_v40 = vld [vmem:[#allocation11 + $0x624] ss:$16 sps:$4 sm:$0xff]   ;;  %v1795_v41 = vld [vmem:[#allocation2 + $0x8] sm:$0xff] }
 0x340   : > { %3549 = vmatprep.subr.bf16.mxu1 %v5456_v42  ;;  %v5502_v42 = vld [vmem:[#allocation11 + $0x420] ss:$16 sps:$4 sm:$0xff]   ;;  %v1867_v43 = vadd.f32 %v1863_v36, %v1795_v41  ;;  %v5561_v30 = vld [vmem:[#allocation11 + $0x704] ss:$16 sps:$4 sm:$0xff]   ;;  %v5573_v41 = vld [vmem:[#allocation11 + $0x2cc] ss:$16 sps:$4 sm:$0xff]  }
 0x342   : > { %3509 = vmatpush2.bf16.msra.mxu0 %v5458_v45  ;;  %v5510_v45 = vld [vmem:[#allocation11 + $0x404] ss:$16 sps:$4 sm:$0xff]  }
 0x343   : > { %3550 = vmatpush2.bf16.msra.mxu1 %v5459_v46  ;;  %3510 = vmatprep.subr.bf16.mxu0 %v5460_v47  ;;  %v5513_v46 = vld [vmem:[#allocation11 + $0x604] ss:$16 sps:$4 sm:$0xff]   ;;  %v1869_v47 = vmax.f32 %v1867_v43, 0.0  ;;  %v5571_v43 = vld [vmem:[#allocation11 + $0x2c8] ss:$16 sps:$4 sm:$0xff]  }
 0x344   : > { %3551 = vmatprep.subr.bf16.mxu1 %v5462_v48  ;;  %v5508_v48 = vld [vmem:[#allocation11 + $0x400] ss:$16 sps:$4 sm:$0xff]  }
 0x345   : > { %v6807_v49 = vrot.slane %v1869_v47, %v6690_v52  ;;  %v1889_v50 = vcombine.high %v1869_v47, %v1869_v47  ;;  %v5577_v47 = vld [vmem:[#allocation11 + $0x2a8] ss:$16 sps:$4 sm:$0xff]  }
 0x346   : > { %3511 = vmatpush2.bf16.msra.mxu0 %v5464_v54  ;;  %v5519_v54 = vld [vmem:[#allocation11 + $0x7e4] ss:$16 sps:$4 sm:$0xff]  }
 0x347   : > { %3552 = vmatpush2.bf16.msra.mxu1 %v5465_v55  ;;  %3562 = vmatprep.subr.bf16.mxu0 %v5468_v58  ;;  %v1904_v55 = vcombine.high %v6807_v49, %v6807_v49  ;;  %v6812_v57 = vrot.slane %v1889_v50, %v6690_v52  ;;  %v5514_v58 = vld [vmem:[#allocation11 + $0x5e0] ss:$16 sps:$4 sm:$0xff]   ;;  %v6824_v36 = vpack.c.bf16 %v6807_v49, %v6807_v49  ;;  %v5585_v49 = vld [vmem:[#allocation11 + $0x28c] ss:$16 sps:$4 sm:$0xff]   ;;  %v5580_v50 = vld [vmem:[#allocation11 + $0x88] ss:$16 sps:$4 sm:$0xff]  }
 0x348   : > { %3603 = vmatprep.subr.bf16.mxu1 %v5471_v59  ;;  %v5523_v52 = vld [vmem:[#allocation11 + $0x7c0] ss:$16 sps:$4 sm:$0xff]  }
 0x349   : > { %3513 = vmatmul.mubr.bf16.vlgmr.msra.gmra.mxu0 %v6789_v61  ;;  %v6814_v59 = vpack.c.bf16 %v1904_v55, %v1904_v55  ;;  %v5586_v55 = vld [vmem:[#allocation11 + $0x68] ss:$16 sps:$4 sm:$0xff]  }
 0x34a   : > { %3554 = vmatmul.mubr.bf16.vlgmr.msra.gmra.mxu1 %v6791_v62  ;;  %3563 = vmatpush1.bf16.msra.mxu0 %v5466_v63  ;;  %v1905_v63 = vcombine.high %v6812_v57, %v6812_v57 }
 0x34b   : > { %3604 = vmatpush1.bf16.msra.mxu1 %v5469_v0  ;;  %3564 = vmatprep.subr.bf16.mxu0 %v5474_v2  ;;  %v5517_v0 = vld [vmem:[#allocation11 + $0x7e0] ss:$16 sps:$4 sm:$0xff]   ;;  %v5522_v2 = vld [vmem:[#allocation11 + $0x5c4] ss:$16 sps:$4 sm:$0xff]  }
 0x34c   : > { %3605 = vmatprep.subr.bf16.mxu1 %v5477_v3  ;;  %v5525_v3 = vld [vmem:[#allocation11 + $0x7c4] ss:$16 sps:$4 sm:$0xff]   ;;  %v6818_v4 = vpack.c.bf16 %v1905_v63, %v1905_v63  ;;  %3594 = vmatprep.mubr.bf16.mxu0 %v6814_v59  ;;  %v5595_v63 = vld [vmem:[#allocation11 + $0x248] ss:$16 sps:$4 sm:$0xff]  }
 0x34e   : > { %3565 = vmatpush1.bf16.msra.mxu0 %v5472_v8  ;;  %3635 = vmatprep.mubr.bf16.mxu1 %v6818_v4  ;;  %v5526_v8 = vld [vmem:[#allocation11 + $0x5a0] ss:$16 sps:$4 sm:$0xff]  }
 0x34f   : > { %3606 = vmatpush1.bf16.msra.mxu1 %v5475_v9  ;;  %3566 = vmatprep.subr.bf16.mxu0 %v5480_v10  ;;  %v5529_v9 = vld [vmem:[#allocation11 + $0x7a0] ss:$16 sps:$4 sm:$0xff]   ;;  %v5534_v10 = vld [vmem:[#allocation11 + $0x584] ss:$16 sps:$4 sm:$0xff]  }
 0x350   : > { %3607 = vmatprep.subr.bf16.mxu1 %v5483_v11  ;;  %v5537_v11 = vld [vmem:[#allocation11 + $0x784] ss:$16 sps:$4 sm:$0xff]  }
 0x352   : > { %3567 = vmatpush1.bf16.msra.mxu0 %v5478_v18  ;;  %v5538_v18 = vld [vmem:[#allocation11 + $0x560] ss:$16 sps:$4 sm:$0xff]  }
 0x353   : > { %3608 = vmatpush1.bf16.msra.mxu1 %v5481_v19  ;;  %3568 = vmatprep.subr.bf16.mxu0 %v5486_v20  ;;  %v5541_v19 = vld [vmem:[#allocation11 + $0x760] ss:$16 sps:$4 sm:$0xff]   ;;  %v5546_v20 = vld [vmem:[#allocation11 + $0x544] ss:$16 sps:$4 sm:$0xff]  }
 0x354   : > { %3609 = vmatprep.subr.bf16.mxu1 %v5489_v21  ;;  %v5549_v21 = vld [vmem:[#allocation11 + $0x744] ss:$16 sps:$4 sm:$0xff]  }
 0x356   : > { %3569 = vmatpush1.bf16.msra.mxu0 %v5484_v24  ;;  %v5552_v24 = vld [vmem:[#allocation11 + $0x524] ss:$16 sps:$4 sm:$0xff]  }
 0x357   : > { %3610 = vmatpush1.bf16.msra.mxu1 %v5487_v25  ;;  %3570 = vmatprep.subr.bf16.mxu0 %v5492_v26  ;;  %v5555_v25 = vld [vmem:[#allocation11 + $0x724] ss:$16 sps:$4 sm:$0xff]   ;;  %v5550_v26 = vld [vmem:[#allocation11 + $0x520] ss:$16 sps:$4 sm:$0xff]  }
 0x358   : > { %3611 = vmatprep.subr.bf16.mxu1 %v5495_v27  ;;  %v5553_v27 = vld [vmem:[#allocation11 + $0x720] ss:$16 sps:$4 sm:$0xff]  }
 0x35a   : > { %3571 = vmatpush1.bf16.msra.mxu0 %v5490_v32  ;;  %v5556_v32 = vld [vmem:[#allocation11 + $0x500] ss:$16 sps:$4 sm:$0xff]  }
 0x35b   : > { %3612 = vmatpush1.bf16.msra.mxu1 %v5493_v33  ;;  %3572 = vmatprep.subr.bf16.mxu0 %v5498_v34  ;;  %v5559_v33 = vld [vmem:[#allocation11 + $0x700] ss:$16 sps:$4 sm:$0xff]   ;;  %v5564_v34 = vld [vmem:[#allocation11 + $0xec] ss:$16 sps:$4 sm:$0xff]  }
 0x35c   : > { %3613 = vmatprep.subr.bf16.mxu1 %v5501_v35  ;;  %v5567_v35 = vld [vmem:[#allocation11 + $0x2ec] ss:$16 sps:$4 sm:$0xff]  }
 0x35e   : > { %3573 = vmatpush1.bf16.msra.mxu0 %v5496_v37  ;;  %v6828_v37 = vpack.c.bf16 %v6812_v57, %v6812_v57  ;;  %v5597_v57 = vld [vmem:[#allocation11 + $0x24c] ss:$16 sps:$4 sm:$0xff]  }
 0x35f   : > { %3614 = vmatpush1.bf16.msra.mxu1 %v5499_v38  ;;  %3574 = vmatprep.subr.bf16.mxu0 %v5504_v39  ;;  %v5562_v38 = vld [vmem:[#allocation11 + $0xe8] ss:$16 sps:$4 sm:$0xff]  }
 0x360   : > { %3615 = vmatprep.subr.bf16.mxu1 %v5507_v40  ;;  %v5565_v39 = vld [vmem:[#allocation11 + $0x2e8] ss:$16 sps:$4 sm:$0xff]   ;;  %v5570_v40 = vld [vmem:[#allocation11 + $0xcc] ss:$16 sps:$4 sm:$0xff]  }
 0x362   : > { %3575 = vmatpush1.bf16.msra.mxu0 %v5502_v42  ;;  %v5568_v42 = vld [vmem:[#allocation11 + $0xc8] ss:$16 sps:$4 sm:$0xff]  }
 0x363   : > { %3616 = vmatpush1.bf16.msra.mxu1 %v5505_v44  ;;  %3576 = vmatprep.subr.bf16.mxu0 %v5510_v45  ;;  %v5576_v44 = vld [vmem:[#allocation11 + $0xac] ss:$16 sps:$4 sm:$0xff]  }
 0x364   : > { %3617 = vmatprep.subr.bf16.mxu1 %v5513_v46  ;;  %v5579_v45 = vld [vmem:[#allocation11 + $0x2ac] ss:$16 sps:$4 sm:$0xff]   ;;  %v5574_v46 = vld [vmem:[#allocation11 + $0xa8] ss:$16 sps:$4 sm:$0xff]  }
 0x366   : > { %3577 = vmatpush1.bf16.msra.mxu0 %v5508_v48  ;;  %v5582_v48 = vld [vmem:[#allocation11 + $0x8c] ss:$16 sps:$4 sm:$0xff]  }
 0x367   : > { %3618 = vmatpush1.bf16.msra.mxu1 %v5511_v51  ;;  %3578 = vmatprep.subr.bf16.mxu0 %v5516_v53  ;;  %v5583_v51 = vld [vmem:[#allocation11 + $0x288] ss:$16 sps:$4 sm:$0xff]   ;;  %v5588_v53 = vld [vmem:[#allocation11 + $0x6c] ss:$16 sps:$4 sm:$0xff]  }
 0x368   : > { %3619 = vmatprep.subr.bf16.mxu1 %v5519_v54  ;;  %v5591_v54 = vld [vmem:[#allocation11 + $0x26c] ss:$16 sps:$4 sm:$0xff]  }
 0x36a   : > { %3579 = vmatpush2.bf16.msra.mxu0 %v5514_v58  ;;  %v5592_v58 = vld [vmem:[#allocation11 + $0x48] ss:$16 sps:$4 sm:$0xff]  }
 0x36b   : > { %3620 = vmatpush2.bf16.msra.mxu1 %v5517_v0  ;;  %3580 = vmatprep.subr.bf16.mxu0 %v5522_v2  ;;  %v5600_v0 = vld [vmem:[#allocation11 + $0x2c] ss:$16 sps:$4 sm:$0xff]  }
 0x36c   : > { %3621 = vmatprep.subr.bf16.mxu1 %v5525_v3  ;;  %v5603_v2 = vld [vmem:[#allocation11 + $0x22c] ss:$16 sps:$4 sm:$0xff]   ;;  %v5598_v3 = vld [vmem:[#allocation11 + $0x28] ss:$16 sps:$4 sm:$0xff]  }
 0x36e   : > { %3581 = vmatpush2.bf16.msra.mxu0 %v5520_v5  ;;  %v5601_v5 = vld [vmem:[#allocation11 + $0x228] ss:$16 sps:$4 sm:$0xff]  }
 0x36f   : > { %3622 = vmatpush2.bf16.msra.mxu1 %v5523_v52  ;;  %3582 = vmatprep.subr.bf16.mxu0 %v5528_v6  ;;  %v5606_v52 = vld [vmem:[#allocation11 + $0xc] ss:$16 sps:$4 sm:$0xff]  }
 0x370   : > { %3623 = vmatprep.subr.bf16.mxu1 %v5531_v7  ;;  %v5609_v6 = vld [vmem:[#allocation11 + $0x20c] ss:$16 sps:$4 sm:$0xff]   ;;  %v5604_v7 = vld [vmem:[#allocation11 + $0x8] ss:$16 sps:$4 sm:$0xff]  }
 0x372   : > { %3583 = vmatpush2.bf16.msra.mxu0 %v5526_v8  ;;  %v5607_v8 = vld [vmem:[#allocation11 + $0x208] ss:$16 sps:$4 sm:$0xff]  }
 0x373   : > { %3624 = vmatpush2.bf16.msra.mxu1 %v5529_v9  ;;  %3584 = vmatprep.subr.bf16.mxu0 %v5534_v10  ;;  %v5612_v9 = vld [vmem:[#allocation11 + $0x1ec] ss:$16 sps:$4 sm:$0xff]  }
 0x374   : > { %3625 = vmatprep.subr.bf16.mxu1 %v5537_v11  ;;  %v5615_v10 = vld [vmem:[#allocation11 + $0x3ec] ss:$16 sps:$4 sm:$0xff]   ;;  %v5610_v11 = vld [vmem:[#allocation11 + $0x1e8] ss:$16 sps:$4 sm:$0xff]  }
 0x376   : > { %3585 = vmatpush2.bf16.msra.mxu0 %v5532_v12  ;;  %v5613_v12 = vld [vmem:[#allocation11 + $0x3e8] ss:$16 sps:$4 sm:$0xff]  }
 0x377   : > { %3626 = vmatpush2.bf16.msra.mxu1 %v5535_v13  ;;  %3586 = vmatprep.subr.bf16.mxu0 %v5540_v14  ;;  %v5618_v13 = vld [vmem:[#allocation11 + $0x1cc] ss:$16 sps:$4 sm:$0xff]  }
 0x378   : > { %3627 = vmatprep.subr.bf16.mxu1 %v5543_v1  ;;  %v5621_v14 = vld [vmem:[#allocation11 + $0x3cc] ss:$16 sps:$4 sm:$0xff]   ;;  %v5616_v1 = vld [vmem:[#allocation11 + $0x1c8] ss:$16 sps:$4 sm:$0xff]  }
 0x37a   : > { %3587 = vmatpush2.bf16.msra.mxu0 %v5538_v18  ;;  %v5619_v18 = vld [vmem:[#allocation11 + $0x3c8] ss:$16 sps:$4 sm:$0xff]  }
 0x37b   : > { %3628 = vmatpush2.bf16.msra.mxu1 %v5541_v19  ;;  %3588 = vmatprep.subr.bf16.mxu0 %v5546_v20  ;;  %v5624_v19 = vld [vmem:[#allocation11 + $0x1ac] ss:$16 sps:$4 sm:$0xff]  }
 0x37c   : > { %3629 = vmatprep.subr.bf16.mxu1 %v5549_v21  ;;  %v5627_v20 = vld [vmem:[#allocation11 + $0x3ac] ss:$16 sps:$4 sm:$0xff]   ;;  %v5622_v21 = vld [vmem:[#allocation11 + $0x1a8] ss:$16 sps:$4 sm:$0xff]  }
 0x37e   : > { %3589 = vmatpush2.bf16.msra.mxu0 %v5544_v22  ;;  %v5625_v22 = vld [vmem:[#allocation11 + $0x3a8] ss:$16 sps:$4 sm:$0xff]  }
 0x37f   : > { %3630 = vmatpush2.bf16.msra.mxu1 %v5547_v23  ;;  %3590 = vmatprep.subr.bf16.mxu0 %v5552_v24  ;;  %v5630_v23 = vld [vmem:[#allocation11 + $0x18c] ss:$16 sps:$4 sm:$0xff]  }
 0x380   : > { %3631 = vmatprep.subr.bf16.mxu1 %v5555_v25  ;;  %v5633_v24 = vld [vmem:[#allocation11 + $0x38c] ss:$16 sps:$4 sm:$0xff]   ;;  %v5628_v25 = vld [vmem:[#allocation11 + $0x188] ss:$16 sps:$4 sm:$0xff]  }
 0x382   : > { %3591 = vmatpush2.bf16.msra.mxu0 %v5550_v26  ;;  %v5631_v26 = vld [vmem:[#allocation11 + $0x388] ss:$16 sps:$4 sm:$0xff]  }
 0x383   : > { %3632 = vmatpush2.bf16.msra.mxu1 %v5553_v27  ;;  %3592 = vmatprep.subr.bf16.mxu0 %v5558_v17  ;;  %v5636_v27 = vld [vmem:[#allocation11 + $0x16c] ss:$16 sps:$4 sm:$0xff]  }
 0x384   : > { %3633 = vmatprep.subr.bf16.mxu1 %v5561_v30  ;;  %v5639_v17 = vld [vmem:[#allocation11 + $0x36c] ss:$16 sps:$4 sm:$0xff]   ;;  %v5634_v30 = vld [vmem:[#allocation11 + $0x168] ss:$16 sps:$4 sm:$0xff]  }
 0x386   : > { %3593 = vmatpush2.bf16.msra.mxu0 %v5556_v32  ;;  %v5637_v32 = vld [vmem:[#allocation11 + $0x368] ss:$16 sps:$4 sm:$0xff]  }
 0x387   : > { %3634 = vmatpush2.bf16.msra.mxu1 %v5559_v33  ;;  %3644 = vmatprep.subr.bf16.mxu0 %v5564_v34  ;;  %v5642_v33 = vld [vmem:[#allocation11 + $0x14c] ss:$16 sps:$4 sm:$0xff]  }
 0x388   : > { %3685 = vmatprep.subr.bf16.mxu1 %v5567_v35  ;;  %v5645_v34 = vld [vmem:[#allocation11 + $0x34c] ss:$16 sps:$4 sm:$0xff]   ;;  %v5640_v35 = vld [vmem:[#allocation11 + $0x148] ss:$16 sps:$4 sm:$0xff]  }
 0x389   : > { %3595 = vmatmul.mubr.bf16.vlgmr.msra.gmra.mxu0 %v6824_v36 }
 0x38a   : > { %3636 = vmatmul.mubr.bf16.vlgmr.msra.gmra.mxu1 %v6828_v37  ;;  %3645 = vmatpush1.bf16.msra.mxu0 %v5562_v38  ;;  %v5643_v38 = vld [vmem:[#allocation11 + $0x348] ss:$16 sps:$4 sm:$0xff]  }
 0x38b   : > { %3686 = vmatpush1.bf16.msra.mxu1 %v5565_v39  ;;  %3646 = vmatprep.subr.bf16.mxu0 %v5570_v40  ;;  %v5648_v39 = vld [vmem:[#allocation11 + $0x12c] ss:$16 sps:$4 sm:$0xff]  }
 0x38c   : > { %3687 = vmatprep.subr.bf16.mxu1 %v5573_v41  ;;  %3676 = vmatprep.mubr.bf16.mxu0 %v6784_v56  ;;  %v5589_v56 = vld [vmem:[#allocation11 + $0x268] ss:$16 sps:$4 sm:$0xff]   ;;  %v5651_v40 = vld [vmem:[#allocation11 + $0x32c] ss:$16 sps:$4 sm:$0xff]  }
 0x38d   : > { %3717 = vmatprep.mubr.bf16.mxu1 %v6787_v60  ;;  %v5594_v60 = vld [vmem:[#allocation11 + $0x4c] ss:$16 sps:$4 sm:$0xff]   ;;  %v5646_v41 = vld [vmem:[#allocation11 + $0x128] ss:$16 sps:$4 sm:$0xff]  }
 0x38e   : > { %3647 = vmatpush1.bf16.msra.mxu0 %v5568_v42  ;;  %v5649_v42 = vld [vmem:[#allocation11 + $0x328] ss:$16 sps:$4 sm:$0xff]  }
 0x38f   : > { %3688 = vmatpush1.bf16.msra.mxu1 %v5571_v43  ;;  %3648 = vmatprep.subr.bf16.mxu0 %v5576_v44  ;;  %v5654_v43 = vld [vmem:[#allocation11 + $0x10c] ss:$16 sps:$4 sm:$0xff]  }
 0x390   : > { %3689 = vmatprep.subr.bf16.mxu1 %v5579_v45  ;;  %v5657_v44 = vld [vmem:[#allocation11 + $0x30c] ss:$16 sps:$4 sm:$0xff]   ;;  %v5652_v45 = vld [vmem:[#allocation11 + $0x108] ss:$16 sps:$4 sm:$0xff]  }
 0x392   : > { %3649 = vmatpush1.bf16.msra.mxu0 %v5574_v46  ;;  %v5655_v46 = vld [vmem:[#allocation11 + $0x308] ss:$16 sps:$4 sm:$0xff]  }
 0x393   : > { %3690 = vmatpush1.bf16.msra.mxu1 %v5577_v47  ;;  %3650 = vmatprep.subr.bf16.mxu0 %v5582_v48  ;;  %v5660_v47 = vld [vmem:[#allocation11 + $0x4ec] ss:$16 sps:$4 sm:$0xff]  }
 0x394   : > { %3691 = vmatprep.subr.bf16.mxu1 %v5585_v49  ;;  %v5663_v48 = vld [vmem:[#allocation11 + $0x6ec] ss:$16 sps:$4 sm:$0xff]   ;;  %v5658_v49 = vld [vmem:[#allocation11 + $0x4e8] ss:$16 sps:$4 sm:$0xff]  }
 0x396   : > { %3651 = vmatpush1.bf16.msra.mxu0 %v5580_v50  ;;  %v5661_v50 = vld [vmem:[#allocation11 + $0x6e8] ss:$16 sps:$4 sm:$0xff]  }
 0x397   : > { %3692 = vmatpush1.bf16.msra.mxu1 %v5583_v51  ;;  %3652 = vmatprep.subr.bf16.mxu0 %v5588_v53  ;;  %v5666_v51 = vld [vmem:[#allocation11 + $0x4cc] ss:$16 sps:$4 sm:$0xff]  }
 0x398   : > { %3693 = vmatprep.subr.bf16.mxu1 %v5591_v54  ;;  %v5669_v53 = vld [vmem:[#allocation11 + $0x6cc] ss:$16 sps:$4 sm:$0xff]   ;;  %v5664_v54 = vld [vmem:[#allocation11 + $0x4c8] ss:$16 sps:$4 sm:$0xff]  }
 0x39a   : > { %3653 = vmatpush1.bf16.msra.mxu0 %v5586_v55  ;;  %v5667_v55 = vld [vmem:[#allocation11 + $0x6c8] ss:$16 sps:$4 sm:$0xff]  }
 0x39b   : > { %3694 = vmatpush1.bf16.msra.mxu1 %v5589_v56  ;;  %3654 = vmatprep.subr.bf16.mxu0 %v5594_v60  ;;  %v5672_v56 = vld [vmem:[#allocation11 + $0x4ac] ss:$16 sps:$4 sm:$0xff]  }
 0x39c   : > { %3695 = vmatprep.subr.bf16.mxu1 %v5597_v57  ;;  %v5675_v60 = vld [vmem:[#allocation11 + $0x6ac] ss:$16 sps:$4 sm:$0xff]   ;;  %v5670_v57 = vld [vmem:[#allocation11 + $0x4a8] ss:$16 sps:$4 sm:$0xff]  }
 0x39e   : > { %3655 = vmatpush1.bf16.msra.mxu0 %v5592_v58  ;;  %v5673_v58 = vld [vmem:[#allocation11 + $0x6a8] ss:$16 sps:$4 sm:$0xff]  }
 0x39f   : > { %3696 = vmatpush1.bf16.msra.mxu1 %v5595_v63  ;;  %3656 = vmatprep.subr.bf16.mxu0 %v5600_v0  ;;  %v5678_v63 = vld [vmem:[#allocation11 + $0x48c] ss:$16 sps:$4 sm:$0xff]   ;;  %v5676_v0 = vld [vmem:[#allocation11 + $0x488] ss:$16 sps:$4 sm:$0xff]  }
 0x3a0   : > { %3697 = vmatprep.subr.bf16.mxu1 %v5603_v2  ;;  %v5684_v2 = vld [vmem:[#allocation11 + $0x46c] ss:$16 sps:$4 sm:$0xff]  }
 0x3a2   : > { %3657 = vmatpush1.bf16.msra.mxu0 %v5598_v3  ;;  %v5687_v3 = vld [vmem:[#allocation11 + $0x66c] ss:$16 sps:$4 sm:$0xff]  }
 0x3a3   : > { %3698 = vmatpush1.bf16.msra.mxu1 %v5601_v5  ;;  %3658 = vmatprep.subr.bf16.mxu0 %v5606_v52  ;;  %v5682_v5 = vld [vmem:[#allocation11 + $0x468] ss:$16 sps:$4 sm:$0xff]  }
 0x3a4   : > { %3699 = vmatprep.subr.bf16.mxu1 %v5609_v6  ;;  %v5685_v52 = vld [vmem:[#allocation11 + $0x668] ss:$16 sps:$4 sm:$0xff]   ;;  %v5690_v6 = vld [vmem:[#allocation11 + $0x44c] ss:$16 sps:$4 sm:$0xff]  }
 0x3a6   : > { %3659 = vmatpush1.bf16.msra.mxu0 %v5604_v7  ;;  %v5691_v7 = vld [vmem:[#allocation11 + $0x648] ss:$16 sps:$4 sm:$0xff]  }
 0x3a7   : > { %3700 = vmatpush1.bf16.msra.mxu1 %v5607_v8  ;;  %3660 = vmatprep.subr.bf16.mxu0 %v5612_v9  ;;  %v5696_v8 = vld [vmem:[#allocation11 + $0x42c] ss:$16 sps:$4 sm:$0xff]  }
 0x3a8   : > { %3701 = vmatprep.subr.bf16.mxu1 %v5615_v10  ;;  %v5699_v9 = vld [vmem:[#allocation11 + $0x62c] ss:$16 sps:$4 sm:$0xff]   ;;  %v5694_v10 = vld [vmem:[#allocation11 + $0x428] ss:$16 sps:$4 sm:$0xff]  }
 0x3aa   : > { %3661 = vmatpush2.bf16.msra.mxu0 %v5610_v11  ;;  %v5697_v11 = vld [vmem:[#allocation11 + $0x628] ss:$16 sps:$4 sm:$0xff]  }
 0x3ab   : > { %3702 = vmatpush2.bf16.msra.mxu1 %v5613_v12  ;;  %3662 = vmatprep.subr.bf16.mxu0 %v5618_v13  ;;  %v5702_v12 = vld [vmem:[#allocation11 + $0x40c] ss:$16 sps:$4 sm:$0xff]  }
 0x3ac   : > { %3703 = vmatprep.subr.bf16.mxu1 %v5621_v14  ;;  %v5705_v13 = vld [vmem:[#allocation11 + $0x60c] ss:$16 sps:$4 sm:$0xff]   ;;  %v5700_v14 = vld [vmem:[#allocation11 + $0x408] ss:$16 sps:$4 sm:$0xff]  }
 0x3ae   : > { %3663 = vmatpush2.bf16.msra.mxu0 %v5616_v1  ;;  %v5703_v1 = vld [vmem:[#allocation11 + $0x608] ss:$16 sps:$4 sm:$0xff]  }
 0x3af   : > { %3704 = vmatpush2.bf16.msra.mxu1 %v5619_v18  ;;  %3664 = vmatprep.subr.bf16.mxu0 %v5624_v19  ;;  %v5708_v18 = vld [vmem:[#allocation11 + $0x5ec] ss:$16 sps:$4 sm:$0xff]  }
 0x3b0   : > { %3705 = vmatprep.subr.bf16.mxu1 %v5627_v20  ;;  %v5711_v19 = vld [vmem:[#allocation11 + $0x7ec] ss:$16 sps:$4 sm:$0xff]   ;;  %v5706_v20 = vld [vmem:[#allocation11 + $0x5e8] ss:$16 sps:$4 sm:$0xff]  }
 0x3b2   : > { %3665 = vmatpush2.bf16.msra.mxu0 %v5622_v21  ;;  %v5709_v21 = vld [vmem:[#allocation11 + $0x7e8] ss:$16 sps:$4 sm:$0xff]  }
 0x3b3   : > { %3706 = vmatpush2.bf16.msra.mxu1 %v5625_v22  ;;  %3666 = vmatprep.subr.bf16.mxu0 %v5630_v23  ;;  %v5714_v22 = vld [vmem:[#allocation11 + $0x5cc] ss:$16 sps:$4 sm:$0xff]  }
 0x3b4   : > { %3707 = vmatprep.subr.bf16.mxu1 %v5633_v24  ;;  %v5717_v23 = vld [vmem:[#allocation11 + $0x7cc] ss:$16 sps:$4 sm:$0xff]   ;;  %v5712_v24 = vld [vmem:[#allocation11 + $0x5c8] ss:$16 sps:$4 sm:$0xff]  }
 0x3b6   : > { %3667 = vmatpush2.bf16.msra.mxu0 %v5628_v25  ;;  %v5715_v25 = vld [vmem:[#allocation11 + $0x7c8] ss:$16 sps:$4 sm:$0xff]  }
 0x3b7   : > { %3708 = vmatpush2.bf16.msra.mxu1 %v5631_v26  ;;  %3668 = vmatprep.subr.bf16.mxu0 %v5636_v27  ;;  %v5720_v26 = vld [vmem:[#allocation11 + $0x5ac] ss:$16 sps:$4 sm:$0xff]  }
 0x3b8   : > { %3709 = vmatprep.subr.bf16.mxu1 %v5639_v17  ;;  %v5723_v27 = vld [vmem:[#allocation11 + $0x7ac] ss:$16 sps:$4 sm:$0xff]   ;;  %v5718_v17 = vld [vmem:[#allocation11 + $0x5a8] ss:$16 sps:$4 sm:$0xff]  }
 0x3ba   : > { %3669 = vmatpush2.bf16.msra.mxu0 %v5634_v30  ;;  %v5721_v30 = vld [vmem:[#allocation11 + $0x7a8] ss:$16 sps:$4 sm:$0xff]  }
 0x3bb   : > { %3710 = vmatpush2.bf16.msra.mxu1 %v5637_v32  ;;  %3670 = vmatprep.subr.bf16.mxu0 %v5642_v33  ;;  %v5726_v32 = vld [vmem:[#allocation11 + $0x58c] ss:$16 sps:$4 sm:$0xff]  }
 0x3bc   : > { %3711 = vmatprep.subr.bf16.mxu1 %v5645_v34  ;;  %v5729_v33 = vld [vmem:[#allocation11 + $0x78c] ss:$16 sps:$4 sm:$0xff]   ;;  %v5724_v34 = vld [vmem:[#allocation11 + $0x588] ss:$16 sps:$4 sm:$0xff]  }
 0x3be   : > { %3671 = vmatpush2.bf16.msra.mxu0 %v5640_v35  ;;  %v5727_v35 = vld [vmem:[#allocation11 + $0x788] ss:$16 sps:$4 sm:$0xff]  }
 0x3bf   : > { %3712 = vmatpush2.bf16.msra.mxu1 %v5643_v38  ;;  %3672 = vmatprep.subr.bf16.mxu0 %v5648_v39  ;;  %v5732_v38 = vld [vmem:[#allocation11 + $0x56c] ss:$16 sps:$4 sm:$0xff]  }
 0x3c0   : > { %3713 = vmatprep.subr.bf16.mxu1 %v5651_v40  ;;  %v5735_v39 = vld [vmem:[#allocation11 + $0x76c] ss:$16 sps:$4 sm:$0xff]   ;;  %v5730_v40 = vld [vmem:[#allocation11 + $0x568] ss:$16 sps:$4 sm:$0xff]  }
 0x3c2   : > { %3673 = vmatpush2.bf16.msra.mxu0 %v5646_v41  ;;  %v5733_v41 = vld [vmem:[#allocation11 + $0x768] ss:$16 sps:$4 sm:$0xff]  }
 0x3c3   : > { %3714 = vmatpush2.bf16.msra.mxu1 %v5649_v42  ;;  %3674 = vmatprep.subr.bf16.mxu0 %v5654_v43  ;;  %v5738_v42 = vld [vmem:[#allocation11 + $0x54c] ss:$16 sps:$4 sm:$0xff]  }
 0x3c4   : > { %3715 = vmatprep.subr.bf16.mxu1 %v5657_v44  ;;  %v5741_v43 = vld [vmem:[#allocation11 + $0x74c] ss:$16 sps:$4 sm:$0xff]   ;;  %v5736_v44 = vld [vmem:[#allocation11 + $0x548] ss:$16 sps:$4 sm:$0xff]  }
 0x3c6   : > { %3675 = vmatpush2.bf16.msra.mxu0 %v5652_v45  ;;  %v5739_v45 = vld [vmem:[#allocation11 + $0x748] ss:$16 sps:$4 sm:$0xff]  }
 0x3c7   : > { %3716 = vmatpush2.bf16.msra.mxu1 %v5655_v46  ;;  %3726 = vmatprep.subr.bf16.mxu0 %v5660_v47  ;;  %v5744_v46 = vld [vmem:[#allocation11 + $0x52c] ss:$16 sps:$4 sm:$0xff]  }
 0x3c8   : > { %3767 = vmatprep.subr.bf16.mxu1 %v5663_v48  ;;  %v5747_v47 = vld [vmem:[#allocation11 + $0x72c] ss:$16 sps:$4 sm:$0xff]   ;;  %v5742_v48 = vld [vmem:[#allocation11 + $0x528] ss:$16 sps:$4 sm:$0xff]  }
 0x3c9   : > { %3677 = vmatmul.mubr.bf16.vlgmr.msra.gmra.mxu0 %v6789_v61  ;;  %v5681_v61 = vld [vmem:[#allocation11 + $0x68c] ss:$16 sps:$4 sm:$0xff]  }
 0x3ca   : > { %3718 = vmatmul.mubr.bf16.vlgmr.msra.gmra.mxu1 %v6791_v62  ;;  %3727 = vmatpush1.bf16.msra.mxu0 %v5658_v49  ;;  %v5679_v62 = vld [vmem:[#allocation11 + $0x688] ss:$16 sps:$4 sm:$0xff]  }
 0x3cb   : > { %3768 = vmatpush1.bf16.msra.mxu1 %v5661_v50  ;;  %3728 = vmatprep.subr.bf16.mxu0 %v5666_v51  ;;  %v5745_v49 = vld [vmem:[#allocation11 + $0x728] ss:$16 sps:$4 sm:$0xff]   ;;  %v5750_v50 = vld [vmem:[#allocation11 + $0x50c] ss:$16 sps:$4 sm:$0xff]  }
 0x3cc   : > { %3769 = vmatprep.subr.bf16.mxu1 %v5669_v53  ;;  %3758 = vmatprep.mubr.bf16.mxu0 %v6814_v59  ;;  %v5693_v59 = vld [vmem:[#allocation11 + $0x64c] ss:$16 sps:$4 sm:$0xff]   ;;  %v5748_v53 = vld [vmem:[#allocation11 + $0x508] ss:$16 sps:$4 sm:$0xff]  }
 0x3cd   : > { %3799 = vmatprep.mubr.bf16.mxu1 %v6818_v4  ;;  %v5688_v4 = vld [vmem:[#allocation11 + $0x448] ss:$16 sps:$4 sm:$0xff]   ;;  %v5753_v51 = vld [vmem:[#allocation11 + $0x70c] ss:$16 sps:$4 sm:$0xff]  }
 0x3ce   : > { %3729 = vmatpush1.bf16.msra.mxu0 %v5664_v54  ;;  %v5751_v54 = vld [vmem:[#allocation11 + $0x708] ss:$16 sps:$4 sm:$0xff]  }
 0x3cf   : > { %3770 = vmatpush1.bf16.msra.mxu1 %v5667_v55  ;;  %3730 = vmatprep.subr.bf16.mxu0 %v5672_v56  ;;  %v5756_v55 = vld [vmem:[#allocation14 + $0x74] ss:$8 sps:$4 sm:$0xff]   ;;  %v5754_v56 = vld [vmem:[#allocation14 + $0x70] ss:$8 sps:$4 sm:$0xff]  }
 0x3d0   : > { %3771 = vmatprep.subr.bf16.mxu1 %v5675_v60  ;;  %v5759_v60 = vld [vmem:[#allocation14 + $0x64] ss:$8 sps:$4 sm:$0xff]  }
 0x3d2   : > { %3731 = vmatpush1.bf16.msra.mxu0 %v5670_v57 }
 0x3d3   : > { %3772 = vmatpush1.bf16.msra.mxu1 %v5673_v58  ;;  %3732 = vmatprep.subr.bf16.mxu0 %v5678_v63  ;;  %v5757_v63 = vld [vmem:[#allocation14 + $0x60] ss:$8 sps:$4 sm:$0xff]  }
 0x3d4   : > { %3773 = vmatprep.subr.bf16.mxu1 %v5681_v61 }
 0x3d6   : > { %3733 = vmatpush1.bf16.msra.mxu0 %v5676_v0 }
 0x3d7   : > { %3774 = vmatpush1.bf16.msra.mxu1 %v5679_v62  ;;  %3734 = vmatprep.subr.bf16.mxu0 %v5684_v2  ;;  %v5762_v62 = vld [vmem:[#allocation14 + $0x54] ss:$8 sps:$4 sm:$0xff]  }
 0x3d8   : > { %3775 = vmatprep.subr.bf16.mxu1 %v5687_v3 }
 0x3da   : > { %3735 = vmatpush1.bf16.msra.mxu0 %v5682_v5  ;;  %v5760_v5 = vld [vmem:[#allocation14 + $0x50] ss:$8 sps:$4 sm:$0xff]  }
 0x3db   : > { %3776 = vmatpush1.bf16.msra.mxu1 %v5685_v52  ;;  %3736 = vmatprep.subr.bf16.mxu0 %v5690_v6 }
 0x3dc   : > { %3777 = vmatprep.subr.bf16.mxu1 %v5693_v59  ;;  %v5765_v59 = vld [vmem:[#allocation14 + $0x44] ss:$8 sps:$4 sm:$0xff]  }
 0x3de   : > { %3737 = vmatpush1.bf16.msra.mxu0 %v5688_v4  ;;  %v5802_v4 = vld [vmem:[#allocation14 + $0x170] ss:$8 sps:$4 sm:$0xff]  }
 0x3df   : > { %3778 = vmatpush1.bf16.msra.mxu1 %v5691_v7  ;;  %3738 = vmatprep.subr.bf16.mxu0 %v5696_v8  ;;  %v5807_v7 = vld [vmem:[#allocation14 + $0x164] ss:$8 sps:$4 sm:$0xff]   ;;  %v5805_v8 = vld [vmem:[#allocation14 + $0x160] ss:$8 sps:$4 sm:$0xff]  }
 0x3e0   : > { %3779 = vmatprep.subr.bf16.mxu1 %v5699_v9  ;;  %v5768_v9 = vld [vmem:[#allocation14 + $0x34] ss:$8 sps:$4 sm:$0xff]  }
 0x3e2   : > { %3739 = vmatpush1.bf16.msra.mxu0 %v5694_v10  ;;  %v5810_v10 = vld [vmem:[#allocation14 + $0x154] ss:$8 sps:$4 sm:$0xff]  }
 0x3e3   : > { %3780 = vmatpush1.bf16.msra.mxu1 %v5697_v11  ;;  %3740 = vmatprep.subr.bf16.mxu0 %v5702_v12  ;;  %v5766_v11 = vld [vmem:[#allocation14 + $0x30] ss:$8 sps:$4 sm:$0xff]  }
 0x3e4   : > { %3781 = vmatprep.subr.bf16.mxu1 %v5705_v13  ;;  %v5808_v12 = vld [vmem:[#allocation14 + $0x150] ss:$8 sps:$4 sm:$0xff]   ;;  %v5771_v13 = vld [vmem:[#allocation14 + $0x24] ss:$8 sps:$4 sm:$0xff]  }
 0x3e6   : > { %3741 = vmatpush1.bf16.msra.mxu0 %v5700_v14  ;;  %v5813_v14 = vld [vmem:[#allocation14 + $0x144] ss:$8 sps:$4 sm:$0xff]  }
 0x3e7   : > { %3782 = vmatpush1.bf16.msra.mxu1 %v5703_v1  ;;  %3742 = vmatprep.subr.bf16.mxu0 %v5708_v18  ;;  %v5769_v1 = vld [vmem:[#allocation14 + $0x20] ss:$8 sps:$4 sm:$0xff]  }
 0x3e8   : > { %3783 = vmatprep.subr.bf16.mxu1 %v5711_v19  ;;  %v5811_v18 = vld [vmem:[#allocation14 + $0x140] ss:$8 sps:$4 sm:$0xff]   ;;  %v5774_v19 = vld [vmem:[#allocation14 + $0x14] ss:$8 sps:$4 sm:$0xff]  }
 0x3ea   : > { %3743 = vmatpush2.bf16.msra.mxu0 %v5706_v20  ;;  %v5816_v20 = vld [vmem:[#allocation14 + $0x134] ss:$8 sps:$4 sm:$0xff]  }
 0x3eb   : > { %3784 = vmatpush2.bf16.msra.mxu1 %v5709_v21  ;;  %3744 = vmatprep.subr.bf16.mxu0 %v5714_v22  ;;  %v5772_v21 = vld [vmem:[#allocation14 + $0x10] ss:$8 sps:$4 sm:$0xff]  }
 0x3ec   : > { %3785 = vmatprep.subr.bf16.mxu1 %v5717_v23  ;;  %v5814_v22 = vld [vmem:[#allocation14 + $0x130] ss:$8 sps:$4 sm:$0xff]   ;;  %v5777_v23 = vld [vmem:[#allocation14 + $0x4] ss:$8 sps:$4 sm:$0xff]  }
 0x3ee   : > { %3745 = vmatpush2.bf16.msra.mxu0 %v5712_v24  ;;  %v5819_v24 = vld [vmem:[#allocation14 + $0x124] ss:$8 sps:$4 sm:$0xff]  }
 0x3ef   : > { %3786 = vmatpush2.bf16.msra.mxu1 %v5715_v25  ;;  %3746 = vmatprep.subr.bf16.mxu0 %v5720_v26  ;;  %v5775_v25 = vld [vmem:[#allocation14] ss:$8 sps:$4 sm:$0xff]  }
 0x3f0   : > { %3787 = vmatprep.subr.bf16.mxu1 %v5723_v27  ;;  %v5817_v26 = vld [vmem:[#allocation14 + $0x120] ss:$8 sps:$4 sm:$0xff]   ;;  %v5780_v27 = vld [vmem:[#allocation14 + $0xf4] ss:$8 sps:$4 sm:$0xff]  }
 0x3f2   : > { %3747 = vmatpush2.bf16.msra.mxu0 %v5718_v17  ;;  %v5822_v17 = vld [vmem:[#allocation14 + $0x114] ss:$8 sps:$4 sm:$0xff]  }
 0x3f3   : > { %3788 = vmatpush2.bf16.msra.mxu1 %v5721_v30  ;;  %3748 = vmatprep.subr.bf16.mxu0 %v5726_v32  ;;  %v5778_v30 = vld [vmem:[#allocation14 + $0xf0] ss:$8 sps:$4 sm:$0xff]  }
 0x3f4   : > { %3789 = vmatprep.subr.bf16.mxu1 %v5729_v33  ;;  %v5820_v32 = vld [vmem:[#allocation14 + $0x110] ss:$8 sps:$4 sm:$0xff]   ;;  %v5783_v33 = vld [vmem:[#allocation14 + $0xe4] ss:$8 sps:$4 sm:$0xff]  }
 0x3f6   : > { %3749 = vmatpush2.bf16.msra.mxu0 %v5724_v34  ;;  %v5825_v34 = vld [vmem:[#allocation14 + $0x104] ss:$8 sps:$4 sm:$0xff]  }
 0x3f7   : > { %3790 = vmatpush2.bf16.msra.mxu1 %v5727_v35  ;;  %3750 = vmatprep.subr.bf16.mxu0 %v5732_v38  ;;  %v5781_v35 = vld [vmem:[#allocation14 + $0xe0] ss:$8 sps:$4 sm:$0xff]  }
 0x3f8   : > { %3791 = vmatprep.subr.bf16.mxu1 %v5735_v39  ;;  %v5823_v38 = vld [vmem:[#allocation14 + $0x100] ss:$8 sps:$4 sm:$0xff]   ;;  %v5786_v39 = vld [vmem:[#allocation14 + $0xd4] ss:$8 sps:$4 sm:$0xff]  }
 0x3fa   : > { %3751 = vmatpush2.bf16.msra.mxu0 %v5730_v40  ;;  %v5828_v40 = vld [vmem:[#allocation14 + $0x1f4] ss:$8 sps:$4 sm:$0xff]  }
 0x3fb   : > { %3792 = vmatpush2.bf16.msra.mxu1 %v5733_v41  ;;  %3752 = vmatprep.subr.bf16.mxu0 %v5738_v42  ;;  %v5784_v41 = vld [vmem:[#allocation14 + $0xd0] ss:$8 sps:$4 sm:$0xff]  }
 0x3fc   : > { %3793 = vmatprep.subr.bf16.mxu1 %v5741_v43  ;;  %v5826_v42 = vld [vmem:[#allocation14 + $0x1f0] ss:$8 sps:$4 sm:$0xff]   ;;  %v5789_v43 = vld [vmem:[#allocation14 + $0xc4] ss:$8 sps:$4 sm:$0xff]  }
 0x3fe   : > { %3753 = vmatpush2.bf16.msra.mxu0 %v5736_v44  ;;  %v5831_v44 = vld [vmem:[#allocation14 + $0x1e4] ss:$8 sps:$4 sm:$0xff]  }
 0x3ff   : > { %3794 = vmatpush2.bf16.msra.mxu1 %v5739_v45  ;;  %3754 = vmatprep.subr.bf16.mxu0 %v5744_v46  ;;  %v5787_v45 = vld [vmem:[#allocation14 + $0xc0] ss:$8 sps:$4 sm:$0xff]  }
 0x400   : > { %3795 = vmatprep.subr.bf16.mxu1 %v5747_v47  ;;  %v5829_v46 = vld [vmem:[#allocation14 + $0x1e0] ss:$8 sps:$4 sm:$0xff]   ;;  %v5792_v47 = vld [vmem:[#allocation14 + $0xb4] ss:$8 sps:$4 sm:$0xff]  }
 0x402   : > { %3755 = vmatpush2.bf16.msra.mxu0 %v5742_v48  ;;  %v5834_v48 = vld [vmem:[#allocation14 + $0x1d4] ss:$8 sps:$4 sm:$0xff]  }
 0x403   : > { %3796 = vmatpush2.bf16.msra.mxu1 %v5745_v49  ;;  %3756 = vmatprep.subr.bf16.mxu0 %v5750_v50  ;;  %v5790_v49 = vld [vmem:[#allocation14 + $0xb0] ss:$8 sps:$4 sm:$0xff]  }
 0x404   : > { %3797 = vmatprep.subr.bf16.mxu1 %v5753_v51  ;;  %v5832_v50 = vld [vmem:[#allocation14 + $0x1d0] ss:$8 sps:$4 sm:$0xff]   ;;  %v5795_v51 = vld [vmem:[#allocation14 + $0xa4] ss:$8 sps:$4 sm:$0xff]  }
 0x406   : > { %3757 = vmatpush2.bf16.msra.mxu0 %v5748_v53  ;;  %v5837_v53 = vld [vmem:[#allocation14 + $0x1c4] ss:$8 sps:$4 sm:$0xff]  }
 0x407   : > { %3798 = vmatpush2.bf16.msra.mxu1 %v5751_v54  ;;  %4212 = vmatprep.subr.bf16.mxu0 %v5756_v55  ;;  %v5793_v54 = vld [vmem:[#allocation14 + $0xa0] ss:$8 sps:$4 sm:$0xff]  }
 0x408   : > { %v5835_v55 = vld [vmem:[#allocation14 + $0x1c0] ss:$8 sps:$4 sm:$0xff]  }
 0x409   : > { %v6838_v57 = vpop.f32.mrf.mxu0  ;;  %3759 = vmatmul.mubr.bf16.vlgmr.msra.gmra.mxu0 %v6824_v36  ;;  %v5804_v36 = vld [vmem:[#allocation14 + $0x174] ss:$8 sps:$4 sm:$0xff]  }
 0x40a   : > { %v6840_v58 = vpop.f32.mrf.mxu1  ;;  %3800 = vmatmul.mubr.bf16.vlgmr.msra.gmra.mxu1 %v6828_v37  ;;  %4213 = vmatpush1.bf16.msra.mxu0 %v5754_v56  ;;  %v5763_v37 = vld [vmem:[#allocation14 + $0x40] ss:$8 sps:$4 sm:$0xff]   ;;  %v5798_v56 = vld [vmem:[#allocation14 + $0x94] ss:$8 sps:$4 sm:$0xff]  }
 0x40b   : > { %v6844_v61 = vpop.f32.mrf.mxu0  ;;  %4214 = vmatprep.subr.bf16.mxu0 %v5759_v60  ;;  %4253 = vmatprep.subr.bf16.mxu1 %v5804_v36  ;;  %v5840_v60 = vld [vmem:[#allocation14 + $0x1b4] ss:$8 sps:$4 sm:$0xff]   ;;  %v5843_v36 = vld [vmem:[#allocation14 + $0x1a4] ss:$8 sps:$4 sm:$0xff]  }
 0x40c   : > { %v6846_v0 = vpop.f32.mrf.mxu1  ;;  %4254 = vmatpush1.bf16.msra.mxu1 %v5802_v4 }
 0x40d   : > { %v3518_v2 = vpop.f32.mrf.mxu0  ;;  %4255 = vmatprep.subr.bf16.mxu1 %v5807_v7 }
 0x40e   : > { %v3559_v3 = vpop.f32.mrf.mxu1  ;;  %4215 = vmatpush1.bf16.msra.mxu0 %v5757_v63  ;;  %v6848_v63 = vld [vmem:[#allocation12] sm:$0xf]  ;;  %v5838_v2 = vld [vmem:[#allocation14 + $0x1b0] ss:$8 sps:$4 sm:$0xff]  }
 0x40f   : > { %v3519_v52 = vpop.f32.mrf.mxu0  ;;  %4216 = vmatprep.subr.bf16.mxu0 %v5762_v62  ;;  %v5796_v62 = vld [vmem:[#allocation14 + $0x90] ss:$8 sps:$4 sm:$0xff]   ;;  %v5801_v3 = vld [vmem:[#allocation14 + $0x84] ss:$8 sps:$4 sm:$0xff]  }
 0x410   : > { %v3560_v6 = vpop.f32.mrf.mxu1  ;;  %4256 = vmatpush1.bf16.msra.mxu1 %v5805_v8  ;;  %v2187_v52 = vrot.slane %v6848_v63, %v6685_v31 }
 0x411   : > { %4257 = vmatprep.subr.bf16.mxu1 %v5810_v10  ;;  %v5799_v6 = vld [vmem:[#allocation14 + $0x80] ss:$8 sps:$4 sm:$0xff]  }
 0x412   : > { %4217 = vmatpush1.bf16.msra.mxu0 %v5760_v5  ;;  %v2183_v5 = vrot.slane %v6848_v63, %v6681_v29  ;;  %v3517_v4 = vadd.f32 %v6844_v61, %v2187_v52 }
 0x413   : > { %4218 = vmatprep.subr.bf16.mxu0 %v5765_v59 }
 0x414   : > { %4258 = vmatpush1.bf16.msra.mxu1 %v5808_v12  ;;  %v3515_v59 = vadd.f32 %v6838_v57, %v2183_v5  ;;  %v3558_v10 = vadd.f32 %v6846_v0, %v3517_v4  ;;  %v5844_v57 = vld [vmem:[#allocation14 + $0x190] ss:$8 sps:$4 sm:$0xff]  }
 0x415   : > { %4259 = vmatprep.subr.bf16.mxu1 %v5813_v14  ;;  %v5846_v14 = vld [vmem:[#allocation14 + $0x194] ss:$8 sps:$4 sm:$0xff]  }
 0x416   : > { %4219 = vmatpush1.bf16.msra.mxu0 %v5763_v37  ;;  %v3556_v7 = vadd.f32 %v6840_v58, %v3515_v59  ;;  %v5841_v37 = vld [vmem:[#allocation14 + $0x1a0] ss:$8 sps:$4 sm:$0xff]  }
 0x417   : > { %4220 = vmatprep.subr.bf16.mxu0 %v5768_v9 }
 0x418   : > { %4260 = vmatpush1.bf16.msra.mxu1 %v5811_v18 }
 0x419   : > { %4261 = vmatprep.subr.bf16.mxu1 %v5816_v20 }
 0x41a   : > { %4221 = vmatpush1.bf16.msra.mxu0 %v5766_v11 }
 0x41b   : > { %4222 = vmatprep.subr.bf16.mxu0 %v5771_v13 }
 0x41c   : > { %4262 = vmatpush1.bf16.msra.mxu1 %v5814_v22 }
 0x41d   : > { %4263 = vmatprep.subr.bf16.mxu1 %v5819_v24 }
 0x41e   : > { %4223 = vmatpush1.bf16.msra.mxu0 %v5769_v1 }
 0x41f   : > { %4224 = vmatprep.subr.bf16.mxu0 %v5774_v19 }
 0x420   : > { %4264 = vmatpush1.bf16.msra.mxu1 %v5817_v26 }
 0x421   : > { %4265 = vmatprep.subr.bf16.mxu1 %v5822_v17 }
 0x422   : > { %4225 = vmatpush1.bf16.msra.mxu0 %v5772_v21 }
 0x423   : > { %4226 = vmatprep.subr.bf16.mxu0 %v5777_v23  ;;  %v5849_v23 = vld [vmem:[#allocation14 + $0x184] ss:$8 sps:$4 sm:$0xff]  }
 0x424   : > { %4266 = vmatpush1.bf16.msra.mxu1 %v5820_v32 }
 0x425   : > { %4267 = vmatprep.subr.bf16.mxu1 %v5825_v34 }
 0x426   : > { %4227 = vmatpush1.bf16.msra.mxu0 %v5775_v25  ;;  %v5847_v25 = vld [vmem:[#allocation14 + $0x180] ss:$8 sps:$4 sm:$0xff]  }
 0x427   : > { %4228 = vmatprep.subr.bf16.mxu0 %v5780_v27 }
 0x428   : > { %4268 = vmatpush1.bf16.msra.mxu1 %v5823_v38 }
 0x429   : > { %4269 = vmatprep.subr.bf16.mxu1 %v5828_v40  ;;  %v5851_v40 = vld [vmem:[#allocation17 + $0x38] sm:$0xff]  }
 0x42a   : > { %4229 = vmatpush2.bf16.msra.mxu0 %v5778_v30 }
 0x42b   : > { %4230 = vmatprep.subr.bf16.mxu0 %v5783_v33 }
 0x42c   : > { %4270 = vmatpush2.bf16.msra.mxu1 %v5826_v42  ;;  %v5853_v42 = vld [vmem:[#allocation17 + $0x30] sm:$0xff]  }
 0x42d   : > { %4271 = vmatprep.subr.bf16.mxu1 %v5831_v44  ;;  %v5855_v44 = vld [vmem:[#allocation17 + $0x28] sm:$0xff]  }
 0x42e   : > { %4231 = vmatpush2.bf16.msra.mxu0 %v5781_v35 }
 0x42f   : > { %4232 = vmatprep.subr.bf16.mxu0 %v5786_v39  ;;  %v5850_v39 = vld [vmem:[#allocation17 + $0x78] sm:$0xff]  }
 0x430   : > { %4272 = vmatpush2.bf16.msra.mxu1 %v5829_v46  ;;  %v5857_v46 = vld [vmem:[#allocation17 + $0x20] sm:$0xff]  }
 0x431   : > { %4273 = vmatprep.subr.bf16.mxu1 %v5834_v48  ;;  %v5859_v48 = vld [vmem:[#allocation17 + $0x18] sm:$0xff]  }
 0x432   : > { %4233 = vmatpush2.bf16.msra.mxu0 %v5784_v41  ;;  %v5852_v41 = vld [vmem:[#allocation17 + $0x70] sm:$0xff]  }
 0x433   : > { %4234 = vmatprep.subr.bf16.mxu0 %v5789_v43  ;;  %v5854_v43 = vld [vmem:[#allocation17 + $0x68] sm:$0xff]  }
 0x434   : > { %4274 = vmatpush2.bf16.msra.mxu1 %v5832_v50  ;;  %v5861_v50 = vld [vmem:[#allocation17 + $0x10] sm:$0xff]  }
 0x435   : > { %4275 = vmatprep.subr.bf16.mxu1 %v5837_v53  ;;  %v2195_v53 = vrot.slane %v6848_v63, %v1812_v16 }
 0x436   : > { %4235 = vmatpush2.bf16.msra.mxu0 %v5787_v45  ;;  %v5856_v45 = vld [vmem:[#allocation17 + $0x60] sm:$0xff]  }
 0x437   : > { %4236 = vmatprep.subr.bf16.mxu0 %v5792_v47  ;;  %v5858_v47 = vld [vmem:[#allocation17 + $0x58] sm:$0xff]  }
 0x438   : > { %4276 = vmatpush2.bf16.msra.mxu1 %v5835_v55 }
 0x439   : > { %4277 = vmatprep.subr.bf16.mxu1 %v5840_v60 }
 0x43a   : > { %4237 = vmatpush2.bf16.msra.mxu0 %v5790_v49  ;;  %v5860_v49 = vld [vmem:[#allocation17 + $0x50] sm:$0xff]  }
 0x43b   : > { %4238 = vmatprep.subr.bf16.mxu0 %v5795_v51  ;;  %v2191_v51 = vrot.slane %v6848_v63, %v1808_v15 }
 0x43c   : > { %4278 = vmatpush2.bf16.msra.mxu1 %v5838_v2 }
 0x43d   : > { %4279 = vmatprep.subr.bf16.mxu1 %v5843_v36 }
 0x43e   : > { %4239 = vmatpush2.bf16.msra.mxu0 %v5793_v54 }
 0x43f   : > { %4240 = vmatprep.subr.bf16.mxu0 %v5798_v56 }
 0x440   : > { %4280 = vmatpush2.bf16.msra.mxu1 %v5841_v37 }
 0x441   : > { %4281 = vmatprep.subr.bf16.mxu1 %v5846_v14  ;;  %v5864_v14 = vld [vmem:[#allocation17 + $0x40] sm:$0xff]  }
 0x442   : > { %4241 = vmatpush2.bf16.msra.mxu0 %v5796_v62 }
 0x443   : > { %4242 = vmatprep.subr.bf16.mxu0 %v5801_v3 }
 0x444   : > { %4282 = vmatpush2.bf16.msra.mxu1 %v5844_v57  ;;  %v3880_v57 = vld [vmem:[#allocation15] sm:$0x3] }
 0x445   : > { %4283 = vmatprep.subr.bf16.mxu1 %v5849_v23 }
 0x446   : > { %4243 = vmatpush2.bf16.msra.mxu0 %v5799_v6 }
 0x447   : > { %5177 = vmatprep.subr.bf16.mxu0 %v5850_v39 }
 0x448   : > { %4284 = vmatpush2.bf16.msra.mxu1 %v5847_v25 }
 0x449   : > { %v3596_v8 = vpop.f32.mrf.mxu0 }
 0x44a   : > { %v3637_v9 = vpop.f32.mrf.mxu1  ;;  %v3597_v11 = vadd.f32 %v3596_v8, %v3556_v7 }
 0x44b   : > { %v3598_v12 = vpop.f32.mrf.mxu0 }
 0x44c   : > { %v3639_v13 = vpop.f32.mrf.mxu1  ;;  %v3638_v1 = vadd.f32 %v3637_v9, %v3597_v11  ;;  %v3599_v18 = vadd.f32 %v3598_v12, %v3558_v10  ;;  %v5862_v10 = vld [vmem:[#allocation17 + $0x48] sm:$0xff]  }
 0x44d   : > { %v3600_v19 = vpop.f32.mrf.mxu0  ;;  %v5863_v11 = vld [vmem:[#allocation17 + $0x8] sm:$0xff]  }
 0x44e   : > { %v3641_v61 = vpop.f32.mrf.mxu1  ;;  %v3640_v20 = vadd.f32 %v3639_v13, %v3599_v18  ;;  %v3808_v58 = vmax.f32 %v3638_v1, 0.0  ;;  %v5865_v1 = vld [vmem:[#allocation17] sm:$0xff]   ;;  %v3885_v19 = vrot.slane %v3880_v57, %v6681_v29 }
 0x44f   : > { %v3601_v21 = vpop.f32.mrf.mxu0  ;;  %v3889_v61 = vrot.slane %v3880_v57, %v6685_v31 }
 0x450   : > { %v3642_v22 = vpop.f32.mrf.mxu1  ;;  %v3809_v24 = vmax.f32 %v3640_v20, 0.0  ;;  %v3812_v26 = vpack.c.bf16 %v3808_v58, %v3808_v58 }
 0x452   : > { %v3813_v0 = vpack.c.bf16 %v3809_v24, %v3809_v24 }
 0x454   : > { %4244 = vmatprep.mubr.bf16.mxu0 %v3813_v0 }
 0x455   : > { %4245 = vmatmul.mubr.bf16.vlgmr.msra.gmra.mxu0 %v3812_v26 }
 0x456   : > { %5178 = vmatpush3.bf16.msra.mxu0 %v5851_v40 }
 0x457   : > { %5179 = vmatprep.subr.bf16.mxu0 %v5852_v41 }
 0x45a   : > { %5180 = vmatpush3.bf16.msra.mxu0 %v5853_v42 }
 0x45b   : > { %5181 = vmatprep.subr.bf16.mxu0 %v5854_v43 }
 0x45e   : > { %5182 = vmatpush3.bf16.msra.mxu0 %v5855_v44 }
 0x45f   : > { %5183 = vmatprep.subr.bf16.mxu0 %v5856_v45 }
 0x462   : > { %5184 = vmatpush3.bf16.msra.mxu0 %v5857_v46 }
 0x463   : > { %5185 = vmatprep.subr.bf16.mxu0 %v5858_v47 }
 0x466   : > { %5186 = vmatpush3.bf16.msra.mxu0 %v5859_v48 }
 0x467   : > { %5187 = vmatprep.subr.bf16.mxu0 %v5860_v49 }
 0x46a   : > { %5188 = vmatpush3.bf16.msra.mxu0 %v5861_v50 }
 0x46b   : > { %5189 = vmatprep.subr.bf16.mxu0 %v5862_v10 }
 0x46e   : > { %5190 = vmatpush3.bf16.msra.mxu0 %v5863_v11 }
 0x46f   : > { %5191 = vmatprep.subr.bf16.mxu0 %v5864_v14 }
 0x472   : > { %5192 = vmatpush3.bf16.msra.mxu0 %v5865_v1 }
 0x489   : > { %v3678_v27 = vpop.f32.mrf.mxu0 }
 0x48a   : > { %v3719_v17 = vpop.f32.mrf.mxu1  ;;  %v3679_v54 = vadd.f32 %v3678_v27, %v2191_v51 }
 0x48b   : > { %v3680_v30 = vpop.f32.mrf.mxu0 }
 0x48c   : > { %v3721_v32 = vpop.f32.mrf.mxu1  ;;  %v3681_v55 = vadd.f32 %v3680_v30, %v2195_v53  ;;  %v3720_v56 = vadd.f32 %v3719_v17, %v3679_v54 }
 0x48d   : > { %v3682_v33 = vpop.f32.mrf.mxu0 }
 0x48e   : > { %v3723_v34 = vpop.f32.mrf.mxu1  ;;  %v3722_v2 = vadd.f32 %v3721_v32, %v3681_v55  ;;  %v5152_v33 = vld [vmem:[#allocation18] ss:$0 sm:$0xff] }
 0x48f   : > { %v3683_v35 = vpop.f32.mrf.mxu0 }
 0x490   : > { %v3724_v38 = vpop.f32.mrf.mxu1 }
 0x4c9   : > { %v3760_v60 = vpop.f32.mrf.mxu0 }
 0x4ca   : > { %v3801_v62 = vpop.f32.mrf.mxu1  ;;  %v3761_v3 = vadd.f32 %v3760_v60, %v3720_v56 }
 0x4cb   : > { %v3762_v5 = vpop.f32.mrf.mxu0 }
 0x4cc   : > { %v3803_v52 = vpop.f32.mrf.mxu1  ;;  %v3802_v6 = vadd.f32 %v3801_v62, %v3761_v3  ;;  %v3763_v59 = vadd.f32 %v3762_v5, %v3722_v2 }
 0x4cd   : > { %v3764_v4 = vpop.f32.mrf.mxu0 }
 0x4ce   : > { %v3805_v36 = vpop.f32.mrf.mxu1  ;;  %v3804_v7 = vadd.f32 %v3803_v52, %v3763_v59  ;;  %v3810_v37 = vmax.f32 %v3802_v6, 0.0 }
 0x4cf   : > { %v3765_v15 = vpop.f32.mrf.mxu0 }
 0x4d0   : > { %v3806_v8 = vpop.f32.mrf.mxu1  ;;  %v3811_v28 = vmax.f32 %v3804_v7, 0.0  ;;  %v3814_v16 = vpack.c.bf16 %v3810_v37, %v3810_v37 }
 0x4d2   : > { %v3815_v9 = vpack.c.bf16 %v3811_v28, %v3811_v28 }
 0x4d4   : > { %4285 = vmatprep.mubr.bf16.mxu1 %v3815_v9 }
 0x4d5   : > { %4286 = vmatmul.mubr.bf16.vlgmr.msra.gmra.mxu1 %v3814_v16 }
 0x515   : > { %v4246_v63 = vpop.f32.mrf.mxu0 }
 0x516   : > { %v4247_v20 = vadd.f32 %v4246_v63, %v3885_v19 }
 0x517   : > { %v4248_v12 = vpop.f32.mrf.mxu0 }
 0x518   : > { %v4249_v21 = vadd.f32 %v4248_v12, %v3889_v61 }
 0x519   : > { %v4250_v13 = vpop.f32.mrf.mxu0 }
 0x51b   : > { %v4251_v18 = vpop.f32.mrf.mxu0 }
 0x595   : > { %v4287_v58 = vpop.f32.mrf.mxu1 }
 0x596   : > { %v4288_v22 = vadd.f32 %v4287_v58, %v4247_v20 }
 0x597   : > { %v4289_v23 = vpop.f32.mrf.mxu1 }
 0x598   : > { %v4290_v24 = vadd.f32 %v4289_v23, %v4249_v21  ;;  %v4294_v25 = vmax.f32 %v4288_v22, 0.0 }
 0x599   : > { %v4291_v0 = vpop.f32.mrf.mxu1 }
 0x59a   : > { %v4295_v26 = vmax.f32 %v4290_v24, 0.0  ;;  %v4296_v30 = vpack.c.bf16 %v4294_v25, %v4294_v25 }
 0x59b   : > { %v4292_v27 = vpop.f32.mrf.mxu1 }
 0x59c   : > { %v4297_v17 = vpack.c.bf16 %v4295_v26, %v4295_v26 }
 0x59e   : > { %4465 = vmatprep.mubr.bf16.mxu0 %v4297_v17 }
 0x59f   : > { %4466 = vmatmul.mubr.bf16.vlgmr.msra.gmra.mxu0 %v4296_v30 }
 0x65f   : > { %v5193_v32 = vpop.f32.mrf.mxu0 }
 0x661   : > { %v5194_v34 = vpop.f32.mrf.mxu0 }
 0x662   : > { %v5195_v29 = vadd.f32 %v5194_v34, %v5193_v32 }
 0x663   : > { %v5196_v35 = vpop.f32.mrf.mxu0 }
 0x664   : > { %v4468_v31 = vadd.f32 %v5195_v29, %v5152_v33 }
 0x665   : > { %v5197_v38 = vpop.f32.mrf.mxu0 }
 0x666   : > { %4473 = vst [vmem:[#allocation20] sm:$0x3] %v4468_v31 }
 0x667 PF: > { %p5284_p4 = scmp.eq.s32.totalorder %s6325_s27, 6  ;;  %s6238_s17 = smov [#allocation20]  }
 0x668   : > { %s4481_s18 = sshll.u32 %s6238_s17, 4  ;;  %s4482_s18 = int_to_ptr.vmem [resolvable:$true] %s4481_s18 }
 0x669   : > { %s6132_s12 = scalar_lea.vmem %s4482_s18, 32  ;;  %p6139_p5 = scmp.lt.s32.totalorder %s4482_s18, %s4482_s18 }
 0x66a   : > { %p6133_p3 = scmp.ne.s32.totalorder %s4482_s18, %s6132_s12  ;;  %p6140_p8 = scmp.lt.s32.totalorder %s6132_s12, %s6132_s12 }
 0x66c   : > { %p6134_p0 = pnand %p6133_p3, %p5284_p4  ;;  %p6141_p9 = por %p6140_p8, %p6139_p5 }
 0x66e   : > { %p6135_p13 = pneg %p6134_p0 }
 0x670   : > { %p6142_p10 = pnand %p6141_p9, %p6135_p13 }
 0x672   : > { %6145 = shalt.err (!%p6142_p10)
}
 0x673   : > { %s6950_s29 = sld [smem:[#allocation35_spill]] }
 0x679   : > { %5234 = dma.vmem_to_hbm [thread:$0]  (%p5284_p4), %s4482_s18, 32, %s6950_s29, [#allocation5]  }
 0x67a   : > { %6197 = dma.done.wait (%p5284_p4), [#allocation5], 32  }
 0x67b   : > { %6199 = vsyncadd (%p5284_p4), [#allocation5], 4294967264 }
 0x67c PF: > { %s6951_s24 = sld [smem:[#allocation29_spill]]  ;;  %s6954_s21 = smov %s6206_s22 }
 0x67d   : > { %s6952_s26 = sld [smem:[#allocation28_spill]] }
 0x67e   : > { %s6953_s23 = sld [smem:[#allocation30_spill]] }
 0x682   : > { %p30_p12 = scmp.ge.s32.totalorder %s6951_s24, 9  }
 0x683   : > { %s6955_s22 = smov %s6952_s26 }
 0x684   :  { %32 = sbr.rel (!%p30_p12) target bundleno = 16 (0x10), region = 168 }
 0x689   :  { %4494 = vsyncpa [#allocation4], 1 }
 0x68a   :  { %4496 = vsyncpa [#allocation4 + $0x1], 1 }
 0x68b   :  { %4497 = vsyncpa [#allocation7], 1 }
 0x68c   :  { %4499 = vsyncpa [#allocation7 + $0x1], 1 }
 0x68d   :  { %4500 = vsyncpa [#allocation10], 1 }
 0x68e   :  { %4501 = vsyncpa [#allocation13], 1 }
 0x68f   :  { %4502 = vsyncpa [#allocation16], 1 }
 0x690   :  { %4503 = vsyncpa [#allocation19], 1 }
 0x691   :  { %4504 = vsyncpa [#allocation5], 1 }
 0x692   :  { %4506 = vsyncpa [#allocation5 + $0x1], 1 }

</bundles_post_ra>
